<compile_context>
chip_gen: v6e
topology: v6e:2x2x1
jax: 0.10.0
libtpu: 0.0.40
codegen_flags: <defaults>
</compile_context>

<pallas_src>
import jax
import jax.numpy as jnp
from jax import lax
from jax.experimental import pallas as pl
from jax.experimental.pallas import tpu as pltpu

KSIZE = 7
PAD = 3
ROW_OFF = 8                     # sublane-aligned row offset of the map (>= PAD)
TARGET_BLOCK_BYTES = 4 << 20    # ~4 MiB input block per grid step (HBM roofline)
DEFAULT_SUB_ELEMS = 4096        # batch sub-chunk cap: BB*H*W <= this (vreg budget)
DEFAULT_CH_CHUNK = 8            # channels reduced per inner-loop iteration


def _largest_divisor_leq(n, cap):
    cap = int(max(1, min(n, cap)))
    for d in range(cap, 0, -1):
        if n % d == 0:
            return d
    return 1


def _pairwise_sum(vals):
    vals = list(vals)
    while len(vals) > 1:
        nxt = [vals[i] + vals[i + 1] for i in range(0, len(vals) - 1, 2)]
        if len(vals) % 2:
            nxt.append(vals[-1])
        vals = nxt
    return vals[0]


def _make_kernel(sub_elems, ch_chunk):
    """Builds the kernel body; all tiling params below are static Python ints."""

    def kernel(w_ref, x_ref, o_ref, sum_sc, max_sc):
        # w_ref  : (2*49,) f32 in SMEM (scalar-prefetched); first 49 = avg taps
        #          pre-divided by C, last 49 = max taps.
        # x_ref  : (nb, ct, H, W) input block in VMEM (one channel tile).
        # o_ref  : (nb, 1, H, W) output block (revisited across the C axis).
        # sum_sc : (nb, r0+H+PAD, c0+W+PAD) f32 padded staging: running channel
        #          sum at the (r0, c0) corner; the zero frame implements the
        #          conv's zero padding.
        # max_sc : same layout, running channel max.
        nb, ct, H, W = x_ref.shape
        rows, cols = sum_sc.shape[-2], sum_sc.shape[-1]
        r0 = rows - (H + PAD)          # sublane offset of the map interior
        c0 = cols - (W + PAD)          # lane offset of the map interior (>= PAD)

        c_idx = pl.program_id(1)
        is_first = c_idx == 0
        is_last = c_idx == pl.num_programs(1) - 1

        # Static sub-tiling so the vreg live set stays bounded even for large
        # (nb, ct) blocks (review items on chunked reduction / NACC pressure).
        BB = _largest_divisor_leq(nb, max(1, sub_elems // (H * W)))
        CH = _largest_divisor_leq(ct, ch_chunk)
        n_sub = nb // BB
        n_ch = ct // CH
        NACC = 4 if BB * H * W <= 4096 else 2

        def reduce_channels(b):
            # Single pass over this sub-chunk's channel tile: running sum+max.
            def one_chunk(c_start, s, m):
                xc = x_ref[pl.ds(b, BB), pl.ds(c_start, CH), :, :].astype(jnp.float32)
                return s + jnp.sum(xc, axis=1), jnp.maximum(m, jnp.max(xc, axis=1))

            s0 = jnp.zeros((BB, H, W), jnp.float32)
            m0 = jnp.full((BB, H, W), -jnp.inf, dtype=jnp.float32)
            if n_ch == 1:
                return one_chunk(0, s0, m0)

            def body(ci, carry):
                s, m = carry
                return one_chunk(ci * CH, s, m)

            return lax.fori_loop(0, n_ch, body, (s0, m0), unroll=(n_ch <= 8))

        def zero_frame(sc, bsl):
            # Zero only the 3-wide frame around the map (never overwritten by
            # the interior stores); this is the conv's zero padding.
            z_tb = jnp.zeros((BB, PAD, W + 2 * PAD), jnp.float32)
            z_lr = jnp.zeros((BB, H, PAD), jnp.float32)
            sc[bsl, r0 - PAD:r0, c0 - PAD:c0 + W + PAD] = z_tb
            sc[bsl, r0 + H:r0 + H + PAD, c0 - PAD:c0 + W + PAD] = z_tb
            sc[bsl, r0:r0 + H, c0 - PAD:c0] = z_lr
            sc[bsl, r0:r0 + H, c0 + W:c0 + W + PAD] = z_lr

        def process_sub(b):
            bsl = pl.ds(b, BB)
            tile_sum, tile_max = reduce_channels(b)

            @pl.when(is_first)
            def _init():
                zero_frame(sum_sc, bsl)
                zero_frame(max_sc, bsl)
                sum_sc[bsl, r0:r0 + H, c0:c0 + W] = tile_sum
                max_sc[bsl, r0:r0 + H, c0:c0 + W] = tile_max

            @pl.when(c_idx > 0)
            def _accumulate():
                cur_s = sum_sc[bsl, r0:r0 + H, c0:c0 + W]
                cur_m = max_sc[bsl, r0:r0 + H, c0:c0 + W]
                sum_sc[bsl, r0:r0 + H, c0:c0 + W] = cur_s + tile_sum
                max_sc[bsl, r0:r0 + H, c0:c0 + W] = jnp.maximum(cur_m, tile_max)

            @pl.when(is_last)
            def _conv_and_store():
                # 7x7 conv over the zero-padded [avg | max] maps, then sigmoid.
                accs = [jnp.zeros((BB, H, W), jnp.float32) for _ in range(NACC)]
                for kw in range(KSIZE):
                    lo = c0 - PAD + kw
                    # Only the H+6 rows the conv can touch; one lane-shifted
                    # slab per map per kw (14 windowed loads total).
                    slab_avg = sum_sc[bsl, r0 - PAD:r0 + H + PAD, lo:lo + W]
                    slab_max = max_sc[bsl, r0 - PAD:r0 + H + PAD, lo:lo + W]
                    for kh in range(KSIZE):
                        w_avg = w_ref[kh * KSIZE + kw]               # 1/C pre-folded
                        w_max = w_ref[KSIZE * KSIZE + kh * KSIZE + kw]
                        term = (w_avg * slab_avg[:, kh:kh + H, :]
                                + w_max * slab_max[:, kh:kh + H, :])
                        accs[kh % NACC] = accs[kh % NACC] + term
                acc = _pairwise_sum(accs)
                out = jax.nn.sigmoid(acc)[:, None, :, :].astype(o_ref.dtype)
                o_ref[bsl, :, :, :] = out

        if n_sub == 1:
            process_sub(0)
        else:
            def sub_body(bi, carry):
                process_sub(pl.multiple_of(bi * BB, BB))
                return carry
            lax.fori_loop(0, n_sub, sub_body, 0)

    return kernel


def spatial_attention(x, w, *, nb=None, ct=None,
                      target_block_bytes=TARGET_BLOCK_BYTES,
                      sub_elems=DEFAULT_SUB_ELEMS,
                      ch_chunk=DEFAULT_CH_CHUNK):
    """x: (N, C, H, W); w: (1, 2, 7, 7) conv weight.  Returns (N, 1, H, W)."""
    N, C, H, W = x.shape
    assert w.shape == (1, 2, KSIZE, KSIZE), w.shape
    itemsize = jnp.dtype(x.dtype).itemsize

    # ---- block sizing (review item 1 / v7x megacore item) -------------------
    # Grow the channel tile first (doesn't grow the vreg live set), then pack
    # batch images, targeting ~target_block_bytes per input block.  Keep at
    # least two batch blocks when N >= 2 so the "parallel" axis splits across
    # two TensorCores on v7x.
    if ct is None:
        ct = _largest_divisor_leq(C, max(1, target_block_bytes // (H * W * itemsize)))
    if nb is None:
        per_img = ct * H * W * itemsize
        nb_cap = max(1, target_block_bytes // per_img)
        if N >= 2:
            nb_cap = min(nb_cap, N // 2)
        nb = _largest_divisor_leq(N, nb_cap)
    assert N % nb == 0, (N, nb)
    assert C % ct == 0, (C, ct)

    # Fold the channel-mean 1/C into the avg-channel taps so the kernel only
    # keeps a running channel sum.
    w_eff = w.astype(jnp.float32).reshape(2, KSIZE * KSIZE)
    w_eff = w_eff * jnp.array([[1.0 / C], [1.0]], dtype=jnp.float32)
    w_flat = w_eff.reshape(-1)          # index = chan * 49 + kh * 7 + kw

    # Padded staging scratch: interior at (ROW_OFF, lane_off).  The lane gutter
    # is only 3 wide for W < 128 (stores are masked there anyway); wide maps
    # keep a 128-aligned interior for unmasked stores.
    lane_off = 128 if W >= 128 else PAD
    rows = ROW_OFF + H + PAD
    cols = lane_off + W + PAD

    # ---- VMEM budget derived from actual buffers (not a hardcoded 32 MiB) ---
    in_block = nb * ct * H * W * itemsize
    out_block = nb * H * W * itemsize
    rows_phys = -(-rows // 8) * 8
    cols_phys = -(-cols // 128) * 128
    scratch_bytes = 2 * nb * rows_phys * cols_phys * 4
    needed = 2 * in_block + 2 * out_block + scratch_bytes + (4 << 20)
    # 48 MiB is comfortably within v5e/v6e's 128 MiB and the recommended cap
    # for v7x's 64 MiB; explicit oversized user blocks pass their own need.
    vmem_limit = int(max(needed, 48 << 20))

    grid = (N // nb, C // ct)
    kernel = _make_kernel(sub_elems, ch_chunk)
    return pl.pallas_call(
        kernel,
        out_shape=jax.ShapeDtypeStruct((N, 1, H, W), x.dtype),
        grid_spec=pltpu.PrefetchScalarGridSpec(
            num_scalar_prefetch=1,
            grid=grid,
            in_specs=[
                # NOTE: if blocks end up small, pipeline_mode=pl.Buffered(3)
                # here is a cheap extra-buffer sweep.
                pl.BlockSpec((nb, ct, H, W), lambda n, c, w_r: (n, c, 0, 0)),
            ],
            out_specs=pl.BlockSpec((nb, 1, H, W), lambda n, c, w_r: (n, 0, 0, 0)),
            scratch_shapes=[
                pltpu.VMEM((nb, rows, cols), jnp.float32),   # running channel sum
                pltpu.VMEM((nb, rows, cols), jnp.float32),   # running channel max
            ],
        ),
        compiler_params=pltpu.CompilerParams(
            # Batch-block axis parallel (v7x: two TCs split it); channel axis
            # reduces into the scratch buffers -> arbitrary.
            dimension_semantics=("parallel", "arbitrary"),
            vmem_limit_bytes=vmem_limit,
        ),
    )(w_flat, x)


def spatial_attention_reference(x, w):
    avg = jnp.mean(x, axis=1, keepdims=True)
    mx = jnp.max(x, axis=1, keepdims=True)
    cat = jnp.concatenate([avg, mx], axis=1)
    out = lax.conv_general_dilated(
        cat, w,
        window_strides=(1, 1),
        padding=((PAD, PAD), (PAD, PAD)),
        dimension_numbers=("NCHW", "OIHW", "NCHW"),
    )
    return jax.nn.sigmoid(out)


if __name__ == "__main__":
    key = jax.random.PRNGKey(0)
    kx, kw = jax.random.split(key)

    N, C, H, W = 2, 4, 16, 16
    x = jax.random.normal(kx, (N, C, H, W), dtype=jnp.float32)
    # nn.Conv2d(2, 1, 7, bias=False) weight: shape (1, 2, 7, 7), deterministic init.
    fan_in = 2 * KSIZE * KSIZE
    bound = (1.0 / fan_in) ** 0.5
    w = jax.random.uniform(kw, (1, 2, KSIZE, KSIZE), dtype=jnp.float32,
                           minval=-bound, maxval=bound)

    ref = spatial_attention_reference(x, w)

    # Default tiling: grid = (2, 1) -> two batch blocks on the parallel axis,
    # one full-channel tile per step.
    out = jax.block_until_ready(spatial_attention(x, w))
    assert out.shape == (N, 1, H, W), out.shape
    assert jnp.allclose(out, ref, atol=1e-5, rtol=1e-5), (
        float(jnp.max(jnp.abs(out - ref))))

    # Channel-tiled + batch-packed path: exercises the running sum/max scratch
    # accumulation across the "arbitrary" C axis with nb > 1.
    out2 = jax.block_until_ready(spatial_attention(x, w, nb=2, ct=2))
    assert jnp.allclose(out2, ref, atol=1e-5, rtol=1e-5), (
        float(jnp.max(jnp.abs(out2 - ref))))

    # Batch-sub-chunked path: forces BB=1 with nb=2 so the in-kernel batch loop
    # (dynamic sub-chunk offsets) and 1-channel reduction chunks are exercised.
    out3 = jax.block_until_ready(
        spatial_attention(x, w, nb=2, ct=4, sub_elems=256, ch_chunk=1))
    assert jnp.allclose(out3, ref, atol=1e-5, rtol=1e-5), (
        float(jnp.max(jnp.abs(out3 - ref))))

    print("KERNEL_OK")
</pallas_src>

<mosaic_0001>
module attributes {stable_mosaic.version = 11 : i64} {
  func.func @kernel(%arg0: i32, %arg1: i32, %arg2: memref<98xf32, #tpu.memory_space<smem>>, %arg3: memref<1x4x16x16xf32, #tpu.memory_space<vmem>>, %arg4: memref<1x1x16x16xf32, #tpu.memory_space<vmem>>, %arg5: memref<1x27x22xf32, #tpu.memory_space<vmem>>, %arg6: memref<1x27x22xf32, #tpu.memory_space<vmem>>) attributes {dimension_semantics = [#tpu.dimension_semantics<parallel>, #tpu.dimension_semantics<arbitrary>], iteration_bounds = array<i64: 2, 1>, scalar_prefetch = 1 : i64, scratch_operands = 2 : i64, tpu.core_type = #tpu.core_type<tc>, window_params = [{transform_indices = @transform_0, window_bounds = array<i64: 1, 4, 16, 16>}, {transform_indices = @transform_1, window_bounds = array<i64: 1, 1, 16, 16>}]} {
    %c0_i32 = arith.constant 0 : i32
    %0 = arith.cmpi eq, %arg1, %c0_i32 : i32
    %c0_i32_0 = arith.constant 0 : i32
    %1 = arith.cmpi eq, %arg1, %c0_i32_0 : i32
    %cst = arith.constant 0.000000e+00 : f32
    %2 = vector.broadcast %cst : f32 to vector<1x16x16xf32>
    %cst_1 = arith.constant 0xFF800000 : f32
    %3 = vector.broadcast %cst_1 : f32 to vector<1x16x16xf32>
    %c0 = arith.constant 0 : index
    %c0_2 = arith.constant 0 : index
    %c0_3 = arith.constant 0 : index
    %c0_4 = arith.constant 0 : index
    %4 = vector.load %arg3[%c0, %c0_2, %c0_3, %c0_4] : memref<1x4x16x16xf32, #tpu.memory_space<vmem>>, vector<1x4x16x16xf32>
    %cst_5 = arith.constant dense<0.000000e+00> : vector<1x16x16xf32>
    %5 = vector.multi_reduction <add>, %4, %cst_5 [1] : vector<1x4x16x16xf32> to vector<1x16x16xf32>
    %6 = arith.addf %2, %5 : vector<1x16x16xf32>
    %cst_6 = arith.constant dense<0xFF800000> : vector<1x16x16xf32>
    %7 = vector.multi_reduction <maximumf>, %4, %cst_6 [1] : vector<1x4x16x16xf32> to vector<1x16x16xf32>
    %8 = arith.maximumf %3, %7 : vector<1x16x16xf32>
    %9 = arith.extui %0 : i1 to i32
    %c0_i32_7 = arith.constant 0 : i32
    %10 = arith.cmpi ne, %9, %c0_i32_7 : i32
    scf.if %10 {
      %cst_11 = arith.constant 0.000000e+00 : f32
      %16 = vector.broadcast %cst_11 : f32 to vector<1x3x22xf32>
      %cst_12 = arith.constant 0.000000e+00 : f32
      %17 = vector.broadcast %cst_12 : f32 to vector<1x16x3xf32>
      %c0_13 = arith.constant 0 : index
      %c5 = arith.constant 5 : index
      %c0_14 = arith.constant 0 : index
      %18 = vector.load %arg5[%c0_13, %c5, %c0_14] : memref<1x27x22xf32, #tpu.memory_space<vmem>>, vector<1x3x22xf32>
      tpu.vector_store %arg5[%c0_13, %c5, %c0_14], %16 {strides = array<i32>} : memref<1x27x22xf32, #tpu.memory_space<vmem>>, vector<1x3x22xf32>,
      %c0_15 = arith.constant 0 : index
      %c24 = arith.constant 24 : index
      %c0_16 = arith.constant 0 : index
      %19 = vector.load %arg5[%c0_15, %c24, %c0_16] : memref<1x27x22xf32, #tpu.memory_space<vmem>>, vector<1x3x22xf32>
      tpu.vector_store %arg5[%c0_15, %c24, %c0_16], %16 {strides = array<i32>} : memref<1x27x22xf32, #tpu.memory_space<vmem>>, vector<1x3x22xf32>,
      %c0_17 = arith.constant 0 : index
      %c8 = arith.constant 8 : index
      %c0_18 = arith.constant 0 : index
      %20 = vector.load %arg5[%c0_17, %c8, %c0_18] : memref<1x27x22xf32, #tpu.memory_space<vmem>>, vector<1x16x3xf32>
      tpu.vector_store %arg5[%c0_17, %c8, %c0_18], %17 {strides = array<i32>} : memref<1x27x22xf32, #tpu.memory_space<vmem>>, vector<1x16x3xf32>,
      %c0_19 = arith.constant 0 : index
      %c8_20 = arith.constant 8 : index
      %c19 = arith.constant 19 : index
      %21 = vector.load %arg5[%c0_19, %c8_20, %c19] : memref<1x27x22xf32, #tpu.memory_space<vmem>>, vector<1x16x3xf32>
      tpu.vector_store %arg5[%c0_19, %c8_20, %c19], %17 {strides = array<i32>} : memref<1x27x22xf32, #tpu.memory_space<vmem>>, vector<1x16x3xf32>,
      %cst_21 = arith.constant 0.000000e+00 : f32
      %22 = vector.broadcast %cst_21 : f32 to vector<1x3x22xf32>
      %cst_22 = arith.constant 0.000000e+00 : f32
      %23 = vector.broadcast %cst_22 : f32 to vector<1x16x3xf32>
      %c0_23 = arith.constant 0 : index
      %c5_24 = arith.constant 5 : index
      %c0_25 = arith.constant 0 : index
      %24 = vector.load %arg6[%c0_23, %c5_24, %c0_25] : memref<1x27x22xf32, #tpu.memory_space<vmem>>, vector<1x3x22xf32>
      tpu.vector_store %arg6[%c0_23, %c5_24, %c0_25], %22 {strides = array<i32>} : memref<1x27x22xf32, #tpu.memory_space<vmem>>, vector<1x3x22xf32>,
      %c0_26 = arith.constant 0 : index
      %c24_27 = arith.constant 24 : index
      %c0_28 = arith.constant 0 : index
      %25 = vector.load %arg6[%c0_26, %c24_27, %c0_28] : memref<1x27x22xf32, #tpu.memory_space<vmem>>, vector<1x3x22xf32>
      tpu.vector_store %arg6[%c0_26, %c24_27, %c0_28], %22 {strides = array<i32>} : memref<1x27x22xf32, #tpu.memory_space<vmem>>, vector<1x3x22xf32>,
      %c0_29 = arith.constant 0 : index
      %c8_30 = arith.constant 8 : index
      %c0_31 = arith.constant 0 : index
      %26 = vector.load %arg6[%c0_29, %c8_30, %c0_31] : memref<1x27x22xf32, #tpu.memory_space<vmem>>, vector<1x16x3xf32>
      tpu.vector_store %arg6[%c0_29, %c8_30, %c0_31], %23 {strides = array<i32>} : memref<1x27x22xf32, #tpu.memory_space<vmem>>, vector<1x16x3xf32>,
      %c0_32 = arith.constant 0 : index
      %c8_33 = arith.constant 8 : index
      %c19_34 = arith.constant 19 : index
      %27 = vector.load %arg6[%c0_32, %c8_33, %c19_34] : memref<1x27x22xf32, #tpu.memory_space<vmem>>, vector<1x16x3xf32>
      tpu.vector_store %arg6[%c0_32, %c8_33, %c19_34], %23 {strides = array<i32>} : memref<1x27x22xf32, #tpu.memory_space<vmem>>, vector<1x16x3xf32>,
      %c0_35 = arith.constant 0 : index
      %c8_36 = arith.constant 8 : index
      %c3 = arith.constant 3 : index
      %28 = vector.load %arg5[%c0_35, %c8_36, %c3] : memref<1x27x22xf32, #tpu.memory_space<vmem>>, vector<1x16x16xf32>
      tpu.vector_store %arg5[%c0_35, %c8_36, %c3], %6 {strides = array<i32>} : memref<1x27x22xf32, #tpu.memory_space<vmem>>, vector<1x16x16xf32>,
      %c0_37 = arith.constant 0 : index
      %c8_38 = arith.constant 8 : index
      %c3_39 = arith.constant 3 : index
      %29 = vector.load %arg6[%c0_37, %c8_38, %c3_39] : memref<1x27x22xf32, #tpu.memory_space<vmem>>, vector<1x16x16xf32>
      tpu.vector_store %arg6[%c0_37, %c8_38, %c3_39], %8 {strides = array<i32>} : memref<1x27x22xf32, #tpu.memory_space<vmem>>, vector<1x16x16xf32>,
    } else {
    }
    %c0_i32_8 = arith.constant 0 : i32
    %11 = arith.cmpi sgt, %arg1, %c0_i32_8 : i32
    %12 = arith.extui %11 : i1 to i32
    %c0_i32_9 = arith.constant 0 : i32
    %13 = arith.cmpi ne, %12, %c0_i32_9 : i32
    scf.if %13 {
      %c0_11 = arith.constant 0 : index
      %c8 = arith.constant 8 : index
      %c3 = arith.constant 3 : index
      %16 = vector.load %arg5[%c0_11, %c8, %c3] : memref<1x27x22xf32, #tpu.memory_space<vmem>>, vector<1x16x16xf32>
      %c0_12 = arith.constant 0 : index
      %c8_13 = arith.constant 8 : index
      %c3_14 = arith.constant 3 : index
      %17 = vector.load %arg6[%c0_12, %c8_13, %c3_14] : memref<1x27x22xf32, #tpu.memory_space<vmem>>, vector<1x16x16xf32>
      %18 = arith.addf %16, %6 : vector<1x16x16xf32>
      %c0_15 = arith.constant 0 : index
      %c8_16 = arith.constant 8 : index
      %c3_17 = arith.constant 3 : index
      %19 = vector.load %arg5[%c0_15, %c8_16, %c3_17] : memref<1x27x22xf32, #tpu.memory_space<vmem>>, vector<1x16x16xf32>
      tpu.vector_store %arg5[%c0_15, %c8_16, %c3_17], %18 {strides = array<i32>} : memref<1x27x22xf32, #tpu.memory_space<vmem>>, vector<1x16x16xf32>,
      %20 = arith.maximumf %17, %8 : vector<1x16x16xf32>
      %c0_18 = arith.constant 0 : index
      %c8_19 = arith.constant 8 : index
      %c3_20 = arith.constant 3 : index
      %21 = vector.load %arg6[%c0_18, %c8_19, %c3_20] : memref<1x27x22xf32, #tpu.memory_space<vmem>>, vector<1x16x16xf32>
      tpu.vector_store %arg6[%c0_18, %c8_19, %c3_20], %20 {strides = array<i32>} : memref<1x27x22xf32, #tpu.memory_space<vmem>>, vector<1x16x16xf32>,
    } else {
    }
    %14 = arith.extui %1 : i1 to i32
    %c0_i32_10 = arith.constant 0 : i32
    %15 = arith.cmpi ne, %14, %c0_i32_10 : i32
    scf.if %15 {
      %cst_11 = arith.constant 0.000000e+00 : f32
      %16 = vector.broadcast %cst_11 : f32 to vector<1x16x16xf32>
      %cst_12 = arith.constant 0.000000e+00 : f32
      %17 = vector.broadcast %cst_12 : f32 to vector<1x16x16xf32>
      %cst_13 = arith.constant 0.000000e+00 : f32
      %18 = vector.broadcast %cst_13 : f32 to vector<1x16x16xf32>
      %cst_14 = arith.constant 0.000000e+00 : f32
      %19 = vector.broadcast %cst_14 : f32 to vector<1x16x16xf32>
      %c0_15 = arith.constant 0 : index
      %c5 = arith.constant 5 : index
      %c0_16 = arith.constant 0 : index
      %20 = vector.load %arg5[%c0_15, %c5, %c0_16] : memref<1x27x22xf32, #tpu.memory_space<vmem>>, vector<1x22x16xf32>
      %c0_17 = arith.constant 0 : index
      %c5_18 = arith.constant 5 : index
      %c0_19 = arith.constant 0 : index
      %21 = vector.load %arg6[%c0_17, %c5_18, %c0_19] : memref<1x27x22xf32, #tpu.memory_space<vmem>>, vector<1x22x16xf32>
      %c0_20 = arith.constant 0 : index
      %22 = memref.load %arg2[%c0_20] : memref<98xf32, #tpu.memory_space<smem>>
      %c49 = arith.constant 49 : index
      %23 = memref.load %arg2[%c49] : memref<98xf32, #tpu.memory_space<smem>>
      %24 = vector.extract_strided_slice %20 {offsets = [0, 0, 0], sizes = [1, 16, 16], strides = [1, 1, 1]} : vector<1x22x16xf32> to vector<1x16x16xf32>
      %25 = vector.broadcast %22 : f32 to vector<1x16x16xf32>
      %26 = arith.mulf %25, %24 : vector<1x16x16xf32>
      %27 = vector.extract_strided_slice %21 {offsets = [0, 0, 0], sizes = [1, 16, 16], strides = [1, 1, 1]} : vector<1x22x16xf32> to vector<1x16x16xf32>
      %28 = vector.broadcast %23 : f32 to vector<1x16x16xf32>
      %29 = arith.mulf %28, %27 : vector<1x16x16xf32>
      %30 = arith.addf %26, %29 : vector<1x16x16xf32>
      %31 = arith.addf %16, %30 : vector<1x16x16xf32>
      %c7 = arith.constant 7 : index
      %32 = memref.load %arg2[%c7] : memref<98xf32, #tpu.memory_space<smem>>
      %c56 = arith.constant 56 : index
      %33 = memref.load %arg2[%c56] : memref<98xf32, #tpu.memory_space<smem>>
      %34 = vector.extract_strided_slice %20 {offsets = [0, 1, 0], sizes = [1, 16, 16], strides = [1, 1, 1]} : vector<1x22x16xf32> to vector<1x16x16xf32>
      %35 = vector.broadcast %32 : f32 to vector<1x16x16xf32>
      %36 = arith.mulf %35, %34 : vector<1x16x16xf32>
      %37 = vector.extract_strided_slice %21 {offsets = [0, 1, 0], sizes = [1, 16, 16], strides = [1, 1, 1]} : vector<1x22x16xf32> to vector<1x16x16xf32>
      %38 = vector.broadcast %33 : f32 to vector<1x16x16xf32>
      %39 = arith.mulf %38, %37 : vector<1x16x16xf32>
      %40 = arith.addf %36, %39 : vector<1x16x16xf32>
      %41 = arith.addf %17, %40 : vector<1x16x16xf32>
      %c14 = arith.constant 14 : index
      %42 = memref.load %arg2[%c14] : memref<98xf32, #tpu.memory_space<smem>>
      %c63 = arith.constant 63 : index
      %43 = memref.load %arg2[%c63] : memref<98xf32, #tpu.memory_space<smem>>
      %44 = vector.extract_strided_slice %20 {offsets = [0, 2, 0], sizes = [1, 16, 16], strides = [1, 1, 1]} : vector<1x22x16xf32> to vector<1x16x16xf32>
      %45 = vector.broadcast %42 : f32 to vector<1x16x16xf32>
      %46 = arith.mulf %45, %44 : vector<1x16x16xf32>
      %47 = vector.extract_strided_slice %21 {offsets = [0, 2, 0], sizes = [1, 16, 16], strides = [1, 1, 1]} : vector<1x22x16xf32> to vector<1x16x16xf32>
      %48 = vector.broadcast %43 : f32 to vector<1x16x16xf32>
      %49 = arith.mulf %48, %47 : vector<1x16x16xf32>
      %50 = arith.addf %46, %49 : vector<1x16x16xf32>
      %51 = arith.addf %18, %50 : vector<1x16x16xf32>
      %c21 = arith.constant 21 : index
      %52 = memref.load %arg2[%c21] : memref<98xf32, #tpu.memory_space<smem>>
      %c70 = arith.constant 70 : index
      %53 = memref.load %arg2[%c70] : memref<98xf32, #tpu.memory_space<smem>>
      %54 = vector.extract_strided_slice %20 {offsets = [0, 3, 0], sizes = [1, 16, 16], strides = [1, 1, 1]} : vector<1x22x16xf32> to vector<1x16x16xf32>
      %55 = vector.broadcast %52 : f32 to vector<1x16x16xf32>
      %56 = arith.mulf %55, %54 : vector<1x16x16xf32>
      %57 = vector.extract_strided_slice %21 {offsets = [0, 3, 0], sizes = [1, 16, 16], strides = [1, 1, 1]} : vector<1x22x16xf32> to vector<1x16x16xf32>
      %58 = vector.broadcast %53 : f32 to vector<1x16x16xf32>
      %59 = arith.mulf %58, %57 : vector<1x16x16xf32>
      %60 = arith.addf %56, %59 : vector<1x16x16xf32>
      %61 = arith.addf %19, %60 : vector<1x16x16xf32>
      %c28 = arith.constant 28 : index
      %62 = memref.load %arg2[%c28] : memref<98xf32, #tpu.memory_space<smem>>
      %c77 = arith.constant 77 : index
      %63 = memref.load %arg2[%c77] : memref<98xf32, #tpu.memory_space<smem>>
      %64 = vector.extract_strided_slice %20 {offsets = [0, 4, 0], sizes = [1, 16, 16], strides = [1, 1, 1]} : vector<1x22x16xf32> to vector<1x16x16xf32>
      %65 = vector.broadcast %62 : f32 to vector<1x16x16xf32>
      %66 = arith.mulf %65, %64 : vector<1x16x16xf32>
      %67 = vector.extract_strided_slice %21 {offsets = [0, 4, 0], sizes = [1, 16, 16], strides = [1, 1, 1]} : vector<1x22x16xf32> to vector<1x16x16xf32>
      %68 = vector.broadcast %63 : f32 to vector<1x16x16xf32>
      %69 = arith.mulf %68, %67 : vector<1x16x16xf32>
      %70 = arith.addf %66, %69 : vector<1x16x16xf32>
      %71 = arith.addf %31, %70 : vector<1x16x16xf32>
      %c35 = arith.constant 35 : index
      %72 = memref.load %arg2[%c35] : memref<98xf32, #tpu.memory_space<smem>>
      %c84 = arith.constant 84 : index
      %73 = memref.load %arg2[%c84] : memref<98xf32, #tpu.memory_space<smem>>
      %74 = vector.extract_strided_slice %20 {offsets = [0, 5, 0], sizes = [1, 16, 16], strides = [1, 1, 1]} : vector<1x22x16xf32> to vector<1x16x16xf32>
      %75 = vector.broadcast %72 : f32 to vector<1x16x16xf32>
      %76 = arith.mulf %75, %74 : vector<1x16x16xf32>
      %77 = vector.extract_strided_slice %21 {offsets = [0, 5, 0], sizes = [1, 16, 16], strides = [1, 1, 1]} : vector<1x22x16xf32> to vector<1x16x16xf32>
      %78 = vector.broadcast %73 : f32 to vector<1x16x16xf32>
      %79 = arith.mulf %78, %77 : vector<1x16x16xf32>
      %80 = arith.addf %76, %79 : vector<1x16x16xf32>
      %81 = arith.addf %41, %80 : vector<1x16x16xf32>
      %c42 = arith.constant 42 : index
      %82 = memref.load %arg2[%c42] : memref<98xf32, #tpu.memory_space<smem>>
      %c91 = arith.constant 91 : index
      %83 = memref.load %arg2[%c91] : memref<98xf32, #tpu.memory_space<smem>>
      %84 = vector.extract_strided_slice %20 {offsets = [0, 6, 0], sizes = [1, 16, 16], strides = [1, 1, 1]} : vector<1x22x16xf32> to vector<1x16x16xf32>
      %85 = vector.broadcast %82 : f32 to vector<1x16x16xf32>
      %86 = arith.mulf %85, %84 : vector<1x16x16xf32>
      %87 = vector.extract_strided_slice %21 {offsets = [0, 6, 0], sizes = [1, 16, 16], strides = [1, 1, 1]} : vector<1x22x16xf32> to vector<1x16x16xf32>
      %88 = vector.broadcast %83 : f32 to vector<1x16x16xf32>
      %89 = arith.mulf %88, %87 : vector<1x16x16xf32>
      %90 = arith.addf %86, %89 : vector<1x16x16xf32>
      %91 = arith.addf %51, %90 : vector<1x16x16xf32>
      %c0_21 = arith.constant 0 : index
      %c5_22 = arith.constant 5 : index
      %c1 = arith.constant 1 : index
      %92 = vector.load %arg5[%c0_21, %c5_22, %c1] : memref<1x27x22xf32, #tpu.memory_space<vmem>>, vector<1x22x16xf32>
      %c0_23 = arith.constant 0 : index
      %c5_24 = arith.constant 5 : index
      %c1_25 = arith.constant 1 : index
      %93 = vector.load %arg6[%c0_23, %c5_24, %c1_25] : memref<1x27x22xf32, #tpu.memory_space<vmem>>, vector<1x22x16xf32>
      %c1_26 = arith.constant 1 : index
      %94 = memref.load %arg2[%c1_26] : memref<98xf32, #tpu.memory_space<smem>>
      %c50 = arith.constant 50 : index
      %95 = memref.load %arg2[%c50] : memref<98xf32, #tpu.memory_space<smem>>
      %96 = vector.extract_strided_slice %92 {offsets = [0, 0, 0], sizes = [1, 16, 16], strides = [1, 1, 1]} : vector<1x22x16xf32> to vector<1x16x16xf32>
      %97 = vector.broadcast %94 : f32 to vector<1x16x16xf32>
      %98 = arith.mulf %97, %96 : vector<1x16x16xf32>
      %99 = vector.extract_strided_slice %93 {offsets = [0, 0, 0], sizes = [1, 16, 16], strides = [1, 1, 1]} : vector<1x22x16xf32> to vector<1x16x16xf32>
      %100 = vector.broadcast %95 : f32 to vector<1x16x16xf32>
      %101 = arith.mulf %100, %99 : vector<1x16x16xf32>
      %102 = arith.addf %98, %101 : vector<1x16x16xf32>
      %103 = arith.addf %71, %102 : vector<1x16x16xf32>
      %c8 = arith.constant 8 : index
      %104 = memref.load %arg2[%c8] : memref<98xf32, #tpu.memory_space<smem>>
      %c57 = arith.constant 57 : index
      %105 = memref.load %arg2[%c57] : memref<98xf32, #tpu.memory_space<smem>>
      %106 = vector.extract_strided_slice %92 {offsets = [0, 1, 0], sizes = [1, 16, 16], strides = [1, 1, 1]} : vector<1x22x16xf32> to vector<1x16x16xf32>
      %107 = vector.broadcast %104 : f32 to vector<1x16x16xf32>
      %108 = arith.mulf %107, %106 : vector<1x16x16xf32>
      %109 = vector.extract_strided_slice %93 {offsets = [0, 1, 0], sizes = [1, 16, 16], strides = [1, 1, 1]} : vector<1x22x16xf32> to vector<1x16x16xf32>
      %110 = vector.broadcast %105 : f32 to vector<1x16x16xf32>
      %111 = arith.mulf %110, %109 : vector<1x16x16xf32>
      %112 = arith.addf %108, %111 : vector<1x16x16xf32>
      %113 = arith.addf %81, %112 : vector<1x16x16xf32>
      %c15 = arith.constant 15 : index
      %114 = memref.load %arg2[%c15] : memref<98xf32, #tpu.memory_space<smem>>
      %c64 = arith.constant 64 : index
      %115 = memref.load %arg2[%c64] : memref<98xf32, #tpu.memory_space<smem>>
      %116 = vector.extract_strided_slice %92 {offsets = [0, 2, 0], sizes = [1, 16, 16], strides = [1, 1, 1]} : vector<1x22x16xf32> to vector<1x16x16xf32>
      %117 = vector.broadcast %114 : f32 to vector<1x16x16xf32>
      %118 = arith.mulf %117, %116 : vector<1x16x16xf32>
      %119 = vector.extract_strided_slice %93 {offsets = [0, 2, 0], sizes = [1, 16, 16], strides = [1, 1, 1]} : vector<1x22x16xf32> to vector<1x16x16xf32>
      %120 = vector.broadcast %115 : f32 to vector<1x16x16xf32>
      %121 = arith.mulf %120, %119 : vector<1x16x16xf32>
      %122 = arith.addf %118, %121 : vector<1x16x16xf32>
      %123 = arith.addf %91, %122 : vector<1x16x16xf32>
      %c22 = arith.constant 22 : index
      %124 = memref.load %arg2[%c22] : memref<98xf32, #tpu.memory_space<smem>>
      %c71 = arith.constant 71 : index
      %125 = memref.load %arg2[%c71] : memref<98xf32, #tpu.memory_space<smem>>
      %126 = vector.extract_strided_slice %92 {offsets = [0, 3, 0], sizes = [1, 16, 16], strides = [1, 1, 1]} : vector<1x22x16xf32> to vector<1x16x16xf32>
      %127 = vector.broadcast %124 : f32 to vector<1x16x16xf32>
      %128 = arith.mulf %127, %126 : vector<1x16x16xf32>
      %129 = vector.extract_strided_slice %93 {offsets = [0, 3, 0], sizes = [1, 16, 16], strides = [1, 1, 1]} : vector<1x22x16xf32> to vector<1x16x16xf32>
      %130 = vector.broadcast %125 : f32 to vector<1x16x16xf32>
      %131 = arith.mulf %130, %129 : vector<1x16x16xf32>
      %132 = arith.addf %128, %131 : vector<1x16x16xf32>
      %133 = arith.addf %61, %132 : vector<1x16x16xf32>
      %c29 = arith.constant 29 : index
      %134 = memref.load %arg2[%c29] : memref<98xf32, #tpu.memory_space<smem>>
      %c78 = arith.constant 78 : index
      %135 = memref.load %arg2[%c78] : memref<98xf32, #tpu.memory_space<smem>>
      %136 = vector.extract_strided_slice %92 {offsets = [0, 4, 0], sizes = [1, 16, 16], strides = [1, 1, 1]} : vector<1x22x16xf32> to vector<1x16x16xf32>
      %137 = vector.broadcast %134 : f32 to vector<1x16x16xf32>
      %138 = arith.mulf %137, %136 : vector<1x16x16xf32>
      %139 = vector.extract_strided_slice %93 {offsets = [0, 4, 0], sizes = [1, 16, 16], strides = [1, 1, 1]} : vector<1x22x16xf32> to vector<1x16x16xf32>
      %140 = vector.broadcast %135 : f32 to vector<1x16x16xf32>
      %141 = arith.mulf %140, %139 : vector<1x16x16xf32>
      %142 = arith.addf %138, %141 : vector<1x16x16xf32>
      %143 = arith.addf %103, %142 : vector<1x16x16xf32>
      %c36 = arith.constant 36 : index
      %144 = memref.load %arg2[%c36] : memref<98xf32, #tpu.memory_space<smem>>
      %c85 = arith.constant 85 : index
      %145 = memref.load %arg2[%c85] : memref<98xf32, #tpu.memory_space<smem>>
      %146 = vector.extract_strided_slice %92 {offsets = [0, 5, 0], sizes = [1, 16, 16], strides = [1, 1, 1]} : vector<1x22x16xf32> to vector<1x16x16xf32>
      %147 = vector.broadcast %144 : f32 to vector<1x16x16xf32>
      %148 = arith.mulf %147, %146 : vector<1x16x16xf32>
      %149 = vector.extract_strided_slice %93 {offsets = [0, 5, 0], sizes = [1, 16, 16], strides = [1, 1, 1]} : vector<1x22x16xf32> to vector<1x16x16xf32>
      %150 = vector.broadcast %145 : f32 to vector<1x16x16xf32>
      %151 = arith.mulf %150, %149 : vector<1x16x16xf32>
      %152 = arith.addf %148, %151 : vector<1x16x16xf32>
      %153 = arith.addf %113, %152 : vector<1x16x16xf32>
      %c43 = arith.constant 43 : index
      %154 = memref.load %arg2[%c43] : memref<98xf32, #tpu.memory_space<smem>>
      %c92 = arith.constant 92 : index
      %155 = memref.load %arg2[%c92] : memref<98xf32, #tpu.memory_space<smem>>
      %156 = vector.extract_strided_slice %92 {offsets = [0, 6, 0], sizes = [1, 16, 16], strides = [1, 1, 1]} : vector<1x22x16xf32> to vector<1x16x16xf32>
      %157 = vector.broadcast %154 : f32 to vector<1x16x16xf32>
      %158 = arith.mulf %157, %156 : vector<1x16x16xf32>
      %159 = vector.extract_strided_slice %93 {offsets = [0, 6, 0], sizes = [1, 16, 16], strides = [1, 1, 1]} : vector<1x22x16xf32> to vector<1x16x16xf32>
      %160 = vector.broadcast %155 : f32 to vector<1x16x16xf32>
      %161 = arith.mulf %160, %159 : vector<1x16x16xf32>
      %162 = arith.addf %158, %161 : vector<1x16x16xf32>
      %163 = arith.addf %123, %162 : vector<1x16x16xf32>
      %c0_27 = arith.constant 0 : index
      %c5_28 = arith.constant 5 : index
      %c2 = arith.constant 2 : index
      %164 = vector.load %arg5[%c0_27, %c5_28, %c2] : memref<1x27x22xf32, #tpu.memory_space<vmem>>, vector<1x22x16xf32>
      %c0_29 = arith.constant 0 : index
      %c5_30 = arith.constant 5 : index
      %c2_31 = arith.constant 2 : index
      %165 = vector.load %arg6[%c0_29, %c5_30, %c2_31] : memref<1x27x22xf32, #tpu.memory_space<vmem>>, vector<1x22x16xf32>
      %c2_32 = arith.constant 2 : index
      %166 = memref.load %arg2[%c2_32] : memref<98xf32, #tpu.memory_space<smem>>
      %c51 = arith.constant 51 : index
      %167 = memref.load %arg2[%c51] : memref<98xf32, #tpu.memory_space<smem>>
      %168 = vector.extract_strided_slice %164 {offsets = [0, 0, 0], sizes = [1, 16, 16], strides = [1, 1, 1]} : vector<1x22x16xf32> to vector<1x16x16xf32>
      %169 = vector.broadcast %166 : f32 to vector<1x16x16xf32>
      %170 = arith.mulf %169, %168 : vector<1x16x16xf32>
      %171 = vector.extract_strided_slice %165 {offsets = [0, 0, 0], sizes = [1, 16, 16], strides = [1, 1, 1]} : vector<1x22x16xf32> to vector<1x16x16xf32>
      %172 = vector.broadcast %167 : f32 to vector<1x16x16xf32>
      %173 = arith.mulf %172, %171 : vector<1x16x16xf32>
      %174 = arith.addf %170, %173 : vector<1x16x16xf32>
      %175 = arith.addf %143, %174 : vector<1x16x16xf32>
      %c9 = arith.constant 9 : index
      %176 = memref.load %arg2[%c9] : memref<98xf32, #tpu.memory_space<smem>>
      %c58 = arith.constant 58 : index
      %177 = memref.load %arg2[%c58] : memref<98xf32, #tpu.memory_space<smem>>
      %178 = vector.extract_strided_slice %164 {offsets = [0, 1, 0], sizes = [1, 16, 16], strides = [1, 1, 1]} : vector<1x22x16xf32> to vector<1x16x16xf32>
      %179 = vector.broadcast %176 : f32 to vector<1x16x16xf32>
      %180 = arith.mulf %179, %178 : vector<1x16x16xf32>
      %181 = vector.extract_strided_slice %165 {offsets = [0, 1, 0], sizes = [1, 16, 16], strides = [1, 1, 1]} : vector<1x22x16xf32> to vector<1x16x16xf32>
      %182 = vector.broadcast %177 : f32 to vector<1x16x16xf32>
      %183 = arith.mulf %182, %181 : vector<1x16x16xf32>
      %184 = arith.addf %180, %183 : vector<1x16x16xf32>
      %185 = arith.addf %153, %184 : vector<1x16x16xf32>
      %c16 = arith.constant 16 : index
      %186 = memref.load %arg2[%c16] : memref<98xf32, #tpu.memory_space<smem>>
      %c65 = arith.constant 65 : index
      %187 = memref.load %arg2[%c65] : memref<98xf32, #tpu.memory_space<smem>>
      %188 = vector.extract_strided_slice %164 {offsets = [0, 2, 0], sizes = [1, 16, 16], strides = [1, 1, 1]} : vector<1x22x16xf32> to vector<1x16x16xf32>
      %189 = vector.broadcast %186 : f32 to vector<1x16x16xf32>
      %190 = arith.mulf %189, %188 : vector<1x16x16xf32>
      %191 = vector.extract_strided_slice %165 {offsets = [0, 2, 0], sizes = [1, 16, 16], strides = [1, 1, 1]} : vector<1x22x16xf32> to vector<1x16x16xf32>
      %192 = vector.broadcast %187 : f32 to vector<1x16x16xf32>
      %193 = arith.mulf %192, %191 : vector<1x16x16xf32>
      %194 = arith.addf %190, %193 : vector<1x16x16xf32>
      %195 = arith.addf %163, %194 : vector<1x16x16xf32>
      %c23 = arith.constant 23 : index
      %196 = memref.load %arg2[%c23] : memref<98xf32, #tpu.memory_space<smem>>
      %c72 = arith.constant 72 : index
      %197 = memref.load %arg2[%c72] : memref<98xf32, #tpu.memory_space<smem>>
      %198 = vector.extract_strided_slice %164 {offsets = [0, 3, 0], sizes = [1, 16, 16], strides = [1, 1, 1]} : vector<1x22x16xf32> to vector<1x16x16xf32>
      %199 = vector.broadcast %196 : f32 to vector<1x16x16xf32>
      %200 = arith.mulf %199, %198 : vector<1x16x16xf32>
      %201 = vector.extract_strided_slice %165 {offsets = [0, 3, 0], sizes = [1, 16, 16], strides = [1, 1, 1]} : vector<1x22x16xf32> to vector<1x16x16xf32>
      %202 = vector.broadcast %197 : f32 to vector<1x16x16xf32>
      %203 = arith.mulf %202, %201 : vector<1x16x16xf32>
      %204 = arith.addf %200, %203 : vector<1x16x16xf32>
      %205 = arith.addf %133, %204 : vector<1x16x16xf32>
      %c30 = arith.constant 30 : index
      %206 = memref.load %arg2[%c30] : memref<98xf32, #tpu.memory_space<smem>>
      %c79 = arith.constant 79 : index
      %207 = memref.load %arg2[%c79] : memref<98xf32, #tpu.memory_space<smem>>
      %208 = vector.extract_strided_slice %164 {offsets = [0, 4, 0], sizes = [1, 16, 16], strides = [1, 1, 1]} : vector<1x22x16xf32> to vector<1x16x16xf32>
      %209 = vector.broadcast %206 : f32 to vector<1x16x16xf32>
      %210 = arith.mulf %209, %208 : vector<1x16x16xf32>
      %211 = vector.extract_strided_slice %165 {offsets = [0, 4, 0], sizes = [1, 16, 16], strides = [1, 1, 1]} : vector<1x22x16xf32> to vector<1x16x16xf32>
      %212 = vector.broadcast %207 : f32 to vector<1x16x16xf32>
      %213 = arith.mulf %212, %211 : vector<1x16x16xf32>
      %214 = arith.addf %210, %213 : vector<1x16x16xf32>
      %215 = arith.addf %175, %214 : vector<1x16x16xf32>
      %c37 = arith.constant 37 : index
      %216 = memref.load %arg2[%c37] : memref<98xf32, #tpu.memory_space<smem>>
      %c86 = arith.constant 86 : index
      %217 = memref.load %arg2[%c86] : memref<98xf32, #tpu.memory_space<smem>>
      %218 = vector.extract_strided_slice %164 {offsets = [0, 5, 0], sizes = [1, 16, 16], strides = [1, 1, 1]} : vector<1x22x16xf32> to vector<1x16x16xf32>
      %219 = vector.broadcast %216 : f32 to vector<1x16x16xf32>
      %220 = arith.mulf %219, %218 : vector<1x16x16xf32>
      %221 = vector.extract_strided_slice %165 {offsets = [0, 5, 0], sizes = [1, 16, 16], strides = [1, 1, 1]} : vector<1x22x16xf32> to vector<1x16x16xf32>
      %222 = vector.broadcast %217 : f32 to vector<1x16x16xf32>
      %223 = arith.mulf %222, %221 : vector<1x16x16xf32>
      %224 = arith.addf %220, %223 : vector<1x16x16xf32>
      %225 = arith.addf %185, %224 : vector<1x16x16xf32>
      %c44 = arith.constant 44 : index
      %226 = memref.load %arg2[%c44] : memref<98xf32, #tpu.memory_space<smem>>
      %c93 = arith.constant 93 : index
      %227 = memref.load %arg2[%c93] : memref<98xf32, #tpu.memory_space<smem>>
      %228 = vector.extract_strided_slice %164 {offsets = [0, 6, 0], sizes = [1, 16, 16], strides = [1, 1, 1]} : vector<1x22x16xf32> to vector<1x16x16xf32>
      %229 = vector.broadcast %226 : f32 to vector<1x16x16xf32>
      %230 = arith.mulf %229, %228 : vector<1x16x16xf32>
      %231 = vector.extract_strided_slice %165 {offsets = [0, 6, 0], sizes = [1, 16, 16], strides = [1, 1, 1]} : vector<1x22x16xf32> to vector<1x16x16xf32>
      %232 = vector.broadcast %227 : f32 to vector<1x16x16xf32>
      %233 = arith.mulf %232, %231 : vector<1x16x16xf32>
      %234 = arith.addf %230, %233 : vector<1x16x16xf32>
      %235 = arith.addf %195, %234 : vector<1x16x16xf32>
      %c0_33 = arith.constant 0 : index
      %c5_34 = arith.constant 5 : index
      %c3 = arith.constant 3 : index
      %236 = vector.load %arg5[%c0_33, %c5_34, %c3] : memref<1x27x22xf32, #tpu.memory_space<vmem>>, vector<1x22x16xf32>
      %c0_35 = arith.constant 0 : index
      %c5_36 = arith.constant 5 : index
      %c3_37 = arith.constant 3 : index
      %237 = vector.load %arg6[%c0_35, %c5_36, %c3_37] : memref<1x27x22xf32, #tpu.memory_space<vmem>>, vector<1x22x16xf32>
      %c3_38 = arith.constant 3 : index
      %238 = memref.load %arg2[%c3_38] : memref<98xf32, #tpu.memory_space<smem>>
      %c52 = arith.constant 52 : index
      %239 = memref.load %arg2[%c52] : memref<98xf32, #tpu.memory_space<smem>>
      %240 = vector.extract_strided_slice %236 {offsets = [0, 0, 0], sizes = [1, 16, 16], strides = [1, 1, 1]} : vector<1x22x16xf32> to vector<1x16x16xf32>
      %241 = vector.broadcast %238 : f32 to vector<1x16x16xf32>
      %242 = arith.mulf %241, %240 : vector<1x16x16xf32>
      %243 = vector.extract_strided_slice %237 {offsets = [0, 0, 0], sizes = [1, 16, 16], strides = [1, 1, 1]} : vector<1x22x16xf32> to vector<1x16x16xf32>
      %244 = vector.broadcast %239 : f32 to vector<1x16x16xf32>
      %245 = arith.mulf %244, %243 : vector<1x16x16xf32>
      %246 = arith.addf %242, %245 : vector<1x16x16xf32>
      %247 = arith.addf %215, %246 : vector<1x16x16xf32>
      %c10 = arith.constant 10 : index
      %248 = memref.load %arg2[%c10] : memref<98xf32, #tpu.memory_space<smem>>
      %c59 = arith.constant 59 : index
      %249 = memref.load %arg2[%c59] : memref<98xf32, #tpu.memory_space<smem>>
      %250 = vector.extract_strided_slice %236 {offsets = [0, 1, 0], sizes = [1, 16, 16], strides = [1, 1, 1]} : vector<1x22x16xf32> to vector<1x16x16xf32>
      %251 = vector.broadcast %248 : f32 to vector<1x16x16xf32>
      %252 = arith.mulf %251, %250 : vector<1x16x16xf32>
      %253 = vector.extract_strided_slice %237 {offsets = [0, 1, 0], sizes = [1, 16, 16], strides = [1, 1, 1]} : vector<1x22x16xf32> to vector<1x16x16xf32>
      %254 = vector.broadcast %249 : f32 to vector<1x16x16xf32>
      %255 = arith.mulf %254, %253 : vector<1x16x16xf32>
      %256 = arith.addf %252, %255 : vector<1x16x16xf32>
      %257 = arith.addf %225, %256 : vector<1x16x16xf32>
      %c17 = arith.constant 17 : index
      %258 = memref.load %arg2[%c17] : memref<98xf32, #tpu.memory_space<smem>>
      %c66 = arith.constant 66 : index
      %259 = memref.load %arg2[%c66] : memref<98xf32, #tpu.memory_space<smem>>
      %260 = vector.extract_strided_slice %236 {offsets = [0, 2, 0], sizes = [1, 16, 16], strides = [1, 1, 1]} : vector<1x22x16xf32> to vector<1x16x16xf32>
      %261 = vector.broadcast %258 : f32 to vector<1x16x16xf32>
      %262 = arith.mulf %261, %260 : vector<1x16x16xf32>
      %263 = vector.extract_strided_slice %237 {offsets = [0, 2, 0], sizes = [1, 16, 16], strides = [1, 1, 1]} : vector<1x22x16xf32> to vector<1x16x16xf32>
      %264 = vector.broadcast %259 : f32 to vector<1x16x16xf32>
      %265 = arith.mulf %264, %263 : vector<1x16x16xf32>
      %266 = arith.addf %262, %265 : vector<1x16x16xf32>
      %267 = arith.addf %235, %266 : vector<1x16x16xf32>
      %c24 = arith.constant 24 : index
      %268 = memref.load %arg2[%c24] : memref<98xf32, #tpu.memory_space<smem>>
      %c73 = arith.constant 73 : index
      %269 = memref.load %arg2[%c73] : memref<98xf32, #tpu.memory_space<smem>>
      %270 = vector.extract_strided_slice %236 {offsets = [0, 3, 0], sizes = [1, 16, 16], strides = [1, 1, 1]} : vector<1x22x16xf32> to vector<1x16x16xf32>
      %271 = vector.broadcast %268 : f32 to vector<1x16x16xf32>
      %272 = arith.mulf %271, %270 : vector<1x16x16xf32>
      %273 = vector.extract_strided_slice %237 {offsets = [0, 3, 0], sizes = [1, 16, 16], strides = [1, 1, 1]} : vector<1x22x16xf32> to vector<1x16x16xf32>
      %274 = vector.broadcast %269 : f32 to vector<1x16x16xf32>
      %275 = arith.mulf %274, %273 : vector<1x16x16xf32>
      %276 = arith.addf %272, %275 : vector<1x16x16xf32>
      %277 = arith.addf %205, %276 : vector<1x16x16xf32>
      %c31 = arith.constant 31 : index
      %278 = memref.load %arg2[%c31] : memref<98xf32, #tpu.memory_space<smem>>
      %c80 = arith.constant 80 : index
      %279 = memref.load %arg2[%c80] : memref<98xf32, #tpu.memory_space<smem>>
      %280 = vector.extract_strided_slice %236 {offsets = [0, 4, 0], sizes = [1, 16, 16], strides = [1, 1, 1]} : vector<1x22x16xf32> to vector<1x16x16xf32>
      %281 = vector.broadcast %278 : f32 to vector<1x16x16xf32>
      %282 = arith.mulf %281, %280 : vector<1x16x16xf32>
      %283 = vector.extract_strided_slice %237 {offsets = [0, 4, 0], sizes = [1, 16, 16], strides = [1, 1, 1]} : vector<1x22x16xf32> to vector<1x16x16xf32>
      %284 = vector.broadcast %279 : f32 to vector<1x16x16xf32>
      %285 = arith.mulf %284, %283 : vector<1x16x16xf32>
      %286 = arith.addf %282, %285 : vector<1x16x16xf32>
      %287 = arith.addf %247, %286 : vector<1x16x16xf32>
      %c38 = arith.constant 38 : index
      %288 = memref.load %arg2[%c38] : memref<98xf32, #tpu.memory_space<smem>>
      %c87 = arith.constant 87 : index
      %289 = memref.load %arg2[%c87] : memref<98xf32, #tpu.memory_space<smem>>
      %290 = vector.extract_strided_slice %236 {offsets = [0, 5, 0], sizes = [1, 16, 16], strides = [1, 1, 1]} : vector<1x22x16xf32> to vector<1x16x16xf32>
      %291 = vector.broadcast %288 : f32 to vector<1x16x16xf32>
      %292 = arith.mulf %291, %290 : vector<1x16x16xf32>
      %293 = vector.extract_strided_slice %237 {offsets = [0, 5, 0], sizes = [1, 16, 16], strides = [1, 1, 1]} : vector<1x22x16xf32> to vector<1x16x16xf32>
      %294 = vector.broadcast %289 : f32 to vector<1x16x16xf32>
      %295 = arith.mulf %294, %293 : vector<1x16x16xf32>
      %296 = arith.addf %292, %295 : vector<1x16x16xf32>
      %297 = arith.addf %257, %296 : vector<1x16x16xf32>
      %c45 = arith.constant 45 : index
      %298 = memref.load %arg2[%c45] : memref<98xf32, #tpu.memory_space<smem>>
      %c94 = arith.constant 94 : index
      %299 = memref.load %arg2[%c94] : memref<98xf32, #tpu.memory_space<smem>>
      %300 = vector.extract_strided_slice %236 {offsets = [0, 6, 0], sizes = [1, 16, 16], strides = [1, 1, 1]} : vector<1x22x16xf32> to vector<1x16x16xf32>
      %301 = vector.broadcast %298 : f32 to vector<1x16x16xf32>
      %302 = arith.mulf %301, %300 : vector<1x16x16xf32>
      %303 = vector.extract_strided_slice %237 {offsets = [0, 6, 0], sizes = [1, 16, 16], strides = [1, 1, 1]} : vector<1x22x16xf32> to vector<1x16x16xf32>
      %304 = vector.broadcast %299 : f32 to vector<1x16x16xf32>
      %305 = arith.mulf %304, %303 : vector<1x16x16xf32>
      %306 = arith.addf %302, %305 : vector<1x16x16xf32>
      %307 = arith.addf %267, %306 : vector<1x16x16xf32>
      %c0_39 = arith.constant 0 : index
      %c5_40 = arith.constant 5 : index
      %c4 = arith.constant 4 : index
      %308 = vector.load %arg5[%c0_39, %c5_40, %c4] : memref<1x27x22xf32, #tpu.memory_space<vmem>>, vector<1x22x16xf32>
      %c0_41 = arith.constant 0 : index
      %c5_42 = arith.constant 5 : index
      %c4_43 = arith.constant 4 : index
      %309 = vector.load %arg6[%c0_41, %c5_42, %c4_43] : memref<1x27x22xf32, #tpu.memory_space<vmem>>, vector<1x22x16xf32>
      %c4_44 = arith.constant 4 : index
      %310 = memref.load %arg2[%c4_44] : memref<98xf32, #tpu.memory_space<smem>>
      %c53 = arith.constant 53 : index
      %311 = memref.load %arg2[%c53] : memref<98xf32, #tpu.memory_space<smem>>
      %312 = vector.extract_strided_slice %308 {offsets = [0, 0, 0], sizes = [1, 16, 16], strides = [1, 1, 1]} : vector<1x22x16xf32> to vector<1x16x16xf32>
      %313 = vector.broadcast %310 : f32 to vector<1x16x16xf32>
      %314 = arith.mulf %313, %312 : vector<1x16x16xf32>
      %315 = vector.extract_strided_slice %309 {offsets = [0, 0, 0], sizes = [1, 16, 16], strides = [1, 1, 1]} : vector<1x22x16xf32> to vector<1x16x16xf32>
      %316 = vector.broadcast %311 : f32 to vector<1x16x16xf32>
      %317 = arith.mulf %316, %315 : vector<1x16x16xf32>
      %318 = arith.addf %314, %317 : vector<1x16x16xf32>
      %319 = arith.addf %287, %318 : vector<1x16x16xf32>
      %c11 = arith.constant 11 : index
      %320 = memref.load %arg2[%c11] : memref<98xf32, #tpu.memory_space<smem>>
      %c60 = arith.constant 60 : index
      %321 = memref.load %arg2[%c60] : memref<98xf32, #tpu.memory_space<smem>>
      %322 = vector.extract_strided_slice %308 {offsets = [0, 1, 0], sizes = [1, 16, 16], strides = [1, 1, 1]} : vector<1x22x16xf32> to vector<1x16x16xf32>
      %323 = vector.broadcast %320 : f32 to vector<1x16x16xf32>
      %324 = arith.mulf %323, %322 : vector<1x16x16xf32>
      %325 = vector.extract_strided_slice %309 {offsets = [0, 1, 0], sizes = [1, 16, 16], strides = [1, 1, 1]} : vector<1x22x16xf32> to vector<1x16x16xf32>
      %326 = vector.broadcast %321 : f32 to vector<1x16x16xf32>
      %327 = arith.mulf %326, %325 : vector<1x16x16xf32>
      %328 = arith.addf %324, %327 : vector<1x16x16xf32>
      %329 = arith.addf %297, %328 : vector<1x16x16xf32>
      %c18 = arith.constant 18 : index
      %330 = memref.load %arg2[%c18] : memref<98xf32, #tpu.memory_space<smem>>
      %c67 = arith.constant 67 : index
      %331 = memref.load %arg2[%c67] : memref<98xf32, #tpu.memory_space<smem>>
      %332 = vector.extract_strided_slice %308 {offsets = [0, 2, 0], sizes = [1, 16, 16], strides = [1, 1, 1]} : vector<1x22x16xf32> to vector<1x16x16xf32>
      %333 = vector.broadcast %330 : f32 to vector<1x16x16xf32>
      %334 = arith.mulf %333, %332 : vector<1x16x16xf32>
      %335 = vector.extract_strided_slice %309 {offsets = [0, 2, 0], sizes = [1, 16, 16], strides = [1, 1, 1]} : vector<1x22x16xf32> to vector<1x16x16xf32>
      %336 = vector.broadcast %331 : f32 to vector<1x16x16xf32>
      %337 = arith.mulf %336, %335 : vector<1x16x16xf32>
      %338 = arith.addf %334, %337 : vector<1x16x16xf32>
      %339 = arith.addf %307, %338 : vector<1x16x16xf32>
      %c25 = arith.constant 25 : index
      %340 = memref.load %arg2[%c25] : memref<98xf32, #tpu.memory_space<smem>>
      %c74 = arith.constant 74 : index
      %341 = memref.load %arg2[%c74] : memref<98xf32, #tpu.memory_space<smem>>
      %342 = vector.extract_strided_slice %308 {offsets = [0, 3, 0], sizes = [1, 16, 16], strides = [1, 1, 1]} : vector<1x22x16xf32> to vector<1x16x16xf32>
      %343 = vector.broadcast %340 : f32 to vector<1x16x16xf32>
      %344 = arith.mulf %343, %342 : vector<1x16x16xf32>
      %345 = vector.extract_strided_slice %309 {offsets = [0, 3, 0], sizes = [1, 16, 16], strides = [1, 1, 1]} : vector<1x22x16xf32> to vector<1x16x16xf32>
      %346 = vector.broadcast %341 : f32 to vector<1x16x16xf32>
      %347 = arith.mulf %346, %345 : vector<1x16x16xf32>
      %348 = arith.addf %344, %347 : vector<1x16x16xf32>
      %349 = arith.addf %277, %348 : vector<1x16x16xf32>
      %c32 = arith.constant 32 : index
      %350 = memref.load %arg2[%c32] : memref<98xf32, #tpu.memory_space<smem>>
      %c81 = arith.constant 81 : index
      %351 = memref.load %arg2[%c81] : memref<98xf32, #tpu.memory_space<smem>>
      %352 = vector.extract_strided_slice %308 {offsets = [0, 4, 0], sizes = [1, 16, 16], strides = [1, 1, 1]} : vector<1x22x16xf32> to vector<1x16x16xf32>
      %353 = vector.broadcast %350 : f32 to vector<1x16x16xf32>
      %354 = arith.mulf %353, %352 : vector<1x16x16xf32>
      %355 = vector.extract_strided_slice %309 {offsets = [0, 4, 0], sizes = [1, 16, 16], strides = [1, 1, 1]} : vector<1x22x16xf32> to vector<1x16x16xf32>
      %356 = vector.broadcast %351 : f32 to vector<1x16x16xf32>
      %357 = arith.mulf %356, %355 : vector<1x16x16xf32>
      %358 = arith.addf %354, %357 : vector<1x16x16xf32>
      %359 = arith.addf %319, %358 : vector<1x16x16xf32>
      %c39 = arith.constant 39 : index
      %360 = memref.load %arg2[%c39] : memref<98xf32, #tpu.memory_space<smem>>
      %c88 = arith.constant 88 : index
      %361 = memref.load %arg2[%c88] : memref<98xf32, #tpu.memory_space<smem>>
      %362 = vector.extract_strided_slice %308 {offsets = [0, 5, 0], sizes = [1, 16, 16], strides = [1, 1, 1]} : vector<1x22x16xf32> to vector<1x16x16xf32>
      %363 = vector.broadcast %360 : f32 to vector<1x16x16xf32>
      %364 = arith.mulf %363, %362 : vector<1x16x16xf32>
      %365 = vector.extract_strided_slice %309 {offsets = [0, 5, 0], sizes = [1, 16, 16], strides = [1, 1, 1]} : vector<1x22x16xf32> to vector<1x16x16xf32>
      %366 = vector.broadcast %361 : f32 to vector<1x16x16xf32>
      %367 = arith.mulf %366, %365 : vector<1x16x16xf32>
      %368 = arith.addf %364, %367 : vector<1x16x16xf32>
      %369 = arith.addf %329, %368 : vector<1x16x16xf32>
      %c46 = arith.constant 46 : index
      %370 = memref.load %arg2[%c46] : memref<98xf32, #tpu.memory_space<smem>>
      %c95 = arith.constant 95 : index
      %371 = memref.load %arg2[%c95] : memref<98xf32, #tpu.memory_space<smem>>
      %372 = vector.extract_strided_slice %308 {offsets = [0, 6, 0], sizes = [1, 16, 16], strides = [1, 1, 1]} : vector<1x22x16xf32> to vector<1x16x16xf32>
      %373 = vector.broadcast %370 : f32 to vector<1x16x16xf32>
      %374 = arith.mulf %373, %372 : vector<1x16x16xf32>
      %375 = vector.extract_strided_slice %309 {offsets = [0, 6, 0], sizes = [1, 16, 16], strides = [1, 1, 1]} : vector<1x22x16xf32> to vector<1x16x16xf32>
      %376 = vector.broadcast %371 : f32 to vector<1x16x16xf32>
      %377 = arith.mulf %376, %375 : vector<1x16x16xf32>
      %378 = arith.addf %374, %377 : vector<1x16x16xf32>
      %379 = arith.addf %339, %378 : vector<1x16x16xf32>
      %c0_45 = arith.constant 0 : index
      %c5_46 = arith.constant 5 : index
      %c5_47 = arith.constant 5 : index
      %380 = vector.load %arg5[%c0_45, %c5_46, %c5_47] : memref<1x27x22xf32, #tpu.memory_space<vmem>>, vector<1x22x16xf32>
      %c0_48 = arith.constant 0 : index
      %c5_49 = arith.constant 5 : index
      %c5_50 = arith.constant 5 : index
      %381 = vector.load %arg6[%c0_48, %c5_49, %c5_50] : memref<1x27x22xf32, #tpu.memory_space<vmem>>, vector<1x22x16xf32>
      %c5_51 = arith.constant 5 : index
      %382 = memref.load %arg2[%c5_51] : memref<98xf32, #tpu.memory_space<smem>>
      %c54 = arith.constant 54 : index
      %383 = memref.load %arg2[%c54] : memref<98xf32, #tpu.memory_space<smem>>
      %384 = vector.extract_strided_slice %380 {offsets = [0, 0, 0], sizes = [1, 16, 16], strides = [1, 1, 1]} : vector<1x22x16xf32> to vector<1x16x16xf32>
      %385 = vector.broadcast %382 : f32 to vector<1x16x16xf32>
      %386 = arith.mulf %385, %384 : vector<1x16x16xf32>
      %387 = vector.extract_strided_slice %381 {offsets = [0, 0, 0], sizes = [1, 16, 16], strides = [1, 1, 1]} : vector<1x22x16xf32> to vector<1x16x16xf32>
      %388 = vector.broadcast %383 : f32 to vector<1x16x16xf32>
      %389 = arith.mulf %388, %387 : vector<1x16x16xf32>
      %390 = arith.addf %386, %389 : vector<1x16x16xf32>
      %391 = arith.addf %359, %390 : vector<1x16x16xf32>
      %c12 = arith.constant 12 : index
      %392 = memref.load %arg2[%c12] : memref<98xf32, #tpu.memory_space<smem>>
      %c61 = arith.constant 61 : index
      %393 = memref.load %arg2[%c61] : memref<98xf32, #tpu.memory_space<smem>>
      %394 = vector.extract_strided_slice %380 {offsets = [0, 1, 0], sizes = [1, 16, 16], strides = [1, 1, 1]} : vector<1x22x16xf32> to vector<1x16x16xf32>
      %395 = vector.broadcast %392 : f32 to vector<1x16x16xf32>
      %396 = arith.mulf %395, %394 : vector<1x16x16xf32>
      %397 = vector.extract_strided_slice %381 {offsets = [0, 1, 0], sizes = [1, 16, 16], strides = [1, 1, 1]} : vector<1x22x16xf32> to vector<1x16x16xf32>
      %398 = vector.broadcast %393 : f32 to vector<1x16x16xf32>
      %399 = arith.mulf %398, %397 : vector<1x16x16xf32>
      %400 = arith.addf %396, %399 : vector<1x16x16xf32>
      %401 = arith.addf %369, %400 : vector<1x16x16xf32>
      %c19 = arith.constant 19 : index
      %402 = memref.load %arg2[%c19] : memref<98xf32, #tpu.memory_space<smem>>
      %c68 = arith.constant 68 : index
      %403 = memref.load %arg2[%c68] : memref<98xf32, #tpu.memory_space<smem>>
      %404 = vector.extract_strided_slice %380 {offsets = [0, 2, 0], sizes = [1, 16, 16], strides = [1, 1, 1]} : vector<1x22x16xf32> to vector<1x16x16xf32>
      %405 = vector.broadcast %402 : f32 to vector<1x16x16xf32>
      %406 = arith.mulf %405, %404 : vector<1x16x16xf32>
      %407 = vector.extract_strided_slice %381 {offsets = [0, 2, 0], sizes = [1, 16, 16], strides = [1, 1, 1]} : vector<1x22x16xf32> to vector<1x16x16xf32>
      %408 = vector.broadcast %403 : f32 to vector<1x16x16xf32>
      %409 = arith.mulf %408, %407 : vector<1x16x16xf32>
      %410 = arith.addf %406, %409 : vector<1x16x16xf32>
      %411 = arith.addf %379, %410 : vector<1x16x16xf32>
      %c26 = arith.constant 26 : index
      %412 = memref.load %arg2[%c26] : memref<98xf32, #tpu.memory_space<smem>>
      %c75 = arith.constant 75 : index
      %413 = memref.load %arg2[%c75] : memref<98xf32, #tpu.memory_space<smem>>
      %414 = vector.extract_strided_slice %380 {offsets = [0, 3, 0], sizes = [1, 16, 16], strides = [1, 1, 1]} : vector<1x22x16xf32> to vector<1x16x16xf32>
      %415 = vector.broadcast %412 : f32 to vector<1x16x16xf32>
      %416 = arith.mulf %415, %414 : vector<1x16x16xf32>
      %417 = vector.extract_strided_slice %381 {offsets = [0, 3, 0], sizes = [1, 16, 16], strides = [1, 1, 1]} : vector<1x22x16xf32> to vector<1x16x16xf32>
      %418 = vector.broadcast %413 : f32 to vector<1x16x16xf32>
      %419 = arith.mulf %418, %417 : vector<1x16x16xf32>
      %420 = arith.addf %416, %419 : vector<1x16x16xf32>
      %421 = arith.addf %349, %420 : vector<1x16x16xf32>
      %c33 = arith.constant 33 : index
      %422 = memref.load %arg2[%c33] : memref<98xf32, #tpu.memory_space<smem>>
      %c82 = arith.constant 82 : index
      %423 = memref.load %arg2[%c82] : memref<98xf32, #tpu.memory_space<smem>>
      %424 = vector.extract_strided_slice %380 {offsets = [0, 4, 0], sizes = [1, 16, 16], strides = [1, 1, 1]} : vector<1x22x16xf32> to vector<1x16x16xf32>
      %425 = vector.broadcast %422 : f32 to vector<1x16x16xf32>
      %426 = arith.mulf %425, %424 : vector<1x16x16xf32>
      %427 = vector.extract_strided_slice %381 {offsets = [0, 4, 0], sizes = [1, 16, 16], strides = [1, 1, 1]} : vector<1x22x16xf32> to vector<1x16x16xf32>
      %428 = vector.broadcast %423 : f32 to vector<1x16x16xf32>
      %429 = arith.mulf %428, %427 : vector<1x16x16xf32>
      %430 = arith.addf %426, %429 : vector<1x16x16xf32>
      %431 = arith.addf %391, %430 : vector<1x16x16xf32>
      %c40 = arith.constant 40 : index
      %432 = memref.load %arg2[%c40] : memref<98xf32, #tpu.memory_space<smem>>
      %c89 = arith.constant 89 : index
      %433 = memref.load %arg2[%c89] : memref<98xf32, #tpu.memory_space<smem>>
      %434 = vector.extract_strided_slice %380 {offsets = [0, 5, 0], sizes = [1, 16, 16], strides = [1, 1, 1]} : vector<1x22x16xf32> to vector<1x16x16xf32>
      %435 = vector.broadcast %432 : f32 to vector<1x16x16xf32>
      %436 = arith.mulf %435, %434 : vector<1x16x16xf32>
      %437 = vector.extract_strided_slice %381 {offsets = [0, 5, 0], sizes = [1, 16, 16], strides = [1, 1, 1]} : vector<1x22x16xf32> to vector<1x16x16xf32>
      %438 = vector.broadcast %433 : f32 to vector<1x16x16xf32>
      %439 = arith.mulf %438, %437 : vector<1x16x16xf32>
      %440 = arith.addf %436, %439 : vector<1x16x16xf32>
      %441 = arith.addf %401, %440 : vector<1x16x16xf32>
      %c47 = arith.constant 47 : index
      %442 = memref.load %arg2[%c47] : memref<98xf32, #tpu.memory_space<smem>>
      %c96 = arith.constant 96 : index
      %443 = memref.load %arg2[%c96] : memref<98xf32, #tpu.memory_space<smem>>
      %444 = vector.extract_strided_slice %380 {offsets = [0, 6, 0], sizes = [1, 16, 16], strides = [1, 1, 1]} : vector<1x22x16xf32> to vector<1x16x16xf32>
      %445 = vector.broadcast %442 : f32 to vector<1x16x16xf32>
      %446 = arith.mulf %445, %444 : vector<1x16x16xf32>
      %447 = vector.extract_strided_slice %381 {offsets = [0, 6, 0], sizes = [1, 16, 16], strides = [1, 1, 1]} : vector<1x22x16xf32> to vector<1x16x16xf32>
      %448 = vector.broadcast %443 : f32 to vector<1x16x16xf32>
      %449 = arith.mulf %448, %447 : vector<1x16x16xf32>
      %450 = arith.addf %446, %449 : vector<1x16x16xf32>
      %451 = arith.addf %411, %450 : vector<1x16x16xf32>
      %c0_52 = arith.constant 0 : index
      %c5_53 = arith.constant 5 : index
      %c6 = arith.constant 6 : index
      %452 = vector.load %arg5[%c0_52, %c5_53, %c6] : memref<1x27x22xf32, #tpu.memory_space<vmem>>, vector<1x22x16xf32>
      %c0_54 = arith.constant 0 : index
      %c5_55 = arith.constant 5 : index
      %c6_56 = arith.constant 6 : index
      %453 = vector.load %arg6[%c0_54, %c5_55, %c6_56] : memref<1x27x22xf32, #tpu.memory_space<vmem>>, vector<1x22x16xf32>
      %c6_57 = arith.constant 6 : index
      %454 = memref.load %arg2[%c6_57] : memref<98xf32, #tpu.memory_space<smem>>
      %c55 = arith.constant 55 : index
      %455 = memref.load %arg2[%c55] : memref<98xf32, #tpu.memory_space<smem>>
      %456 = vector.extract_strided_slice %452 {offsets = [0, 0, 0], sizes = [1, 16, 16], strides = [1, 1, 1]} : vector<1x22x16xf32> to vector<1x16x16xf32>
      %457 = vector.broadcast %454 : f32 to vector<1x16x16xf32>
      %458 = arith.mulf %457, %456 : vector<1x16x16xf32>
      %459 = vector.extract_strided_slice %453 {offsets = [0, 0, 0], sizes = [1, 16, 16], strides = [1, 1, 1]} : vector<1x22x16xf32> to vector<1x16x16xf32>
      %460 = vector.broadcast %455 : f32 to vector<1x16x16xf32>
      %461 = arith.mulf %460, %459 : vector<1x16x16xf32>
      %462 = arith.addf %458, %461 : vector<1x16x16xf32>
      %463 = arith.addf %431, %462 : vector<1x16x16xf32>
      %c13 = arith.constant 13 : index
      %464 = memref.load %arg2[%c13] : memref<98xf32, #tpu.memory_space<smem>>
      %c62 = arith.constant 62 : index
      %465 = memref.load %arg2[%c62] : memref<98xf32, #tpu.memory_space<smem>>
      %466 = vector.extract_strided_slice %452 {offsets = [0, 1, 0], sizes = [1, 16, 16], strides = [1, 1, 1]} : vector<1x22x16xf32> to vector<1x16x16xf32>
      %467 = vector.broadcast %464 : f32 to vector<1x16x16xf32>
      %468 = arith.mulf %467, %466 : vector<1x16x16xf32>
      %469 = vector.extract_strided_slice %453 {offsets = [0, 1, 0], sizes = [1, 16, 16], strides = [1, 1, 1]} : vector<1x22x16xf32> to vector<1x16x16xf32>
      %470 = vector.broadcast %465 : f32 to vector<1x16x16xf32>
      %471 = arith.mulf %470, %469 : vector<1x16x16xf32>
      %472 = arith.addf %468, %471 : vector<1x16x16xf32>
      %473 = arith.addf %441, %472 : vector<1x16x16xf32>
      %c20 = arith.constant 20 : index
      %474 = memref.load %arg2[%c20] : memref<98xf32, #tpu.memory_space<smem>>
      %c69 = arith.constant 69 : index
      %475 = memref.load %arg2[%c69] : memref<98xf32, #tpu.memory_space<smem>>
      %476 = vector.extract_strided_slice %452 {offsets = [0, 2, 0], sizes = [1, 16, 16], strides = [1, 1, 1]} : vector<1x22x16xf32> to vector<1x16x16xf32>
      %477 = vector.broadcast %474 : f32 to vector<1x16x16xf32>
      %478 = arith.mulf %477, %476 : vector<1x16x16xf32>
      %479 = vector.extract_strided_slice %453 {offsets = [0, 2, 0], sizes = [1, 16, 16], strides = [1, 1, 1]} : vector<1x22x16xf32> to vector<1x16x16xf32>
      %480 = vector.broadcast %475 : f32 to vector<1x16x16xf32>
      %481 = arith.mulf %480, %479 : vector<1x16x16xf32>
      %482 = arith.addf %478, %481 : vector<1x16x16xf32>
      %483 = arith.addf %451, %482 : vector<1x16x16xf32>
      %c27 = arith.constant 27 : index
      %484 = memref.load %arg2[%c27] : memref<98xf32, #tpu.memory_space<smem>>
      %c76 = arith.constant 76 : index
      %485 = memref.load %arg2[%c76] : memref<98xf32, #tpu.memory_space<smem>>
      %486 = vector.extract_strided_slice %452 {offsets = [0, 3, 0], sizes = [1, 16, 16], strides = [1, 1, 1]} : vector<1x22x16xf32> to vector<1x16x16xf32>
      %487 = vector.broadcast %484 : f32 to vector<1x16x16xf32>
      %488 = arith.mulf %487, %486 : vector<1x16x16xf32>
      %489 = vector.extract_strided_slice %453 {offsets = [0, 3, 0], sizes = [1, 16, 16], strides = [1, 1, 1]} : vector<1x22x16xf32> to vector<1x16x16xf32>
      %490 = vector.broadcast %485 : f32 to vector<1x16x16xf32>
      %491 = arith.mulf %490, %489 : vector<1x16x16xf32>
      %492 = arith.addf %488, %491 : vector<1x16x16xf32>
      %493 = arith.addf %421, %492 : vector<1x16x16xf32>
      %c34 = arith.constant 34 : index
      %494 = memref.load %arg2[%c34] : memref<98xf32, #tpu.memory_space<smem>>
      %c83 = arith.constant 83 : index
      %495 = memref.load %arg2[%c83] : memref<98xf32, #tpu.memory_space<smem>>
      %496 = vector.extract_strided_slice %452 {offsets = [0, 4, 0], sizes = [1, 16, 16], strides = [1, 1, 1]} : vector<1x22x16xf32> to vector<1x16x16xf32>
      %497 = vector.broadcast %494 : f32 to vector<1x16x16xf32>
      %498 = arith.mulf %497, %496 : vector<1x16x16xf32>
      %499 = vector.extract_strided_slice %453 {offsets = [0, 4, 0], sizes = [1, 16, 16], strides = [1, 1, 1]} : vector<1x22x16xf32> to vector<1x16x16xf32>
      %500 = vector.broadcast %495 : f32 to vector<1x16x16xf32>
      %501 = arith.mulf %500, %499 : vector<1x16x16xf32>
      %502 = arith.addf %498, %501 : vector<1x16x16xf32>
      %503 = arith.addf %463, %502 : vector<1x16x16xf32>
      %c41 = arith.constant 41 : index
      %504 = memref.load %arg2[%c41] : memref<98xf32, #tpu.memory_space<smem>>
      %c90 = arith.constant 90 : index
      %505 = memref.load %arg2[%c90] : memref<98xf32, #tpu.memory_space<smem>>
      %506 = vector.extract_strided_slice %452 {offsets = [0, 5, 0], sizes = [1, 16, 16], strides = [1, 1, 1]} : vector<1x22x16xf32> to vector<1x16x16xf32>
      %507 = vector.broadcast %504 : f32 to vector<1x16x16xf32>
      %508 = arith.mulf %507, %506 : vector<1x16x16xf32>
      %509 = vector.extract_strided_slice %453 {offsets = [0, 5, 0], sizes = [1, 16, 16], strides = [1, 1, 1]} : vector<1x22x16xf32> to vector<1x16x16xf32>
      %510 = vector.broadcast %505 : f32 to vector<1x16x16xf32>
      %511 = arith.mulf %510, %509 : vector<1x16x16xf32>
      %512 = arith.addf %508, %511 : vector<1x16x16xf32>
      %513 = arith.addf %473, %512 : vector<1x16x16xf32>
      %c48 = arith.constant 48 : index
      %514 = memref.load %arg2[%c48] : memref<98xf32, #tpu.memory_space<smem>>
      %c97 = arith.constant 97 : index
      %515 = memref.load %arg2[%c97] : memref<98xf32, #tpu.memory_space<smem>>
      %516 = vector.extract_strided_slice %452 {offsets = [0, 6, 0], sizes = [1, 16, 16], strides = [1, 1, 1]} : vector<1x22x16xf32> to vector<1x16x16xf32>
      %517 = vector.broadcast %514 : f32 to vector<1x16x16xf32>
      %518 = arith.mulf %517, %516 : vector<1x16x16xf32>
      %519 = vector.extract_strided_slice %453 {offsets = [0, 6, 0], sizes = [1, 16, 16], strides = [1, 1, 1]} : vector<1x22x16xf32> to vector<1x16x16xf32>
      %520 = vector.broadcast %515 : f32 to vector<1x16x16xf32>
      %521 = arith.mulf %520, %519 : vector<1x16x16xf32>
      %522 = arith.addf %518, %521 : vector<1x16x16xf32>
      %523 = arith.addf %483, %522 : vector<1x16x16xf32>
      %524 = arith.addf %503, %513 : vector<1x16x16xf32>
      %525 = arith.addf %523, %493 : vector<1x16x16xf32>
      %526 = arith.addf %524, %525 : vector<1x16x16xf32>
      %527 = arith.negf %526 : vector<1x16x16xf32>
      %528 = math.exp %527 : vector<1x16x16xf32>
      %cst_58 = arith.constant 1.000000e+00 : f32
      %529 = vector.broadcast %cst_58 : f32 to vector<1x16x16xf32>
      %530 = arith.addf %529, %528 : vector<1x16x16xf32>
      %531 = arith.divf %529, %530 : vector<1x16x16xf32>
      %532 = vector.shape_cast %531 : vector<1x16x16xf32> to vector<1x1x16x16xf32>
      %c0_59 = arith.constant 0 : index
      %c0_60 = arith.constant 0 : index
      %c0_61 = arith.constant 0 : index
      %c0_62 = arith.constant 0 : index
      %533 = vector.load %arg4[%c0_59, %c0_60, %c0_61, %c0_62] : memref<1x1x16x16xf32, #tpu.memory_space<vmem>>, vector<1x1x16x16xf32>
      tpu.vector_store %arg4[%c0_59, %c0_60, %c0_61, %c0_62], %532 {strides = array<i32>} : memref<1x1x16x16xf32, #tpu.memory_space<vmem>>, vector<1x1x16x16xf32>,
    } else {
    }
    return
  }
  func.func @transform_0(%arg0: i32, %arg1: i32, %arg2: memref<98xf32, #tpu.memory_space<smem>>) -> (i32, i32, i32, i32) {
    %c0_i32 = arith.constant 0 : i32
    %c0_i32_0 = arith.constant 0 : i32
    %c0_i32_1 = arith.constant 0 : i32
    return %arg0, %arg1, %c0_i32, %c0_i32_0 : i32, i32, i32, i32
  }
  func.func @transform_1(%arg0: i32, %arg1: i32, %arg2: memref<98xf32, #tpu.memory_space<smem>>) -> (i32, i32, i32, i32) {
    %c0_i32 = arith.constant 0 : i32
    %c0_i32_0 = arith.constant 0 : i32
    %c0_i32_1 = arith.constant 0 : i32
    %c0_i32_2 = arith.constant 0 : i32
    return %arg0, %c0_i32, %c0_i32_0, %c0_i32_1 : i32, i32, i32, i32
  }
}

</mosaic_0001>

<bundles_post_ra>
// kernel: tpu_custom_call.1
= control target key start
LH: loop header
LB: loop body
LE: loop exit
PB: predicated region body
PF: predicated region fallthrough
CT: control target
= control target key end

     0   :  { %s2090_s9 = smov [#allocation5]   ;;  %s3466_s0 = inlined_call_operand.hbm [shape: f32[98], index: 0, kind: input, shape index: {}]   ;;  %s3467_s1 = inlined_call_operand.hbm [shape: f32[2,4,16,16], index: 1, kind: input, shape index: {}]   ;;  %s3468_s2 = inlined_call_operand.hbm [shape: f32[2,1,16,16], index: 2, kind: output, shape index: {}]  }
   0x1   :  { %3482 = sst [smem:[#allocation44_spill]] %s3467_s1 }
   0x2   :  { %8 = dma.hbm_to_smem %s3466_s0, 16, %s2090_s9, [#allocation4] }
   0x3   :  { %2056 = dma.done.wait [#allocation4], 16 }
   0x4   :  { %2057 = vsyncadd [#allocation4], 4294967280 }
   0x5   :  { %10 = sfence }
   0x6   :  { %11 = vsyncpa [#allocation7], 0 }
   0x7   :  { %13 = vsyncpa [#allocation7 + $0x1], 0 }
   0x8   :  { %14 = vsyncpa [#allocation8], 0 }
   0x9   :  { %16 = vsyncpa [#allocation8 + $0x1], 0  ;;  %s2123_s12 = smov 0   ;;  %s2125_s13 = smov 0  }
   0xa   :  { %s2127_s14 = smov 0   ;;  %s2129_s15 = smov 0  }
   0xb   :  { %s2131_s16 = smov 0   ;;  %s2133_s17 = smov 0  }
   0xc LB: > { %3483 = sst [smem:[#allocation13_spill]] %s2072_s13  ;;  %s1765_s0 = sadd.s32 4294967295, %s2088_s17   ;;  %s2088_s17 = sphi %s2133_s17, %s22_s17   ;;  %s2084_s16 = sphi %s2131_s16, %s3570_s16   ;;  %s2080_s15 = sphi %s2129_s15, %s3569_s15   ;;  %s2076_s14 = sphi %s2127_s14, %s3568_s14   ;;  %s2072_s13 = sphi %s2125_s13, %s3567_s13   ;;  %s2068_s12 = sphi %s2123_s12, %s3566_s12  }
   0xd   : > { %3484 = sst [smem:[#allocation14_spill]] %s2076_s14  ;;  %s1766_s18 = sadd.s32 4294967294, %s2088_s17  }
   0xe   : > { %3485 = sst [smem:[#allocation15_spill]] %s2084_s16  ;;  %s34_s19 = sadd.s32 1, %s2084_s16 }
   0xf   : > { %3486 = sst [smem:[#allocation16_spill]] %s2088_s17  ;;  %s43_s20 = sadd.s32 1, %s2076_s14 }
  0x10   : > { %p36_p0 = scmp.ge.s32.totalorder %s34_s19, 2  ;;  %p50_p1 = scmp.ne.s32.totalorder %s2076_s14, %s2072_s13 }
  0x11   : > { %p51_p2 = scmp.eq.s32.totalorder %s2088_s17, 0  ;;  %p56_p3 = scmp.ne.s32.totalorder %s2072_s13, %s2068_s12 }
  0x12   : > { %s3572_s19 = smov (%p36_p0, %s34_s19), 0  ;;  %p57_p5 = scmp.eq.s32.totalorder %s1765_s0, 0 }
  0x13   : > { %3487 = sst [smem:[#allocation17_spill]] %s3572_s19  ;;  %p2164_p4 = por %p51_p2, %p50_p1 }
  0x14   : > { %s38_s22 = ssub.s32 %s2084_s16, %s3572_s19  ;;  %p80_p6 = scmp.eq.s32.totalorder %s1765_s0, 1 }
  0x15   : > { %p41_p7 = scmp.eq.s32.totalorder %s38_s22, 0  ;;  %p2170_p8 = por %p57_p5, %p56_p3 }
  0x16   : > { %p2174_p9 = por %p80_p6, %p50_p1  ;;  %p86_p10 = scmp.eq.s32.totalorder %s1766_s18, 1 }
  0x17   : > { %s2179_s25 = scalar_select %p41_p7, %s2076_s14, %s43_s20  }
  0x18   : > { %p2181_p11 = por %p86_p10, %p56_p3  ;;  %p1893_p13 = scmp.lt.s32.totalorder %s2088_s17, 2 }
  0x19   : > { %3491 = sst [smem:[#allocation18_spill]] %s2179_s25  ;;  %s106_s27 = sand.u32 1, %s2076_s14  }
  0x1a   : > { %s3492_s26 = scalar_select %p2181_p11, 1, 0 }
  0x1b   : > { %s1769_s28 = sshll.u32 %s106_s27, 6  ;;  %s1879_s29 = sshll.u32 %s2084_s16, 10 }
  0x1c   : > { %3493 = sst [smem:[#allocation19_spill]] %s3492_s26  ;;  %s110_s5 = scalar_lea.vmem [#allocation6], %s1769_s28 }
  0x1d   : > { %s3494_s1 = sld [smem:[#allocation44_spill]]  ;;  %s120_s6 = sshll.u32 %s110_s5, 4  ;;  %s121_s6 = int_to_ptr.vmem [resolvable:$true] %s120_s6 }
  0x1e   : > { %p2194_p0 = pnand %p1893_p13, %p2164_p4  ;;  %p1772_p1 = scmp.ge.s32.totalorder %s2088_s17, 1 }
  0x1f   : > { %s107_s8 = scalar_lea.sflag [#allocation7], %s106_s27  ;;  %s1991_s9 = scalar_lea.vmem %s121_s6, 1024 }
  0x20   : > { %p1980_p2 = pneg %p2194_p0  ;;  %p1992_p3 = scmp.ne.s32.totalorder %s121_s6, %s1991_s9 }
  0x21   : > { %s2091_s10 = smov [#allocation6]  }
  0x22   : > { %p1994_p5 = pnand %p1992_p3, %p1980_p2  ;;  %s1996_s11 = sshll.u32 %s2091_s10, 4  ;;  %s1997_s11 = int_to_ptr.vmem [resolvable:$false] %s1996_s11 }
  0x23   : > { %s119_s4 = scalar_lea.hbm %s3494_s1, %s1879_s29  ;;  %s1998_s0 = scalar_lea.vmem %s1997_s11, 2048 }
  0x24   : > { %p1995_p6 = pneg %p1994_p5  ;;  %p1999_p7 = scmp.lt.s32.totalorder %s121_s6, %s1997_s11 }
  0x25   : > { %p2000_p10 = scmp.lt.s32.totalorder %s1998_s0, %s1991_s9 }
  0x27   : > { %p2001_p12 = por %p2000_p10, %p1999_p7 }
  0x29   : > { %p2002_p4 = pnand %p2001_p12, %p1995_p6 }
  0x2b   : > { %2005 = shalt.err (!%p2002_p4)
}
  0x2c   : > { %s2092_s18 = smov 128   ;;  %s2093_s20 = smov 8  }
  0x2d   : > { %1888 = dma.hbm_to_vmem [thread:$0]  (!%p2194_p0), %s119_s4, 1024, %s121_s6, %s107_s8, %s2092_s18, %s2092_s18, %s2093_s20  }
  0x2e   : > { %p128_p13 = scmp.lt.s32.totalorder %s2088_s17, 3 }
  0x30   : > { %p129_p2 = pnand %p1772_p1, %p128_p13 }
  0x32   : > { %132 = sbr.rel (%p129_p2) target bundleno = 592 (0x250), region = 24 }
  0x37   : > { %s2207_s21 = sand.u32 1, %s2072_s13  }
  0x38   : > { %s1773_s22 = sshll.u32 %s2207_s21, 6  ;;  %s135_s27 = scalar_lea.sflag [#allocation7], %s2207_s21 }
  0x39   : > { %s2211_s28 = scalar_lea.vmem [#allocation6], %s1773_s22 }
  0x3a   : > { %2059 = dma.done.wait (%p2170_p8), %s135_s27, 1024  }
  0x3b   : > { %2061 = vsyncadd (%p2170_p8), %s135_s27, 4294966272  ;;  %vm201_vm0 = vcmask 174080   ;;  %vm204_vm1 = vcmask 23552   ;;  %v2094_v0 = vmov 0.0   ;;  %vm207_vm2 = vcmask 179352   ;;  %v159_v1 = vld [vmem:[%s2211_s28] sm:$0xff] }
  0x3c   : > { %202 = vst.msk [vmem:[#allocation2 + $0x5] sm:$0x7] %vm201_vm0, %v2094_v0  ;;  %203 = vst.msk [vmem:[#allocation2 + $0x18] sm:$0x7] %vm201_vm0, %v2094_v0  ;;  %vm167_vm3 = vcmask 130048   ;;  %v161_v2 = vld [vmem:[%s2211_s28 + $0x10] sm:$0xff] }
  0x3d   : > { %210 = vst.msk [vmem:[#allocation3 + $0x5] sm:$0x7] %vm201_vm0, %v2094_v0  ;;  %211 = vst.msk [vmem:[#allocation3 + $0x18] sm:$0x7] %vm201_vm0, %v2094_v0  ;;  %v163_v3 = vld [vmem:[%s2211_s28 + $0x20] sm:$0xff]  ;;  %v165_v4 = vld [vmem:[%s2211_s28 + $0x30] sm:$0xff] }
  0x3e   : > { %212 = vst.msk [vmem:[#allocation3 + $0x8] sm:$0xff] %vm204_vm1, %v2094_v0  ;;  %205 = vst.msk [vmem:[#allocation2 + $0x8] sm:$0xff] %vm204_vm1, %v2094_v0  ;;  %v184_v5 = vsel %vm167_vm3, %v159_v1, -inf  ;;  %v185_v6 = vsel %vm167_vm3, %v161_v2, -inf  ;;  %v186_v7 = vsel %vm167_vm3, %v163_v3, -inf  ;;  %v168_v8 = vsel %vm167_vm3, %v159_v1, 0.0 }
  0x3f   : > { %206 = vst.msk [vmem:[#allocation2 + $0x10] sm:$0xff] %vm204_vm1, %v2094_v0  ;;  %213 = vst.msk [vmem:[#allocation3 + $0x10] sm:$0xff] %vm204_vm1, %v2094_v0  ;;  %v160_v9 = vld [vmem:[%s2211_s28 + $0x8] sm:$0xff]  ;;  %v187_v10 = vmax.f32 %v184_v5, %v186_v7  ;;  %v188_v11 = vsel %vm167_vm3, %v165_v4, -inf  ;;  %v169_v12 = vsel %vm167_vm3, %v161_v2, 0.0  ;;  %v171_v13 = vsel %vm167_vm3, %v163_v3, 0.0 }
  0x40   : > { %214 = vst.msk [vmem:[#allocation3 + $0x8] sm:$0xff] %vm207_vm2, %v2094_v0  ;;  %208 = vst.msk [vmem:[#allocation2 + $0x8] sm:$0xff] %vm207_vm2, %v2094_v0  ;;  %v162_v14 = vld [vmem:[%s2211_s28 + $0x18] sm:$0xff]  ;;  %v164_v15 = vld [vmem:[%s2211_s28 + $0x28] sm:$0xff]  ;;  %v189_v17 = vmax.f32 %v185_v6, %v188_v11  ;;  %v170_v18 = vadd.f32 %v169_v12, %v168_v8  ;;  %v173_v19 = vsel %vm167_vm3, %v165_v4, 0.0  ;;  %v191_v20 = vsel %vm167_vm3, %v160_v9, -inf }
  0x41   : > { %209 = vst.msk [vmem:[#allocation2 + $0x10] sm:$0xff] %vm207_vm2, %v2094_v0  ;;  %215 = vst.msk [vmem:[#allocation3 + $0x10] sm:$0xff] %vm207_vm2, %v2094_v0  ;;  %v166_v16 = vld [vmem:[%s2211_s28 + $0x38] sm:$0xff]  ;;  %v192_v21 = vsel %vm167_vm3, %v162_v14, -inf  ;;  %v193_v22 = vsel %vm167_vm3, %v164_v15, -inf  ;;  %v175_v24 = vsel %vm167_vm3, %v160_v9, 0.0 }
  0x42   : > { %v195_v23 = vsel %vm167_vm3, %v166_v16, -inf  ;;  %v190_v25 = vmax.f32 %v187_v10, %v189_v17  ;;  %v172_v26 = vadd.f32 %v171_v13, %v170_v18  ;;  %v194_v27 = vmax.f32 %v191_v20, %v193_v22  ;;  %s2095_s23 = smov 3   ;;  %s2241_s29 = sld [smem:[#allocation5 + $0x32]] }
  0x43   : > { %v196_v28 = vmax.f32 %v192_v21, %v195_v23  ;;  %v176_v29 = vsel %vm167_vm3, %v162_v14, 0.0  ;;  %v178_v30 = vsel %vm167_vm3, %v164_v15, 0.0  ;;  %v180_v34 = vsel %vm167_vm3, %v166_v16, 0.0  ;;  %s2243_s30 = sld [smem:[#allocation5 + $0x1]]  ;;  %s2096_s9 = smov 127  }
  0x44   : > { %229 = vrot.lane.b32.xlu1 %v190_v25, %s2095_s23  ;;  %v174_v31 = vadd.f32 %v173_v19, %v172_v26  ;;  %v177_v33 = vadd.f32 %v176_v29, %v175_v24  ;;  %vm224_vm4 = vcmask 154648   ;;  %s1790_s3 = sld [smem:[#allocation5 + $0x8]]  ;;  %vm355_vm5 = vcmask 1043456   ;;  %s3502_s16 = smov 124  }
  0x45   : > { %v197_v32 = vmax.f32 %v194_v27, %v196_v28  ;;  %s1791_s4 = sld [smem:[#allocation5 + $0x39]]  ;;  %s3503_s25 = smov 125   ;;  %vm1616_vm6 = vcmask 1046528   ;;  %vm1643_vm7 = vcmask 1045504  }
  0x46   : > { %218 = vrot.lane.b32.xlu0 %v174_v31, %s2095_s23  ;;  %v179_v35 = vadd.f32 %v178_v30, %v177_v33  ;;  %s1793_s5 = sld [smem:[#allocation5 + $0x40]] }
  0x47   : > { %s1792_s6 = sld [smem:[#allocation5 + $0xf]] }
  0x48   : > { %231 = vrot.lane.b32.xlu1 %v197_v32, %s2095_s23  ;;  %v181_v36 = vadd.f32 %v180_v34, %v179_v35  ;;  %v424_v41 = vstv %s2241_s29  ;;  %s1794_s7 = sld [smem:[#allocation5 + $0x16]] }
  0x49   : > { %v421_v43 = vstv %s2243_s30  ;;  %s1795_s8 = sld [smem:[#allocation5 + $0x47]] }
  0x4a   : > { %220 = vrot.lane.b32.xlu0 %v181_v36, %s2095_s23  ;;  %v441_v45 = vstv %s1790_s3  ;;  %s2273_s10 = sld [smem:[#allocation5 + $0x33]]  ;;  %s2097_s23 = smov 126  }
  0x4b   : > { %v445_v46 = vstv %s1791_s4  ;;  %s2277_s11 = sld [smem:[#allocation5 + $0x2]] }
  0x4c   : > { %v473_v59 = vstv %s1793_s5  ;;  %s1805_s0 = sld [smem:[#allocation5 + $0x3a]] }
  0x4d   : > { %v469_v0 = vstv %s1792_s6  ;;  %s1804_s18 = sld [smem:[#allocation5 + $0x9]] }
  0x4e   : > { %v497_v3 = vstv %s1794_s7  ;;  %s1806_s20 = sld [smem:[#allocation5 + $0x10]] }
  0x4f   : > { %v501_v4 = vstv %s1795_s8  ;;  %s1807_s22 = sld [smem:[#allocation5 + $0x41]] }
  0x50   : > { %v623_v17 = vstv %s2273_s10  ;;  %s1808_s27 = sld [smem:[#allocation5 + $0x17]]  ;;  %s3472_s10 = smov 125  }
  0x51   : > { %v620_v22 = vstv %s2277_s11  ;;  %s1809_s28 = sld [smem:[#allocation5 + $0x48]] }
  0x52   : > { %v644_v25 = vstv %s1805_s0  ;;  %s2312_s29 = sld [smem:[#allocation5 + $0x3]] }
  0x53   : > { %v640_v30 = vstv %s1804_s18  ;;  %s2314_s30 = sld [smem:[#allocation5 + $0x34]] }
  0x54   : > { %v668_v33 = vstv %s1806_s20  ;;  %s1818_s3 = sld [smem:[#allocation5 + $0xa]] }
  0x55   : > { %v672_v34 = vstv %s1807_s22  ;;  %s1819_s4 = sld [smem:[#allocation5 + $0x3b]] }
  0x56   : > { %s1820_s5 = sld [smem:[#allocation5 + $0x11]] }
  0x57   : > { %s1821_s6 = sld [smem:[#allocation5 + $0x42]] }
  0x58   : > { %s1822_s7 = sld [smem:[#allocation5 + $0x18]] }
  0x59   : > { %s1823_s8 = sld [smem:[#allocation5 + $0x49]] }
  0x5a   : > { %s2353_s11 = sld [smem:[#allocation5 + $0x4]] }
  0x5b   : > { %s2356_s0 = sld [smem:[#allocation5 + $0x35]] }
  0x5c   : > { %s1832_s18 = sld [smem:[#allocation5 + $0xb]] }
  0x5d   : > { %s1833_s20 = sld [smem:[#allocation5 + $0x3c]] }
  0x5e   : > { %s1834_s22 = sld [smem:[#allocation5 + $0x12]] }
  0x5f   : > { %s2714_s1 = sld [smem:[#allocation5 + $0x3d]] }
  0x60   : > { %s2720_s19 = sld [smem:[#allocation5 + $0x13]] }
  0x61   : > { %s2732_s14 = sld [smem:[#allocation5 + $0x20]] }
  0x62   : > { %s2734_s13 = sld [smem:[#allocation5 + $0x51]] }
  0x63   : > { %s2740_s17 = sld [smem:[#allocation5 + $0x1a]] }
  0x64   : > { %s2750_s26 = sld [smem:[#allocation5 + $0x59]] }
  0xb6   : > { %v230_v37 = vpop.permute.xlu1 %229 }
  0xb7   : > { %235 = vst.msk [vmem:[#allocation3 + $0x8] sm:$0xff] %vm224_vm4, %v230_v37 }
  0xb8   : > { %v219_v38 = vpop.permute.xlu0 %218 }
  0xb9   : > { %225 = vst.msk [vmem:[#allocation2 + $0x8] sm:$0xff] %vm224_vm4, %v219_v38 }
  0xba   : > { %v232_v39 = vpop.permute.xlu1 %231 }
  0xbb   : > { %236 = vst.msk [vmem:[#allocation3 + $0x10] sm:$0xff] %vm224_vm4, %v232_v39 }
  0xbc   : > { %v221_v40 = vpop.permute.xlu0 %220 }
  0xbd   : > { %226 = vst.msk [vmem:[#allocation2 + $0x10] sm:$0xff] %vm224_vm4, %v221_v40 }
  0xbe   : > { %v2246_v42 = vld [vmem:[#allocation3 + $0x5] sm:$0xff] }
  0xbf   : > { %v425_v44 = vmul.f32 %v424_v41, %v2246_v42  ;;  %v446_v51 = vmul.f32 %v445_v46, %v2246_v42  ;;  %v474_v2 = vmul.f32 %v473_v59, %v2246_v42  ;;  %v502_v11 = vmul.f32 %v501_v4, %v2246_v42 }
  0xc0   : > { %v2250_v47 = vld [vmem:[#allocation2 + $0x5] sm:$0xff]  ;;  %v624_v24 = vmul.f32 %v623_v17, %v2246_v42  ;;  %v645_v32 = vmul.f32 %v644_v25, %v2246_v42 }
  0xc1   : > { %v422_v48 = vmul.f32 %v421_v43, %v2250_v47  ;;  %v442_v50 = vmul.f32 %v441_v45, %v2250_v47  ;;  %v470_v8 = vmul.f32 %v469_v0, %v2250_v47  ;;  %v498_v10 = vmul.f32 %v497_v3, %v2250_v47 }
  0xc2   : > { %v2253_v49 = vld [vmem:[#allocation3 + $0xd] sm:$0xff]  ;;  %v2257_v53 = vld [vmem:[#allocation3 + $0x15] sm:$0x3f]  ;;  %v621_v29 = vmul.f32 %v620_v22, %v2250_v47  ;;  %v641_v38 = vmul.f32 %v640_v30, %v2250_v47  ;;  %v669_v40 = vmul.f32 %v668_v33, %v2250_v47 }
  0xc3   : > { %v427_v52 = vadd.f32 %v425_v44, %v422_v48  ;;  %v426_v57 = vmul.f32 %v424_v41, %v2253_v49  ;;  %v449_v58 = vadd.f32 %v446_v51, %v442_v50  ;;  %v448_v62 = vmul.f32 %v445_v46, %v2257_v53 }
  0xc4   : > { %v2259_v54 = vld [vmem:[#allocation2 + $0xd] sm:$0xff]  ;;  %v2261_v55 = vld [vmem:[#allocation2 + $0x15] sm:$0x3f]  ;;  %v447_v1 = vmul.f32 %v445_v46, %v2253_v49  ;;  %v475_v9 = vmul.f32 %v473_v59, %v2253_v49  ;;  %v477_v13 = vadd.f32 %v474_v2, %v470_v8  ;;  %v476_v15 = vmul.f32 %v473_v59, %v2257_v53 }
  0xc5   : > { %431 = vrot.lane.b32.xlu0 %v427_v52, %s2096_s9  ;;  %v423_v56 = vmul.f32 %v421_v43, %v2259_v54  ;;  %v444_v61 = vmul.f32 %v441_v45, %v2261_v55  ;;  %v443_v63 = vmul.f32 %v441_v45, %v2259_v54  ;;  %v471_v7 = vmul.f32 %v469_v0, %v2259_v54 }
  0xc6   : > { %v472_v14 = vmul.f32 %v469_v0, %v2261_v55  ;;  %v505_v16 = vadd.f32 %v502_v11, %v498_v10  ;;  %v500_v19 = vmul.f32 %v497_v3, %v2261_v55  ;;  %v504_v20 = vmul.f32 %v501_v4, %v2257_v53 }
  0xc7   : > { %v428_v60 = vadd.f32 %v426_v57, %v423_v56  ;;  %v451_v5 = vadd.f32 %v448_v62, %v444_v61  ;;  %v450_v6 = vadd.f32 %v447_v1, %v443_v63  ;;  %v478_v12 = vadd.f32 %v475_v9, %v471_v7 }
  0xc8   : > { %v479_v18 = vadd.f32 %v476_v15, %v472_v14  ;;  %v499_v21 = vmul.f32 %v497_v3, %v2259_v54  ;;  %v503_v23 = vmul.f32 %v501_v4, %v2253_v49  ;;  %v507_v26 = vadd.f32 %v504_v20, %v500_v19 }
  0xc9   : > { %455 = vrot.lane.b32.xlu0 %v449_v58, %s2096_s9  ;;  %433 = vrot.lane.b32.xlu1 %v428_v60, %s2096_s9  ;;  %v622_v28 = vmul.f32 %v620_v22, %v2259_v54  ;;  %v625_v31 = vmul.f32 %v623_v17, %v2253_v49  ;;  %v626_v36 = vadd.f32 %v624_v24, %v621_v29  ;;  %v696_v50 = vstv %s1808_s27  ;;  %s1835_s27 = sld [smem:[#allocation5 + $0x43]] }
  0xca   : > { %v506_v27 = vadd.f32 %v503_v23, %v499_v21  ;;  %v642_v37 = vmul.f32 %v640_v30, %v2259_v54  ;;  %v646_v39 = vmul.f32 %v644_v25, %v2253_v49  ;;  %v673_v41 = vmul.f32 %v672_v34, %v2246_v42 }
  0xcb   : > { %v627_v35 = vadd.f32 %v625_v31, %v622_v28  ;;  %v648_v44 = vadd.f32 %v645_v32, %v641_v38  ;;  %v643_v45 = vmul.f32 %v640_v30, %v2261_v55  ;;  %v647_v46 = vmul.f32 %v644_v25, %v2257_v53 }
  0xcc   : > { %v649_v43 = vadd.f32 %v646_v39, %v642_v37  ;;  %v676_v48 = vadd.f32 %v673_v41, %v669_v40  ;;  %v700_v51 = vstv %s1809_s28  ;;  %v671_v56 = vmul.f32 %v668_v33, %v2261_v55  ;;  %s2371_s28 = sld [smem:[#allocation5 + $0x2b]] }
  0xcd   : > { %459 = vrot.lane.b32.xlu0 %v451_v5, %s2096_s9  ;;  %457 = vrot.lane.b32.xlu1 %v450_v6, %s2096_s9  ;;  %v650_v52 = vadd.f32 %v647_v46, %v643_v45  ;;  %v675_v57 = vmul.f32 %v672_v34, %v2257_v53  ;;  %v670_v58 = vmul.f32 %v668_v33, %v2259_v54  ;;  %v819_v1 = vstv %s2312_s29  ;;  %s2376_s29 = sld [smem:[#allocation5 + $0x5c]] }
  0xce   : > { %v674_v59 = vmul.f32 %v672_v34, %v2253_v49  ;;  %v697_v60 = vmul.f32 %v696_v50, %v2250_v47  ;;  %v701_v61 = vmul.f32 %v700_v51, %v2246_v42  ;;  %v698_v0 = vmul.f32 %v696_v50, %v2259_v54 }
  0xcf   : > { %v678_v62 = vadd.f32 %v675_v57, %v671_v56  ;;  %v822_v2 = vstv %s2314_s30  ;;  %v702_v3 = vmul.f32 %v700_v51, %v2253_v49  ;;  %v820_v5 = vmul.f32 %v819_v1, %v2250_v47  ;;  %s2379_s30 = sld [smem:[#allocation5 + $0x24]] }
  0xd0   : > { %v677_v63 = vadd.f32 %v674_v59, %v670_v58  ;;  %v704_v4 = vadd.f32 %v701_v61, %v697_v60  ;;  %v839_v6 = vstv %s1818_s3  ;;  %v843_v7 = vstv %s1819_s4  ;;  %s2383_s3 = sld [smem:[#allocation5 + $0x55]] }
  0xd1   : > { %485 = vrot.lane.b32.xlu0 %v478_v12, %s2096_s9  ;;  %483 = vrot.lane.b32.xlu1 %v477_v13, %s2096_s9  ;;  %v705_v8 = vadd.f32 %v702_v3, %v698_v0  ;;  %v823_v9 = vmul.f32 %v822_v2, %v2246_v42  ;;  %v699_v10 = vmul.f32 %v696_v50, %v2261_v55  ;;  %v867_v23 = vstv %s1820_s5  ;;  %s2386_s4 = sld [smem:[#allocation5 + $0x25]] }
  0xd2   : > { %v703_v11 = vmul.f32 %v700_v51, %v2257_v53  ;;  %v840_v12 = vmul.f32 %v839_v6, %v2250_v47  ;;  %v844_v13 = vmul.f32 %v843_v7, %v2246_v42  ;;  %v824_v17 = vmul.f32 %v822_v2, %v2253_v49  ;;  %s2390_s5 = sld [smem:[#allocation5 + $0x56]] }
  0xd3   : > { %v825_v14 = vadd.f32 %v823_v9, %v820_v5  ;;  %v842_v20 = vmul.f32 %v839_v6, %v2261_v55  ;;  %v846_v21 = vmul.f32 %v843_v7, %v2257_v53  ;;  %v841_v22 = vmul.f32 %v839_v6, %v2259_v54 }
  0xd4   : > { %v706_v15 = vadd.f32 %v703_v11, %v699_v10  ;;  %v871_v24 = vstv %s1821_s6  ;;  %v845_v25 = vmul.f32 %v843_v7, %v2253_v49  ;;  %v868_v30 = vmul.f32 %v867_v23, %v2250_v47  ;;  %s2392_s6 = sld [smem:[#allocation5 + $0x2c]] }
  0xd5   : > { %511 = vrot.lane.b32.xlu0 %v505_v16, %s2096_s9  ;;  %487 = vrot.lane.b32.xlu1 %v479_v18, %s2096_s9  ;;  %v821_v16 = vmul.f32 %v819_v1, %v2259_v54  ;;  %v847_v18 = vadd.f32 %v844_v13, %v840_v12  ;;  %v849_v28 = vadd.f32 %v846_v21, %v842_v20  ;;  %v899_v33 = vstv %s1823_s8  ;;  %s2399_s8 = sld [smem:[#allocation5 + $0x2d]] }
  0xd6   : > { %v848_v29 = vadd.f32 %v845_v25, %v841_v22  ;;  %v872_v31 = vmul.f32 %v871_v24, %v2246_v42  ;;  %v873_v32 = vmul.f32 %v871_v24, %v2253_v49  ;;  %v900_v37 = vmul.f32 %v899_v33, %v2246_v42 }
  0xd7   : > { %v826_v19 = vadd.f32 %v824_v17, %v821_v16  ;;  %v870_v38 = vmul.f32 %v867_v23, %v2261_v55  ;;  %v874_v39 = vmul.f32 %v871_v24, %v2257_v53  ;;  %v1018_v46 = vstv %s2353_s11  ;;  %s3469_s11 = smov 124  }
  0xd8   : > { %v901_v50 = vmul.f32 %v899_v33, %v2253_v49  ;;  %v1020_v51 = vmul.f32 %v1018_v46, %v2259_v54  ;;  %v1019_v57 = vmul.f32 %v1018_v46, %v2250_v47  ;;  %v1038_v60 = vstv %s1832_s18  ;;  %s2410_s18 = sld [smem:[#allocation5 + $0x26]] }
  0xd9   : > { %515 = vrot.lane.b32.xlu0 %v507_v26, %s2096_s9  ;;  %513 = vrot.lane.b32.xlu1 %v506_v27, %s2096_s9  ;;  %v869_v26 = vmul.f32 %v867_v23, %v2259_v54  ;;  %v895_v27 = vstv %s1822_s7  ;;  %v1042_v61 = vstv %s1833_s20  ;;  %v1040_v2 = vmul.f32 %v1038_v60, %v2259_v54  ;;  %s2397_s7 = sld [smem:[#allocation5 + $0x5d]] }
  0xda   : > { %v898_v40 = vmul.f32 %v895_v27, %v2261_v55  ;;  %v897_v45 = vmul.f32 %v895_v27, %v2259_v54  ;;  %v1070_v0 = vstv %s1835_s27  ;;  %v1039_v3 = vmul.f32 %v1038_v60, %v2250_v47  ;;  %s2412_s20 = sld [smem:[#allocation5 + $0x57]] }
  0xdb   : > { %v876_v34 = vadd.f32 %v873_v32, %v869_v26  ;;  %v1044_v5 = vmul.f32 %v1042_v61, %v2253_v49  ;;  %v1071_v7 = vmul.f32 %v1070_v0, %v2246_v42  ;;  %v1045_v9 = vmul.f32 %v1042_v61, %v2257_v53  ;;  %s2431_s27 = sld [smem:[#allocation5 + $0x4e]] }
  0xdc   : > { %v904_v56 = vadd.f32 %v901_v50, %v897_v45  ;;  %v2415_v12 = vstv %s2371_s28  ;;  %v2418_v13 = vstv %s2376_s29  ;;  %v2429_v16 = vstv %s2383_s3  ;;  %s2449_s28 = sld [smem:[#allocation5 + $0x27]] }
  0xdd   : > { %632 = vrot.lane.b32.xlu0 %v627_v35, %s2097_s23  ;;  %630 = vrot.lane.b32.xlu1 %v626_v36, %s2097_s23  ;;  %v896_v35 = vmul.f32 %v895_v27, %v2250_v47  ;;  %v875_v36 = vadd.f32 %v872_v31, %v868_v30  ;;  %v1047_v10 = vadd.f32 %v1044_v5, %v1040_v2  ;;  %v2444_v25 = vstv %s2386_s4  ;;  %s2460_s29 = sld [smem:[#allocation5 + $0x58]] }
  0xde   : > { %v590_v21 = vmul.f32 %v2415_v12, %v2261_v55  ;;  %v594_v22 = vmul.f32 %v2418_v13, %v2257_v53  ;;  %v561_v24 = vmul.f32 %v2429_v16, %v2257_v53  ;;  %v2447_v26 = vstv %s2390_s5  ;;  %s1811_s3 = sld [smem:[#allocation5 + $0x4f]] }
  0xdf   : > { %v903_v41 = vadd.f32 %v900_v37, %v896_v35  ;;  %v1072_v27 = vmul.f32 %v1070_v0, %v2253_v49  ;;  %v756_v30 = vmul.f32 %v2444_v25, %v2261_v55  ;;  %v760_v31 = vmul.f32 %v2447_v26, %v2257_v53  ;;  %s1824_s4 = sld [smem:[#allocation5 + $0x1f]] }
  0xe0   : > { %s1825_s5 = sld [smem:[#allocation5 + $0x50]] }
  0xe1   : > { %656 = vrot.lane.b32.xlu0 %v649_v43, %s2097_s23  ;;  %654 = vrot.lane.b32.xlu1 %v648_v44, %s2097_s23  ;;  %v877_v43 = vadd.f32 %v874_v39, %v870_v38  ;;  %v902_v44 = vmul.f32 %v899_v33, %v2257_v53  ;;  %v2475_v38 = vstv %s2399_s8  ;;  %v2490_v45 = vadd.f32 %v760_v31, %v756_v30  ;;  %s2624_s8 = sld [smem:[#allocation5 + $0x2e]] }
  0xe2   : > { %v593_v31 = vmul.f32 %v2418_v13, %v2253_v49 }
  0xe5   : > { %682 = vrot.lane.b32.xlu0 %v676_v48, %s2097_s23  ;;  %658 = vrot.lane.b32.xlu1 %v650_v52, %s2097_s23  ;;  %v1021_v48 = vstv %s2356_s0  ;;  %v905_v52 = vadd.f32 %v902_v44, %v898_v40  ;;  %s2404_s0 = sld [smem:[#allocation5 + $0x5e]]  ;;  %v2481_v40 = vstv %s2410_s18 }
  0xe6   : > { %v1022_v58 = vmul.f32 %v1021_v48, %v2246_v42  ;;  %v1023_v59 = vmul.f32 %v1021_v48, %v2253_v49  ;;  %v529_v44 = vstv %s2431_s27  ;;  %v988_v48 = vmul.f32 %v2475_v38, %v2261_v55  ;;  %s2638_s18 = sld [smem:[#allocation5 + $0x4d]] }
  0xe7   : > { %v531_v2 = vmul.f32 %v529_v44, %v2253_v49  ;;  %s2658_s27 = sld [smem:[#allocation5 + $0x23]] }
  0xe8   : > { %v1024_v1 = vadd.f32 %v1022_v58, %v1019_v57 }
  0xe9   : > { %686 = vrot.lane.b32.xlu0 %v678_v62, %s2097_s23  ;;  %684 = vrot.lane.b32.xlu1 %v677_v63, %s2097_s23  ;;  %v1025_v62 = vadd.f32 %v1023_v59, %v1020_v51  ;;  %v1066_v63 = vstv %s1834_s22  ;;  %s2420_s22 = sld [smem:[#allocation5 + $0x1d]] }
  0xea   : > { %v1067_v6 = vmul.f32 %v1066_v63, %v2250_v47  ;;  %v1068_v20 = vmul.f32 %v1066_v63, %v2259_v54 }
  0xeb   : > { %v2478_v39 = vstv %s2404_s0  ;;  %s2636_s0 = sld [smem:[#allocation5 + $0x5f]] }
  0xec   : > { %v1074_v17 = vadd.f32 %v1071_v7, %v1067_v6  ;;  %v1075_v35 = vadd.f32 %v1072_v27, %v1068_v20  ;;  %v992_v50 = vmul.f32 %v2478_v39, %v2257_v53  ;;  %v588_v20 = vmul.f32 %v2415_v12, %v2250_v47 }
  0xed   : > { %712 = vrot.lane.b32.xlu0 %v705_v8, %s2097_s23  ;;  %710 = vrot.lane.b32.xlu1 %v704_v4, %s2097_s23  ;;  %v1043_v4 = vmul.f32 %v1042_v61, %v2246_v42  ;;  %v1041_v8 = vmul.f32 %v1038_v60, %v2261_v55  ;;  %v532_v60 = vmul.f32 %v529_v44, %v2257_v53  ;;  %v2512_v61 = vstv %s2449_s28  ;;  %s2662_s28 = sld [smem:[#allocation5 + $0x54]] }
  0xef   : > { %v1046_v11 = vadd.f32 %v1043_v4, %v1039_v3  ;;  %v1154_v4 = vmul.f32 %v2512_v61, %v2261_v55 }
  0xf1   : > { %829 = vrot.lane.b32.xlu0 %v825_v14, %s3472_s10  ;;  %714 = vrot.lane.b32.xlu1 %v706_v15, %s2097_s23  ;;  %v1069_v14 = vmul.f32 %v1066_v63, %v2261_v55  ;;  %v2426_v15 = vstv %s2379_s30  ;;  %s1810_s30 = sld [smem:[#allocation5 + $0x1e]]  ;;  %v770_v63 = vrot.slane %v2490_v45, 4  ;;  %v991_v45 = vmul.f32 %v2478_v39, %v2253_v49 }
  0xf2   : > { %v557_v23 = vmul.f32 %v2426_v15, %v2261_v55  ;;  %v556_v6 = vmul.f32 %v2426_v15, %v2259_v54 }
  0xf4   : > { %v2472_v37 = vadd.f32 %v561_v24, %v557_v23  ;;  %v589_v23 = vmul.f32 %v2415_v12, %v2259_v54  ;;  %v592_v24 = vmul.f32 %v2418_v13, %v2246_v42  ;;  %v555_v12 = vmul.f32 %v2426_v15, %v2250_v47 }
  0xf5   : > { %853 = vrot.lane.b32.xlu0 %v847_v18, %s3472_s10  ;;  %831 = vrot.lane.b32.xlu1 %v826_v19, %s3472_s10  ;;  %v1048_v18 = vadd.f32 %v1045_v9, %v1041_v8  ;;  %v1073_v19 = vmul.f32 %v1070_v0, %v2257_v53  ;;  %v560_v9 = vmul.f32 %v2429_v16, %v2253_v49 }
  0xf7   : > { %v724_v30 = vstv %s1810_s30  ;;  %s2672_s30 = sld [smem:[#allocation5 + $0x3f]] }
  0xf8   : > { %v725_v15 = vmul.f32 %v724_v30, %v2250_v47 }
  0xf9   : > { %857 = vrot.lane.b32.xlu0 %v849_v28, %s3472_s10  ;;  %855 = vrot.lane.b32.xlu1 %v848_v29, %s3472_s10  ;;  %v2455_v28 = vstv %s2392_s6  ;;  %v2458_v29 = vstv %s2397_s7  ;;  %s2608_s6 = sld [smem:[#allocation5]] }
  0xfa   : > { %v789_v32 = vmul.f32 %v2455_v28, %v2261_v55  ;;  %v793_v33 = vmul.f32 %v2458_v29, %v2257_v53  ;;  %s2612_s7 = sld [smem:[#allocation5 + $0x31]] }
  0xfc   : > { %v2492_v46 = vadd.f32 %v793_v33, %v789_v32  ;;  %v559_v32 = vmul.f32 %v2429_v16, %v2246_v42  ;;  %v728_v33 = vstv %s1811_s3  ;;  %s2681_s3 = sld [smem:[#allocation5 + $0x2a]] }
  0xfd   : > { %883 = vrot.lane.b32.xlu0 %v876_v34, %s3472_s10  ;;  %881 = vrot.lane.b32.xlu1 %v875_v36, %s3472_s10  ;;  %v1076_v34 = vadd.f32 %v1073_v19, %v1069_v14  ;;  %v2470_v36 = vadd.f32 %v594_v22, %v590_v21  ;;  %v563_v19 = vadd.f32 %v560_v9, %v556_v6 }
  0xfe   : > { %v803_v0 = vrot.slane %v2492_v46, 4  ;;  %v729_v16 = vmul.f32 %v728_v33, %v2246_v42  ;;  %v758_v9 = vmul.f32 %v2447_v26, %v2246_v42  ;;  %v990_v46 = vmul.f32 %v2478_v39, %v2246_v42 }
  0xff   : > { %v604_v51 = vrot.slane %v2470_v36, 4  ;;  %v787_v36 = vmul.f32 %v2455_v28, %v2250_v47 }
 0x101   : > { %909 = vrot.lane.b32.xlu0 %v903_v41, %s3472_s10  ;;  %885 = vrot.lane.b32.xlu1 %v877_v43, %s3472_s10  ;;  %v2484_v41 = vstv %s2412_s20  ;;  %v525_v43 = vstv %s2420_s22  ;;  %s2646_s20 = sld [smem:[#allocation5 + $0x7]] }
 0x102   : > { %v959_v57 = vmul.f32 %v2484_v41, %v2257_v53  ;;  %v527_v58 = vmul.f32 %v525_v43, %v2259_v54  ;;  %v528_v59 = vmul.f32 %v525_v43, %v2261_v55  ;;  %s2654_s22 = sld [smem:[#allocation5 + $0x38]] }
 0x104   : > { %v534_v7 = vadd.f32 %v531_v2, %v527_v58  ;;  %v535_v8 = vadd.f32 %v532_v60, %v528_v59  ;;  %v755_v2 = vmul.f32 %v2444_v25, %v2259_v54 }
 0x105   : > { %913 = vrot.lane.b32.xlu0 %v905_v52, %s3472_s10  ;;  %911 = vrot.lane.b32.xlu1 %v904_v56, %s3472_s10  ;;  %v571_v52 = vrot.slane %v2472_v37, 4  ;;  %v955_v56 = vmul.f32 %v2481_v40, %v2261_v55  ;;  %v726_v37 = vmul.f32 %v724_v30, %v2259_v54 }
 0x106   : > { %v540_v21 = vrot.slane %v534_v7, 4  ;;  %v542_v22 = vrot.slane %v535_v8, 4  ;;  %v732_v7 = vadd.f32 %v729_v16, %v725_v15 }
 0x107   : > { %v2522_v3 = vadd.f32 %v959_v57, %v955_v56  ;;  %v562_v56 = vadd.f32 %v559_v32, %v555_v12 }
 0x109   : > { %1030 = vrot.lane.b32.xlu0 %v1025_v62, %s3469_s11  ;;  %1028 = vrot.lane.b32.xlu1 %v1024_v1, %s3469_s11  ;;  %v2515_v62 = vstv %s2460_s29  ;;  %v2519_v1 = vadd.f32 %v992_v50, %v988_v48  ;;  %v596_v48 = vadd.f32 %v593_v31, %v589_v23  ;;  %v730_v50 = vmul.f32 %v728_v33, %v2253_v49  ;;  %s2670_s29 = sld [smem:[#allocation5 + $0xe]] }
 0x10a   : > { %v1158_v5 = vmul.f32 %v2515_v62, %v2257_v53  ;;  %v568_v8 = vrot.slane %v562_v56, 4 }
 0x10b   : > { %v1002_v14 = vrot.slane %v2519_v1, 4  ;;  %v733_v59 = vadd.f32 %v730_v50, %v726_v37  ;;  %v602_v60 = vrot.slane %v596_v48, 4 }
 0x10d   : > { %1054 = vrot.lane.b32.xlu0 %v1047_v10, %s3469_s11  ;;  %1052 = vrot.lane.b32.xlu1 %v1046_v11, %s3469_s11  ;;  %v526_v10 = vmul.f32 %v525_v43, %v2250_v47  ;;  %v530_v11 = vmul.f32 %v529_v44, %v2246_v42  ;;  %v543_v43 = vsel %vm355_vm5, %v540_v21, %v542_v22 }
 0x10e   : > { %v595_v44 = vadd.f32 %v592_v24, %v588_v20  ;;  %v792_v24 = vmul.f32 %v2458_v29, %v2253_v49  ;;  %v605_v12 = vsel %vm355_vm5, %v602_v60, %v604_v51 }
 0x10f   : > { %v533_v27 = vadd.f32 %v530_v11, %v526_v10  ;;  %v759_v10 = vmul.f32 %v2447_v26, %v2253_v49  ;;  %v739_v11 = vrot.slane %v733_v59, 4  ;;  %v923_v26 = vstv %s1824_s4  ;;  %s2693_s4 = sld [smem:[#allocation5 + $0x15]] }
 0x110   : > { %v601_v6 = vrot.slane %v595_v44, 4  ;;  %v924_v59 = vmul.f32 %v923_v26, %v2250_v47 }
 0x111   : > { %1080 = vrot.lane.b32.xlu0 %v1074_v17, %s3469_s11  ;;  %1056 = vrot.lane.b32.xlu1 %v1048_v18, %s3469_s11  ;;  %v969_v17 = vrot.slane %v2522_v3, 4  ;;  %v2542_v18 = vadd.f32 %v1158_v5, %v1154_v4  ;;  %v539_v13 = vrot.slane %v533_v27, 4  ;;  %v727_v4 = vmul.f32 %v724_v30, %v2261_v55 }
 0x112   : > { %v731_v5 = vmul.f32 %v728_v33, %v2257_v53  ;;  %v603_v20 = vsel %vm355_vm5, %v601_v6, %v602_v60  ;;  %v762_v22 = vadd.f32 %v759_v10, %v755_v2  ;;  %v927_v30 = vstv %s1825_s5  ;;  %s2696_s5 = sld [smem:[#allocation5 + $0x46]] }
 0x113   : > { %v541_v58 = vsel %vm355_vm5, %v539_v13, %v540_v21  ;;  %v925_v33 = vmul.f32 %v923_v26, %v2259_v54  ;;  %v930_v44 = vmul.f32 %v927_v30, %v2257_v53  ;;  %v929_v48 = vmul.f32 %v927_v30, %v2253_v49 }
 0x114   : > { %v734_v23 = vadd.f32 %v731_v5, %v727_v4  ;;  %v928_v60 = vmul.f32 %v927_v30, %v2246_v42 }
 0x115   : > { %1084 = vrot.lane.b32.xlu0 %v1076_v34, %s3469_s11  ;;  %1082 = vrot.lane.b32.xlu1 %v1075_v35, %s3469_s11  ;;  %v1168_v34 = vrot.slane %v2542_v18, 4  ;;  %v569_v35 = vrot.slane %v563_v19, 4  ;;  %v788_v19 = vmul.f32 %v2455_v28, %v2259_v54  ;;  %v932_v16 = vadd.f32 %v929_v48, %v925_v33 }
 0x116   : > { %v741_v37 = vrot.slane %v734_v23, 4  ;;  %v931_v10 = vadd.f32 %v928_v60, %v924_v59 }
 0x117   : > { %v572_v57 = vsel %vm355_vm5, %v569_v35, %v571_v52  ;;  %v570_v21 = vsel %vm355_vm5, %v568_v8, %v569_v35  ;;  %v795_v32 = vadd.f32 %v792_v24, %v788_v19  ;;  %v768_v35 = vrot.slane %v762_v22, 4 }
 0x118   : > { %v742_v56 = vsel %vm355_vm5, %v739_v11, %v741_v37  ;;  %v938_v6 = vrot.slane %v932_v16, 4  ;;  %v1157_v24 = vmul.f32 %v2515_v62, %v2253_v49 }
 0x119   : > { %610 = vrot.lane.b32.xlu0 %v604_v51, %s2096_s9  ;;  %577 = vrot.lane.b32.xlu1 %v571_v52, %s2096_s9  ;;  %v754_v52 = vmul.f32 %v2444_v25, %v2250_v47  ;;  %v738_v25 = vrot.slane %v732_v7, 4  ;;  %v791_v51 = vmul.f32 %v2458_v29, %v2246_v42  ;;  %v801_v15 = vrot.slane %v795_v32, 4 }
 0x11a   : > { %v958_v29 = vmul.f32 %v2484_v41, %v2253_v49  ;;  %v771_v5 = vsel %vm355_vm5, %v768_v35, %v770_v63  ;;  %v987_v7 = vmul.f32 %v2475_v38, %v2259_v54 }
 0x11b   : > { %v761_v27 = vadd.f32 %v758_v9, %v754_v52  ;;  %v740_v31 = vsel %vm355_vm5, %v738_v25, %v739_v11  ;;  %v794_v28 = vadd.f32 %v791_v51, %v787_v36  ;;  %v804_v4 = vsel %vm355_vm5, %v801_v15, %v803_v0 }
 0x11c   : > { %v986_v9 = vmul.f32 %v2475_v38, %v2250_v47  ;;  %v937_v25 = vrot.slane %v931_v10, 4  ;;  %v1156_v36 = vmul.f32 %v2515_v62, %v2246_v42 }
 0x11d   : > { %776 = vrot.lane.b32.xlu0 %v770_v63, %s2097_s23  ;;  %809 = vrot.lane.b32.xlu1 %v803_v0, %s2097_s23  ;;  %v767_v13 = vrot.slane %v761_v27, 4  ;;  %v953_v63 = vmul.f32 %v2481_v40, %v2250_v47  ;;  %v957_v0 = vmul.f32 %v2484_v41, %v2246_v42  ;;  %v800_v38 = vrot.slane %v794_v28, 4 }
 0x11e   : > { %v993_v22 = vadd.f32 %v990_v46, %v986_v9  ;;  %v1184_v27 = vstv %s2624_s8  ;;  %v939_v33 = vsel %vm355_vm5, %v937_v25, %v938_v6  ;;  %s1836_s8 = sld [smem:[#allocation5 + $0x19]]  ;;  %v2782_v25 = vstv %s2654_s22 }
 0x11f   : > { %v769_v50 = vsel %vm355_vm5, %v767_v13, %v768_v35  ;;  %v960_v23 = vadd.f32 %v957_v0, %v953_v63  ;;  %v1186_v37 = vmul.f32 %v1184_v27, %v2259_v54  ;;  %v1185_v48 = vmul.f32 %v1184_v27, %v2250_v47  ;;  %s2823_s22 = sld [smem:[#allocation5 + $0xd]] }
 0x120   : > { %v1152_v13 = vmul.f32 %v2512_v61, %v2250_v47 }
 0x121   : > { %1008 = vrot.lane.b32.xlu0 %v1002_v14, %s3472_s10  ;;  %975 = vrot.lane.b32.xlu1 %v969_v17, %s3472_s10 }
 0x122   : > { %v1159_v62 = vadd.f32 %v1156_v36, %v1152_v13  ;;  %v2819_v13 = vstv %s2693_s4  ;;  %v1122_v36 = vstv %s2732_s14  ;;  %s2853_s14 = sld [smem:[#allocation5 + $0x45]]  ;;  %s1774_s4 = sshll.u32 %s2207_s21, 4 }
 0x124   : > { %v1094_v1 = vstv %s1836_s8  ;;  %s2748_s8 = sld [smem:[#allocation5 + $0x28]] }
 0x125   : > { %546 = vrot.lane.b32.xlu0 %v543_v43, %s2096_s9  ;;  %1174 = vrot.lane.b32.xlu1 %v1168_v34, %s3469_s11  ;;  %v926_v43 = vmul.f32 %v923_v26, %v2261_v55  ;;  %s1846_s11 = sld [smem:[#allocation5 + $0xc]]  ;;  %v1095_v10 = vmul.f32 %v1094_v1, %v2250_v47 }
 0x129   : > { %575 = vrot.lane.b32.xlu0 %v572_v57, %s2096_s9  ;;  %544 = vrot.lane.b32.xlu1 %v541_v58, %s2096_s9  ;;  %v933_v57 = vadd.f32 %v930_v44, %v926_v43  ;;  %v954_v58 = vmul.f32 %v2481_v40, %v2259_v54  ;;  %v802_v40 = vsel %vm355_vm5, %v800_v38, %v801_v15  ;;  %v999_v43 = vrot.slane %v993_v22, 4 }
 0x12a   : > { %v966_v44 = vrot.slane %v960_v23, 4  ;;  %v1096_v38 = vmul.f32 %v1094_v1, %v2259_v54  ;;  %v2771_v23 = vstv %s2638_s18  ;;  %s2799_s18 = sld [smem:[#allocation5 + $0x1b]] }
 0x12b   : > { %v940_v8 = vrot.slane %v933_v57, 4  ;;  %v961_v52 = vadd.f32 %v958_v29, %v954_v58  ;;  %v1187_v58 = vmul.f32 %v1184_v27, %v2261_v55 }
 0x12d   : > { %606 = vrot.lane.b32.xlu0 %v603_v20, %s2096_s9  ;;  %573 = vrot.lane.b32.xlu1 %v570_v21, %s2096_s9  ;;  %v994_v20 = vadd.f32 %v991_v45, %v987_v7  ;;  %v941_v39 = vsel %vm355_vm5, %v938_v6, %v940_v8  ;;  %v967_v41 = vrot.slane %v961_v52, 4  ;;  %v1153_v21 = vmul.f32 %v2512_v61, %v2259_v54 }
 0x12e   : > { %v1165_v8 = vrot.slane %v1159_v62, 4  ;;  %v1237_v45 = vstv %s1846_s11  ;;  %s2768_s11 = sld [smem:[#allocation5 + $0x60]]  ;;  %v2774_v54 = vstv %s2646_s20 }
 0x12f   : > { %v970_v32 = vsel %vm355_vm5, %v967_v41, %v969_v17  ;;  %v1160_v35 = vadd.f32 %v1157_v24, %v1153_v21  ;;  %v2785_v24 = vstv %s2658_s27  ;;  %v1238_v27 = vmul.f32 %v1237_v45, %v2250_v47  ;;  %s2813_s20 = sld [smem:[#allocation5 + $0x4c]] }
 0x130   : > { %s2830_s27 = sld [smem:[#allocation5 + $0x3e]] }
 0x131   : > { %743 = vrot.lane.b32.xlu0 %v740_v31, %s2097_s23  ;;  %608 = vrot.lane.b32.xlu1 %v605_v12, %s2096_s9  ;;  %s2618_s9 = sld [smem:[#allocation5 + $0x1c]]  ;;  %v1000_v31 = vrot.slane %v994_v20, 4  ;;  %v1188_v12 = vstv %s2636_s0 }
 0x132   : > { %v1189_v3 = vmul.f32 %v1188_v12, %v2246_v42  ;;  %v1190_v17 = vmul.f32 %v1188_v12, %v2253_v49  ;;  %v1191_v28 = vmul.f32 %v1188_v12, %v2257_v53  ;;  %s1837_s0 = sld [smem:[#allocation5 + $0x4a]] }
 0x133   : > { %v1001_v16 = vsel %vm355_vm5, %v999_v43, %v1000_v31  ;;  %v2802_v43 = vstv %s2662_s28  ;;  %s2100_s28 = smov 123  }
 0x134   : > { %v1193_v57 = vadd.f32 %v1190_v17, %v1186_v37  ;;  %v1192_v61 = vadd.f32 %v1189_v3, %v1185_v48  ;;  %v1194_v6 = vadd.f32 %v1191_v28, %v1187_v58  ;;  %v1097_v37 = vmul.f32 %v1094_v1, %v2261_v55  ;;  %v2836_v58 = vld [vmem:[#allocation2 + $0x15] sm:$0x3f]  ;;  %v2857_v1 = vld [vmem:[#allocation3 + $0xd] sm:$0xff] }
 0x135   : > { %772 = vrot.lane.b32.xlu0 %v769_v50, %s2097_s23  ;;  %745 = vrot.lane.b32.xlu1 %v742_v56, %s2097_s23  ;;  %v968_v50 = vsel %vm355_vm5, %v966_v44, %v967_v41  ;;  %v1166_v56 = vrot.slane %v1160_v35, 4  ;;  %v2805_v44 = vstv %s2670_s29  ;;  %v2808_v48 = vstv %s2672_s30  ;;  %s2896_s29 = sld [smem:[#allocation5 + $0x5a]] }
 0x136   : > { %v1198_v7 = vrot.slane %v1192_v61, 4  ;;  %v1201_v9 = vrot.slane %v1194_v6, 4  ;;  %v2811_v3 = vstv %s2681_s3  ;;  %v1240_v28 = vmul.f32 %v2836_v58, %v1237_v45  ;;  %v2839_v61 = vld [vmem:[#allocation3 + $0x15] sm:$0x3f]  ;;  %s2956_s30 = sld [smem:[#allocation5 + $0x61]] }
 0x137   : > { %v2626_v2 = vpop.permute.xlu0 %431  ;;  %v1169_v60 = vsel %vm355_vm5, %v1166_v56, %v1168_v34  ;;  %v1167_v52 = vsel %vm355_vm5, %v1165_v8, %v1166_v56  ;;  %v2765_v21 = vstv %s2618_s9  ;;  %s2791_s9 = sld [smem:[#allocation5 + $0x36]]  ;;  %v2851_v8 = vstv %s2740_s17 }
 0x138   : > { %3496 = vst [vmem:[#allocation20_spill] sm:$0xff] %v2626_v2  ;;  %v1098_v46 = vstv %s1837_s0  ;;  %s2760_s0 = sld [smem:[#allocation5 + $0x2f]] }
 0x139   : > { %807 = vrot.lane.b32.xlu0 %v804_v4, %s2097_s23  ;;  %774 = vrot.lane.b32.xlu1 %v771_v5, %s2097_s23  ;;  %v1003_v4 = vsel %vm355_vm5, %v1000_v31, %v1002_v14  ;;  %v1199_v5 = vrot.slane %v1193_v57, 4  ;;  %v1099_v20 = vmul.f32 %v1098_v46, %v2246_v42  ;;  %v1100_v42 = vmul.f32 %v1098_v46, %v2253_v49  ;;  %v2788_v31 = vld [vmem:[#allocation3 + $0x5] sm:$0xff]  ;;  %s2874_s17 = sld [smem:[#allocation5 + $0x52]] }
 0x13a   : > { %v1101_v47 = vmul.f32 %v1098_v46, %v2257_v53  ;;  %v2826_v53 = vstv %s2696_s5  ;;  %s2993_s3 = sld [smem:[#allocation5 + $0x6]]  ;;  %s1880_s5 = sshll.u32 %s2080_s15, 8 }
 0x13b   : > { %v2656_v11 = vpop.permute.xlu1 %433  ;;  %v2660_v19 = vpop.permute.xlu0 %455  ;;  %v1200_v14 = vsel %vm355_vm5, %v1198_v7, %v1199_v5  ;;  %v1202_v22 = vsel %vm355_vm5, %v1199_v5, %v1201_v9  ;;  %v1102_v35 = vadd.f32 %v1099_v20, %v1095_v10  ;;  %v1265_v5 = vstv %s2720_s19  ;;  %s2866_s19 = sld [smem:[#allocation5 + $0x21]] }
 0x13c   : > { %3497 = vst [vmem:[#allocation21_spill] sm:$0xff] %v2656_v11  ;;  %3498 = vst [vmem:[#allocation22_spill] sm:$0xff] %v2660_v19  ;;  %v1104_v57 = vadd.f32 %v1101_v47, %v1097_v37  ;;  %v1125_v37 = vmul.f32 %v2836_v58, %v1122_v36  ;;  %v1268_v41 = vmul.f32 %v2836_v58, %v1265_v5 }
 0x13d   : > { %944 = vrot.lane.b32.xlu0 %v941_v39, %s3472_s10  ;;  %805 = vrot.lane.b32.xlu1 %v802_v40, %s2097_s23  ;;  %s2688_s23 = sld [smem:[#allocation5 + $0x5b]]  ;;  %v1241_v39 = vstv %s2714_s1 }
 0x13e   : > { %s2779_s1 = sld [smem:[#allocation5 + $0x5]]  ;;  %v1242_v12 = vmul.f32 %v2788_v31, %v1241_v39  ;;  %v1244_v62 = vmul.f32 %v2839_v61, %v1241_v39 }
 0x13f   : > { %v2677_v26 = vpop.permute.xlu1 %457  ;;  %v2679_v30 = vpop.permute.xlu0 %459 }
 0x140   : > { %3499 = vst [vmem:[#allocation23_spill] sm:$0xff] %v2677_v26  ;;  %v1245_v55 = vadd.f32 %v1242_v12, %v1238_v27  ;;  %v1296_v26 = vmul.f32 %v2836_v58, %v2851_v8 }
 0x141   : > { %973 = vrot.lane.b32.xlu0 %v970_v32, %s3472_s10  ;;  %942 = vrot.lane.b32.xlu1 %v939_v33, %s3472_s10  ;;  %v1103_v33 = vadd.f32 %v1100_v42, %v1096_v38  ;;  %v1247_v42 = vadd.f32 %v1244_v62, %v1240_v28  ;;  %v2891_v28 = vstv %s2760_s0  ;;  %v2894_v62 = vstv %s2768_s11 }
 0x143   : > { %v2704_v51 = vpop.permute.xlu1 %483  ;;  %v2706_v15 = vpop.permute.xlu0 %485  ;;  %v2816_v17 = vstv %s2688_s23  ;;  %s3264_s23 = sld [smem:[#allocation5 + $0x53]] }
 0x144   : > { %3500 = vst [vmem:[#allocation24_spill] sm:$0xff] %v2704_v51  ;;  %3501 = vst [vmem:[#allocation25_spill] sm:$0xff] %v2706_v15 }
 0x145   : > { %1004 = vrot.lane.b32.xlu0 %v1001_v16, %s3472_s10  ;;  %971 = vrot.lane.b32.xlu1 %v968_v50, %s3472_s10  ;;  %s2728_s10 = sld [smem:[#allocation5 + $0x44]]  ;;  %v1126_v16 = vstv %s2734_s13 }
 0x146   : > { %s2845_s13 = sld [smem:[#allocation5 + $0x14]]  ;;  %v1127_v10 = vmul.f32 %v2788_v31, %v1126_v16  ;;  %v1128_v20 = vmul.f32 %v2857_v1, %v1126_v16  ;;  %v1129_v47 = vmul.f32 %v2839_v61, %v1126_v16  ;;  %v2910_v16 = vstv %s2813_s20 }
 0x147   : > { %v2716_v29 = vpop.permute.xlu1 %487  ;;  %v2718_v59 = vpop.permute.xlu0 %511 }
 0x149   : > { %1172 = vrot.lane.b32.xlu0 %v1169_v60, %s3502_s16  ;;  %1006 = vrot.lane.b32.xlu1 %v1003_v4, %s3503_s25  ;;  %s2744_s25 = sld [smem:[#allocation5 + $0x4b]]  ;;  %v2842_v60 = vld [vmem:[#allocation2 + $0xd] sm:$0xff] }
 0x14a   : > { %v1239_v4 = vmul.f32 %v2842_v60, %v1237_v45  ;;  %v1124_v7 = vmul.f32 %v2842_v60, %v1122_v36  ;;  %v1267_v46 = vmul.f32 %v2842_v60, %v1265_v5  ;;  %v2869_v45 = vld [vmem:[#allocation2 + $0x5] sm:$0xff] }
 0x14b   : > { %v2736_v18 = vpop.permute.xlu1 %513  ;;  %v2738_v34 = vpop.permute.xlu0 %515  ;;  %v1269_v6 = vstv %s2728_s10  ;;  %v1123_v38 = vmul.f32 %v2869_v45, %v1122_v36  ;;  %v1266_v12 = vmul.f32 %v2869_v45, %v1265_v5  ;;  %s2885_s10 = sld [smem:[#allocation5 + $0x29]]  ;;  %v2926_v5 = vstv %s2853_s14 }
 0x14c   : > { %v1272_v40 = vmul.f32 %v2839_v61, %v1269_v6 }
 0x14d   : > { %1203 = vrot.lane.b32.xlu0 %v1200_v14, %s3502_s16  ;;  %1170 = vrot.lane.b32.xlu1 %v1167_v52, %s3502_s16  ;;  %v1243_v14 = vmul.f32 %v2857_v1, %v1241_v39  ;;  %v1130_v36 = vadd.f32 %v1127_v10, %v1123_v38  ;;  %v1132_v10 = vadd.f32 %v1129_v47, %v1125_v37 }
 0x14e   : > { %v1275_v37 = vadd.f32 %v1272_v40, %v1268_v41  ;;  %v1294_v47 = vmul.f32 %v2869_v45, %v2851_v8  ;;  %v2954_v41 = vstv %s2896_s29 }
 0x14f   : > { %v2752_v63 = vpop.permute.xlu1 %630  ;;  %v2754_v0 = vpop.permute.xlu0 %632  ;;  %v2861_v52 = vstv %s2744_s25  ;;  %v1246_v27 = vadd.f32 %v1243_v14, %v1239_v4  ;;  %v2913_v4 = vstv %s2823_s22  ;;  %s156_s25 = scalar_lea.vmem [#allocation9], %s1774_s4 }
 0x150   : > { %3504 = vst [vmem:[#allocation26_spill] sm:$0xff] %v2752_v63  ;;  %3505 = vst [vmem:[#allocation27_spill] sm:$0xff] %v2754_v0  ;;  %v1295_v63 = vmul.f32 %v2842_v60, %v2851_v8  ;;  %v1299_v8 = vmul.f32 %v2857_v1, %v2861_v52 }
 0x151   : > { %1207 = vrot.lane.b32.xlu0 %v1201_v9, %s3502_s16  ;;  %1205 = vrot.lane.b32.xlu1 %v1202_v22, %s3502_s16  ;;  %v2864_v9 = vstv %s2748_s8  ;;  %v2951_v40 = vstv %s2885_s10  ;;  %s1681_s8 = sshll.u32 %s156_s25, 4  ;;  %s3417_s8 = int_to_ptr.vmem [resolvable:$true] %s1681_s8 }
 0x152   : > { %s2006_s15 = scalar_lea.vmem %s3417_s8, 256 }
 0x153   : > { %v2793_v49 = vpop.permute.xlu1 %654  ;;  %v2795_v32 = vpop.permute.xlu0 %656  ;;  %p2007_p8 = scmp.ne.s32.totalorder %s3417_s8, %s2006_s15 }
 0x154   : > { %3506 = vst [vmem:[#allocation28_spill] sm:$0xff] %v2793_v49  ;;  %3507 = vst [vmem:[#allocation29_spill] sm:$0xff] %v2795_v32  ;;  %v1353_v32 = vmul.f32 %v2836_v58, %v2864_v9 }
 0x155   : > { %1110 = vrot.lane.b32.xlu0 %v1103_v33, %s3502_s16  ;;  %1108 = vrot.lane.b32.xlu1 %v1102_v35, %s3502_s16  ;;  %v1270_v33 = vmul.f32 %v2788_v31, %v1269_v6  ;;  %v1131_v35 = vadd.f32 %v1128_v20, %v1124_v7  ;;  %v2901_v7 = vstv %s2799_s18  ;;  %p2008_p12 = pnand %p2007_p8, %p2174_p9  ;;  %s2102_s18 = smov [#allocation9]  }
 0x156   : > { %s2010_s20 = sshll.u32 %s2102_s18, 4  ;;  %s2011_s20 = int_to_ptr.vmem [resolvable:$false] %s2010_s20 }
 0x157   : > { %v2832_v50 = vpop.permute.xlu1 %658  ;;  %v2834_v56 = vpop.permute.xlu0 %682  ;;  %v1137_v38 = vrot.slane %v1131_v35, 4  ;;  %p2009_p0 = pneg %p2008_p12  ;;  %s2012_s22 = scalar_lea.vmem %s2011_s20, 512 }
 0x158   : > { %3508 = vst [vmem:[#allocation30_spill] sm:$0xff] %v2834_v56  ;;  %v2918_v56 = vstv %s2830_s27  ;;  %p2013_p1 = scmp.lt.s32.totalorder %s3417_s8, %s2011_s20  ;;  %p2014_p3 = scmp.lt.s32.totalorder %s2012_s22, %s2006_s15 }
 0x159   : > { %1251 = vrot.lane.b32.xlu0 %v1245_v55, %s2100_s28  ;;  %1112 = vrot.lane.b32.xlu1 %v1104_v57, %s3502_s16  ;;  %v1354_v55 = vstv %s2750_s26  ;;  %v1271_v57 = vmul.f32 %v2857_v1, %v1269_v6  ;;  %s2923_s26 = sld [smem:[#allocation5 + $0x30]]  ;;  %v2929_v6 = vstv %s2866_s19 }
 0x15a   : > { %v1357_v51 = vmul.f32 %v2839_v61, %v1354_v55  ;;  %v1355_v0 = vmul.f32 %v2788_v31, %v1354_v55  ;;  %p2015_p5 = por %p2014_p3, %p2013_p1 }
 0x15b   : > { %v2876_v39 = vpop.permute.xlu1 %684  ;;  %v2878_v22 = vpop.permute.xlu0 %686 }
 0x15c   : > { %3509 = vst [vmem:[#allocation31_spill] sm:$0xff] %v2876_v39  ;;  %v2921_v39 = vstv %s2845_s13  ;;  %v2978_v11 = vadd.f32 %v1357_v51, %v1353_v32  ;;  %v1384_v32 = vmul.f32 %v2869_v45, %v2891_v28  ;;  %p2016_p6 = pnand %p2015_p5, %p2009_p0 }
 0x15d   : > { %1255 = vrot.lane.b32.xlu0 %v1247_v42, %s2100_s28  ;;  %1253 = vrot.lane.b32.xlu1 %v1246_v27, %s2100_s28  ;;  %v1274_v42 = vadd.f32 %v1271_v57, %v1267_v46  ;;  %v1273_v27 = vadd.f32 %v1270_v33, %v1266_v12  ;;  %v1136_v46 = vrot.slane %v1130_v36, 4  ;;  %v2932_v12 = vstv %s2874_s17 }
 0x15e   : > { %v1298_v57 = vmul.f32 %v2788_v31, %v2861_v52  ;;  %v1352_v36 = vmul.f32 %v2842_v60, %v2864_v9  ;;  %v1367_v2 = vrot.slane %v2978_v11, 4  ;;  %v332_v11 = vmul.f32 %v2839_v61, %v2826_v53 }
 0x15f   : > { %v2903_v14 = vpop.permute.xlu1 %710  ;;  %v2905_v20 = vpop.permute.xlu0 %712 }
 0x160   : > { %v1301_v15 = vadd.f32 %v1298_v57, %v1294_v47  ;;  %v326_v47 = vmul.f32 %v2869_v45, %v2819_v13  ;;  %v330_v57 = vmul.f32 %v2788_v31, %v2826_v53 }
 0x161   : > { %1281 = vrot.lane.b32.xlu0 %v1274_v42, %s2100_s28  ;;  %1279 = vrot.lane.b32.xlu1 %v1273_v27, %s2100_s28  ;;  %v1138_v42 = vsel %vm355_vm5, %v1136_v46, %v1137_v38  ;;  %v1139_v27 = vrot.slane %v1132_v10, 4  ;;  %v1356_v10 = vmul.f32 %v2857_v1, %v1354_v55  ;;  %v1351_v46 = vmul.f32 %v2869_v45, %v2864_v9 }
 0x162   : > { %v1385_v55 = vmul.f32 %v2842_v60, %v2891_v28 }
 0x163   : > { %v2934_v33 = vpop.permute.xlu1 %714  ;;  %v2936_v35 = vpop.permute.xlu0 %829  ;;  %v1140_v19 = vsel %vm355_vm5, %v1137_v38, %v1139_v27  ;;  %v1359_v9 = vadd.f32 %v1356_v10, %v1352_v36  ;;  %v2991_v38 = vstv %s2923_s26  ;;  %v1358_v51 = vadd.f32 %v1355_v0, %v1351_v46 }
 0x164   : > { %3510 = vst [vmem:[#allocation32_spill] sm:$0xff] %v2936_v35  ;;  %v3511_v35 = vstv %s2608_s6  ;;  %3514 = vst [vmem:[#allocation35_spill] sm:$0xff] %v2991_v38  ;;  %v1388_v36 = vmul.f32 %v2788_v31, %v2894_v62  ;;  %v1389_v27 = vmul.f32 %v2857_v1, %v2894_v62  ;;  %v1302_v10 = vadd.f32 %v1299_v8, %v1295_v63 }
 0x165   : > { %1141 = vrot.lane.b32.xlu0 %v1138_v42, %s3502_s16  ;;  %1283 = vrot.lane.b32.xlu1 %v1275_v37, %s2100_s28  ;;  %v2961_v49 = vmul.f32 %v2869_v45, %v3511_v35  ;;  %v1300_v35 = vmul.f32 %v2839_v61, %v2861_v52  ;;  %v1390_v0 = vmul.f32 %v2839_v61, %v2894_v62  ;;  %v3019_v63 = vstv %s2956_s30 }
 0x166   : > { %v342_v46 = vmul.f32 %v2869_v45, %v2765_v21  ;;  %v1392_v38 = vadd.f32 %v1389_v27, %v1385_v55  ;;  %3517 = vst [vmem:[#allocation38_spill] sm:$0xff] %v3019_v63  ;;  %v1364_v62 = vrot.slane %v1358_v51, 4  ;;  %v3519_v63 = vstv %s2612_s7 }
 0x167   : > { %v2967_v42 = vpop.permute.xlu1 %831  ;;  %v2969_v37 = vpop.permute.xlu0 %853  ;;  %v1303_v52 = vadd.f32 %v1300_v35, %v1296_v26  ;;  %v327_v26 = vmul.f32 %v2842_v60, %v2819_v13  ;;  %v1391_v35 = vadd.f32 %v1388_v36, %v1384_v32 }
 0x168   : > { %3512 = vst [vmem:[#allocation33_spill] sm:$0xff] %v2967_v42  ;;  %3513 = vst [vmem:[#allocation34_spill] sm:$0xff] %v2969_v37  ;;  %v1386_v37 = vmul.f32 %v2836_v58, %v2891_v28  ;;  %v1365_v42 = vrot.slane %v1359_v9, 4  ;;  %v328_v28 = vmul.f32 %v2836_v58, %v2819_v13  ;;  %v3518_v9 = vstv %s2612_s7  ;;  %s3239_s7 = sld [smem:[#allocation5 + $0x22]] }
 0x169   : > { %1307 = vrot.lane.b32.xlu0 %v1301_v15, %s2100_s28  ;;  %1143 = vrot.lane.b32.xlu1 %v1140_v19, %s3502_s16  ;;  %s3021_s16 = sld [smem:[#allocation5 + $0x37]]  ;;  %v3030_v55 = vmul.f32 %v2788_v31, %v3518_v9  ;;  %v1398_v36 = vrot.slane %v1392_v38, 4  ;;  %v1397_v38 = vrot.slane %v1391_v35, 4  ;;  %v344_v35 = vmul.f32 %v2836_v58, %v2765_v21 }
 0x16a   : > { %v1393_v27 = vadd.f32 %v1390_v0, %v1386_v37  ;;  %v1368_v51 = vsel %vm355_vm5, %v1365_v42, %v1367_v2  ;;  %v1366_v32 = vsel %vm355_vm5, %v1364_v62, %v1365_v42  ;;  %v369_v37 = vmul.f32 %v2842_v60, %v2785_v24 }
 0x16b   : > { %v3001_v15 = vpop.permute.xlu1 %855  ;;  %v3003_v19 = vpop.permute.xlu0 %857 }
 0x16c   : > { %3515 = vst [vmem:[#allocation36_spill] sm:$0xff] %v3001_v15  ;;  %3516 = vst [vmem:[#allocation37_spill] sm:$0xff] %v3003_v19  ;;  %v346_v15 = vmul.f32 %v2788_v31, %v2771_v23  ;;  %v333_v19 = vadd.f32 %v330_v57, %v326_v47  ;;  %v343_v47 = vmul.f32 %v2842_v60, %v2765_v21  ;;  %v3522_v21 = vstv %s2779_s1  ;;  %s3415_s1 = scalar_lea.hbm %s3468_s2, %s1880_s5 }
 0x16d   : > { %1311 = vrot.lane.b32.xlu0 %v1303_v52, %s2100_s28  ;;  %1309 = vrot.lane.b32.xlu1 %v1302_v10, %s2100_s28  ;;  %v331_v57 = vmul.f32 %v2857_v1, %v2826_v53  ;;  %v347_v10 = vmul.f32 %v2857_v1, %v2771_v23  ;;  %v3050_v53 = vmul.f32 %v2857_v1, %v3519_v63 }
 0x16e   : > { %v520_v52 = vadd.f32 %v2718_v59, %v333_v19  ;;  %v3045_v9 = vadd.f32 %v346_v15, %v342_v46  ;;  %v335_v19 = vadd.f32 %v332_v11, %v328_v28  ;;  %v370_v15 = vmul.f32 %v2836_v58, %v2785_v24 }
 0x16f   : > { %v3036_v8 = vpop.permute.xlu1 %881  ;;  %v3038_v13 = vpop.permute.xlu0 %883  ;;  %v334_v59 = vadd.f32 %v331_v57, %v327_v26  ;;  %v3056_v0 = vadd.f32 %v347_v10, %v343_v47  ;;  %v374_v46 = vmul.f32 %v2839_v61, %v2802_v43  ;;  %v1399_v11 = vsel %vm355_vm5, %v1397_v38, %v1398_v36 }
 0x170   : > { %v719_v42 = vadd.f32 %v2903_v14, %v520_v52  ;;  %v522_v28 = vadd.f32 %v2738_v34, %v335_v19  ;;  %v348_v47 = vmul.f32 %v2839_v61, %v2771_v23  ;;  %v3521_v57 = vstv %s2608_s6  ;;  %s2101_s6 = smov 122  }
 0x171   : > { %1371 = vrot.lane.b32.xlu0 %v1368_v51, %s2100_s28  ;;  %1369 = vrot.lane.b32.xlu1 %v1366_v32, %s2100_s28  ;;  %v1400_v51 = vrot.slane %v1393_v27, 4  ;;  %v521_v26 = vadd.f32 %v2736_v18, %v334_v59  ;;  %v283_v52 = vmul.f32 %v2842_v60, %v3521_v57  ;;  %v294_v34 = vmul.f32 %v2869_v45, %v2774_v54 }
 0x172   : > { %v721_v32 = vadd.f32 %v2934_v33, %v522_v28  ;;  %v1219_v10 = vmul.f32 %v2842_v60, %v3522_v21  ;;  %v3086_v23 = vadd.f32 %v374_v46, %v370_v15  ;;  %v296_v59 = vmul.f32 %v2836_v58, %v2774_v54 }
 0x173   : > { %v3062_v63 = vpop.permute.xlu1 %885  ;;  %v910_v62 = vpop.permute.xlu0 %909  ;;  %v720_v27 = vadd.f32 %v2905_v20, %v521_v26  ;;  %v3523_v38 = vmov %v3522_v21  ;;  %v1401_v33 = vsel %vm355_vm5, %v1398_v36, %v1400_v51  ;;  %v356_v46 = vrot.slane %v3045_v9, 4 }
 0x174   : > { %v3066_v14 = vadd.f32 %v910_v62, %v719_v42  ;;  %v3524_v62 = vstv %s2791_s9  ;;  %v300_v28 = vmul.f32 %v2839_v61, %v2782_v25  ;;  %v397_v21 = vmul.f32 %v2836_v58, %v2811_v3  ;;  %s1668_s9 = scalar_lea.sflag [#allocation8], %s2207_s21 }
 0x175   : > { %1402 = vrot.lane.b32.xlu0 %v1399_v11, %s2100_s28  ;;  %1373 = vrot.lane.b32.xlu1 %v1367_v2, %s2100_s28  ;;  %v1218_v2 = vmul.f32 %v2869_v45, %v3523_v38  ;;  %v1221_v11 = vmul.f32 %v2788_v31, %v3524_v62  ;;  %v3527_v26 = vmov %v3524_v62  ;;  %v401_v38 = vmul.f32 %v2839_v61, %v2816_v17 }
 0x176   : > { %3520 = vst [vmem:[#allocation39_spill] sm:$0xff] %v3066_v14  ;;  %v1222_v15 = vmul.f32 %v2857_v1, %v3527_v26  ;;  %v368_v9 = vmul.f32 %v2869_v45, %v2785_v24  ;;  %v1494_v26 = vmul.f32 %v2842_v60, %v2901_v7  ;;  %v3128_v18 = vadd.f32 %v348_v47, %v344_v35 }
 0x177   : > { %v912_v19 = vpop.permute.xlu1 %911  ;;  %v914_v42 = vpop.permute.xlu0 %913  ;;  %v1223_v62 = vadd.f32 %v1221_v11, %v1218_v2  ;;  %v373_v2 = vmul.f32 %v2857_v1, %v2802_v43  ;;  %v3137_v36 = vadd.f32 %v401_v38, %v397_v21  ;;  %v1498_v35 = vmul.f32 %v2857_v1, %v2910_v16 }
 0x178   : > { %v3096_v57 = vadd.f32 %v912_v19, %v720_v27  ;;  %v3098_v20 = vadd.f32 %v914_v42, %v721_v32  ;;  %v298_v27 = vmul.f32 %v2788_v31, %v2782_v25  ;;  %v1224_v32 = vadd.f32 %v1222_v15, %v1219_v10 }
 0x179   : > { %1406 = vrot.lane.b32.xlu0 %v1400_v51, %s2100_s28  ;;  %1404 = vrot.lane.b32.xlu1 %v1401_v33, %s2100_s28  ;;  %v1493_v51 = vmul.f32 %v2869_v45, %v2901_v7  ;;  %v1497_v33 = vmul.f32 %v2788_v31, %v2910_v16  ;;  %v372_v10 = vmul.f32 %v2788_v31, %v2802_v43 }
 0x17a   : > { %3525 = vst [vmem:[#allocation40_spill] sm:$0xff] %v3096_v57  ;;  %3526 = vst [vmem:[#allocation41_spill] sm:$0xff] %v3098_v20  ;;  %v303_v15 = vadd.f32 %v300_v28, %v296_v59  ;;  %v312_v24 = vmul.f32 %v2836_v58, %v2805_v44  ;;  %v316_v47 = vmul.f32 %v2839_v61, %v2808_v48  ;;  %v3529_v57 = vrot.slane %v3056_v0, 4 }
 0x17b   : > { %v3118_v19 = vpop.permute.xlu1 %1028  ;;  %v3120_v42 = vpop.permute.xlu0 %1030  ;;  %v1437_v43 = vmul.f32 %v2869_v45, %v2913_v4  ;;  %v1441_v59 = vmul.f32 %v2788_v31, %v2918_v56  ;;  %v1501_v38 = vadd.f32 %v1498_v35, %v1494_v26  ;;  %v1499_v11 = vmul.f32 %v2839_v61, %v2910_v16 }
 0x17c   : > { %v3161_v20 = vadd.f32 %v3030_v55, %v2961_v49  ;;  %v3166_v14 = vsel %vm355_vm5, %v356_v46, %v3529_v57  ;;  %v3171_v26 = vadd.f32 %v298_v27, %v294_v34  ;;  %v3530_v16 = vrot.slane %v3086_v23, 4 }
 0x17d   : > { %1229 = vrot.lane.b32.xlu0 %v1224_v32, %s2100_s28  ;;  %1227 = vrot.lane.b32.xlu1 %v1223_v62, %s2100_s28  ;;  %v1500_v32 = vadd.f32 %v1497_v33, %v1493_v51  ;;  %v1495_v62 = vmul.f32 %v2836_v58, %v2901_v7  ;;  %v359_v51 = vrot.slane %v3128_v18, 4  ;;  %v3174_v7 = vadd.f32 %v372_v10, %v368_v9 }
 0x17e   : > { %v3176_v33 = vadd.f32 %v373_v2, %v369_v37  ;;  %v391_v49 = vadd.f32 %v3530_v16, %v303_v15  ;;  %v3481_v55 = vrot.slane %v3137_v36, 4  ;;  %v1438_v34 = vmul.f32 %v2842_v60, %v2913_v4 }
 0x17f   : > { %v3151_v28 = vpop.permute.xlu1 %1052  ;;  %v3153_v21 = vpop.permute.xlu0 %1054  ;;  %v1502_v37 = vadd.f32 %v1499_v11, %v1495_v62  ;;  %v1439_v46 = vmul.f32 %v2836_v58, %v2913_v4  ;;  %v1443_v27 = vmul.f32 %v2839_v61, %v2918_v56  ;;  %v1323_v9 = vmul.f32 %v2842_v60, %v2929_v6 }
 0x180   : > { %3528 = vst [vmem:[#allocation42_spill] sm:$0xff] %v3151_v28  ;;  %v3169_v28 = vadd.f32 %v3050_v53, %v283_v52  ;;  %v319_v53 = vadd.f32 %v316_v47, %v312_v24  ;;  %v1444_v52 = vadd.f32 %v1441_v59, %v1437_v43  ;;  %v1442_v10 = vmul.f32 %v2857_v1, %v2918_v56 }
 0x181   : > { %1508 = vrot.lane.b32.xlu0 %v1501_v38, %s2101_s6  ;;  %1506 = vrot.lane.b32.xlu1 %v1500_v32, %s2101_s6  ;;  %v1465_v2 = vmul.f32 %v2869_v45, %v2921_v39  ;;  %v1469_v15 = vmul.f32 %v2788_v31, %v2926_v5  ;;  %v1466_v11 = vmul.f32 %v2842_v60, %v2921_v39  ;;  %v381_v4 = vrot.slane %v3174_v7, 4 }
 0x182   : > { %v1322_v35 = vmul.f32 %v2869_v45, %v2929_v6  ;;  %v1326_v56 = vmul.f32 %v2788_v31, %v2932_v12  ;;  %v1327_v24 = vmul.f32 %v2857_v1, %v2932_v12  ;;  %v418_v47 = vadd.f32 %v3481_v55, %v319_v53 }
 0x183   : > { %v3185_v18 = vpop.permute.xlu1 %1056  ;;  %v3187_v57 = vpop.permute.xlu0 %1080  ;;  %v1470_v43 = vmul.f32 %v2857_v1, %v2926_v5  ;;  %v1324_v59 = vmul.f32 %v2836_v58, %v2929_v6  ;;  %v1328_v38 = vmul.f32 %v2839_v61, %v2932_v12  ;;  %v1445_v7 = vadd.f32 %v1442_v10, %v1438_v34 }
 0x184   : > { %3531 = vst [vmem:[#allocation43_spill] sm:$0xff] %v3187_v57  ;;  %v1446_v16 = vadd.f32 %v1443_v27, %v1439_v46  ;;  %v1551_v53 = vmul.f32 %v2842_v60, %v2951_v40  ;;  %v1467_v57 = vmul.f32 %v2836_v58, %v2921_v39  ;;  %v1471_v6 = vmul.f32 %v2839_v61, %v2926_v5 }
 0x185   : > { %1450 = vrot.lane.b32.xlu0 %v1444_v52, %s2101_s6  ;;  %1510 = vrot.lane.b32.xlu1 %v1502_v37, %s2101_s6  ;;  %v3224_v52 = vadd.f32 %v1327_v24, %v1323_v9  ;;  %v1472_v37 = vadd.f32 %v1469_v15, %v1465_v2  ;;  %v1473_v55 = vadd.f32 %v1470_v43, %v1466_v11  ;;  %v382_v12 = vrot.slane %v3176_v33, 4  ;;  %v3537_v33 = vld [vmem:[#allocation20_spill] sm:$0xff] }
 0x186   : > { %v1329_v34 = vadd.f32 %v1326_v56, %v1322_v35  ;;  %v1550_v46 = vmul.f32 %v2869_v45, %v2951_v40  ;;  %v1555_v27 = vmul.f32 %v2857_v1, %v2954_v41  ;;  %v466_v39 = vadd.f32 %v2679_v30, %v391_v49 }
 0x187   : > { %v3220_v32 = vpop.permute.xlu1 %1082  ;;  %v3222_v62 = vpop.permute.xlu0 %1084  ;;  %v494_v9 = vadd.f32 %v2716_v29, %v418_v47  ;;  %v1331_v5 = vadd.f32 %v1328_v38, %v1324_v59  ;;  %v1554_v10 = vmul.f32 %v2788_v31, %v2954_v41  ;;  %v1336_v11 = vrot.slane %v3224_v52, 4 }
 0x188   : > { %v3246_v35 = vadd.f32 %v1555_v27, %v1551_v53  ;;  %v1552_v56 = vmul.f32 %v2836_v58, %v2951_v40  ;;  %v1556_v24 = vmul.f32 %v2839_v61, %v2954_v41  ;;  %v3532_v30 = vrot.slane %v3056_v0, 4 }
 0x189   : > { %1452 = vrot.lane.b32.xlu1 %v1445_v7, %s2101_s6  ;;  %1454 = vrot.lane.b32.xlu0 %v1446_v16, %s2101_s6  ;;  %v299_v49 = vmul.f32 %v2857_v1, %v2782_v25  ;;  %v383_v59 = vsel %vm355_vm5, %v381_v4, %v382_v12  ;;  %v295_v38 = vmul.f32 %v2842_v60, %v2774_v54  ;;  %v1335_v41 = vrot.slane %v1329_v34, 4  ;;  %v3534_v34 = vld [vmem:[#allocation38_spill] sm:$0xff] }
 0x18a   : > { %v360_v29 = vsel %vm355_vm5, %v3532_v30, %v359_v51  ;;  %v1474_v40 = vadd.f32 %v1471_v6, %v1467_v57  ;;  %v1338_v51 = vrot.slane %v1331_v5, 4  ;;  %v1557_v7 = vadd.f32 %v1554_v10, %v1550_v46  ;;  %v3535_v10 = vld [vmem:[#allocation37_spill] sm:$0xff] }
 0x18b   : > { %v578_v2 = vpop.permute.xlu1 %577  ;;  %v611_v15 = vpop.permute.xlu0 %610  ;;  %v1337_v52 = vsel %vm355_vm5, %v1335_v41, %v1336_v11  ;;  %v1564_v54 = vrot.slane %v3246_v35, 4  ;;  %v1559_v53 = vadd.f32 %v1556_v24, %v1552_v56  ;;  %v1587_v27 = vmul.f32 %v2788_v31, %v3534_v34 }
 0x18c   : > { %v584_v47 = vadd.f32 %v578_v2, %v466_v39  ;;  %v617_v43 = vadd.f32 %v611_v15, %v494_v9  ;;  %v1588_v39 = vmul.f32 %v2857_v1, %v3534_v34  ;;  %v1520_v9 = vstv %s3239_s7 }
 0x18d   : > { %1478 = vrot.lane.b32.xlu1 %v1472_v37, %s2101_s6  ;;  %1480 = vrot.lane.b32.xlu0 %v1473_v55, %s2101_s6  ;;  %v3533_v37 = vld [vmem:[#allocation35_spill] sm:$0xff]  ;;  %v396_v5 = vmul.f32 %v2842_v60, %v2811_v3  ;;  %v1563_v35 = vrot.slane %v1557_v7, 4  ;;  %v400_v56 = vmul.f32 %v2857_v1, %v2816_v17 }
 0x18e   : > { %v693_v0 = vadd.f32 %v2878_v22, %v617_v43  ;;  %v665_v25 = vadd.f32 %v2832_v50, %v584_v47  ;;  %v1584_v55 = vmul.f32 %v2842_v60, %v3533_v37  ;;  %v1585_v22 = vmul.f32 %v2836_v58, %v3533_v37 }
 0x18f   : > { %v810_v16 = vpop.permute.xlu1 %809  ;;  %v777_v4 = vpop.permute.xlu0 %776  ;;  %v1589_v50 = vmul.f32 %v2839_v61, %v3534_v34  ;;  %v1583_v46 = vmul.f32 %v2869_v45, %v3533_v37  ;;  %v1339_v47 = vsel %vm355_vm5, %v1336_v11, %v1338_v51  ;;  %v1566_v43 = vrot.slane %v1559_v53, 4 }
 0x190   : > { %v816_v57 = vadd.f32 %v810_v16, %v693_v0  ;;  %v783_v6 = vadd.f32 %v777_v4, %v665_v25  ;;  %v1565_v25 = vsel %vm355_vm5, %v1563_v35, %v1564_v54  ;;  %v395_v4 = vmul.f32 %v2869_v45, %v2811_v3 }
 0x191   : > { %1482 = vrot.lane.b32.xlu1 %v1474_v40, %s2101_s6  ;;  %1340 = vrot.lane.b32.xlu0 %v1337_v52, %s2100_s28  ;;  %v1591_v40 = vadd.f32 %v1588_v39, %v1584_v55  ;;  %v1592_v16 = vadd.f32 %v1589_v50, %v1585_v22  ;;  %v1590_v7 = vadd.f32 %v1587_v27, %v1583_v46  ;;  %v1524_v52 = vstv %s3264_s23 }
 0x192   : > { %v864_v2 = vadd.f32 %v3535_v10, %v783_v6  ;;  %v892_v15 = vadd.f32 %v3062_v63, %v816_v57  ;;  %v399_v63 = vmul.f32 %v2788_v31, %v2816_v17  ;;  %v363_v11 = vadd.f32 %v3166_v14, %v3161_v20 }
 0x193   : > { %v976_v24 = vpop.permute.xlu1 %975  ;;  %v1009_v30 = vpop.permute.xlu0 %1008  ;;  %v403_v51 = vadd.f32 %v400_v56, %v396_v5  ;;  %v364_v3 = vadd.f32 %v360_v29, %v3169_v28  ;;  %v389_v55 = vadd.f32 %v383_v59, %v3171_v26  ;;  %v302_v17 = vadd.f32 %v299_v49, %v295_v38 }
 0x194   : > { %v982_v41 = vadd.f32 %v976_v24, %v864_v2  ;;  %v1015_v0 = vadd.f32 %v1009_v30, %v892_v15  ;;  %v1597_v22 = vrot.slane %v1591_v40, 4  ;;  %v1567_v50 = vsel %vm355_vm5, %v1564_v54, %v1566_v43 }
 0x195   : > { %1342 = vrot.lane.b32.xlu1 %v1339_v47, %s2100_s28  ;;  %1568 = vrot.lane.b32.xlu0 %v1565_v25, %s2101_s6  ;;  %v1599_v46 = vrot.slane %v1592_v16, 4  ;;  %v1522_v14 = vmul.f32 %v2842_v60, %v1520_v9  ;;  %v3536_v20 = vrot.slane %v3086_v23, 4  ;;  %v402_v26 = vadd.f32 %v399_v63, %v395_v4  ;;  %v3542_v4 = vld [vmem:[#allocation21_spill] sm:$0xff] }
 0x196   : > { %v1063_v53 = vadd.f32 %v3185_v18, %v982_v41  ;;  %v3304_v37 = vadd.f32 %v3222_v62, %v1015_v0  ;;  %v311_v18 = vmul.f32 %v2842_v60, %v2805_v44  ;;  %v1596_v62 = vrot.slane %v1590_v7, 4  ;;  %v3543_v7 = vld [vmem:[#allocation22_spill] sm:$0xff] }
 0x197   : > { %v1175_v57 = vpop.permute.xlu1 %1174  ;;  %v547_v6 = vpop.permute.xlu0 %546  ;;  %v385_v28 = vsel %vm355_vm5, %v382_v12, %v3536_v20  ;;  %v409_v29 = vrot.slane %v403_v51, 4  ;;  %v1521_v49 = vmul.f32 %v2869_v45, %v1520_v9  ;;  %v1525_v59 = vmul.f32 %v2788_v31, %v1524_v52 }
 0x198   : > { %v3308_v34 = vadd.f32 %v1175_v57, %v1063_v53  ;;  %v1526_v23 = vmul.f32 %v2857_v1, %v1524_v52  ;;  %v437_v38 = vadd.f32 %v3537_v33, %v363_v11  ;;  %v1598_v27 = vsel %vm355_vm5, %v1596_v62, %v1597_v22 }
 0x199   : > { %1570 = vrot.lane.b32.xlu1 %v1567_v50, %s2101_s6  ;;  %1572 = vrot.lane.b32.xlu0 %v1566_v43, %s2101_s6  ;;  %v3538_v39 = vstv %s2993_s3  ;;  %v3539_v10 = vstv %s3021_s16  ;;  %v1600_v15 = vsel %vm355_vm5, %v1597_v22, %v1599_v46  ;;  %v1523_v56 = vmul.f32 %v2836_v58, %v1520_v9 }
 0x19a   : > { %v1417_v5 = vmul.f32 %v2869_v45, %v3538_v39  ;;  %v1420_v2 = vmul.f32 %v2788_v31, %v3539_v10  ;;  %v1529_v35 = vadd.f32 %v1526_v23, %v1522_v14  ;;  %v1527_v24 = vmul.f32 %v2839_v61, %v1524_v52  ;;  %v3545_v14 = vld [vmem:[#allocation26_spill] sm:$0xff] }
 0x19b   : > { %v545_v54 = vpop.permute.xlu1 %544  ;;  %v576_v12 = vpop.permute.xlu0 %575  ;;  %v310_v30 = vmul.f32 %v2869_v45, %v2805_v44  ;;  %v314_v47 = vmul.f32 %v2788_v31, %v2808_v48  ;;  %v315_v43 = vmul.f32 %v2857_v1, %v2808_v48  ;;  %v390_v40 = vadd.f32 %v385_v28, %v302_v17 }
 0x19c   : > { %v3540_v41 = vrot.slane %v3137_v36, 4  ;;  %v550_v9 = vadd.f32 %v545_v54, %v437_v38  ;;  %v1528_v61 = vadd.f32 %v1525_v59, %v1521_v49  ;;  %v408_v0 = vrot.slane %v402_v26, 4 }
 0x19d   : > { %1601 = vrot.lane.b32.xlu1 %v1598_v27, %s2101_s6  ;;  %1603 = vrot.lane.b32.xlu0 %v1600_v15, %s2101_s6  ;;  %v318_v44 = vadd.f32 %v315_v43, %v311_v18  ;;  %v1422_v31 = vadd.f32 %v1420_v2, %v1417_v5  ;;  %v3541_v16 = vmov %v3538_v39  ;;  %v438_v63 = vadd.f32 %v3542_v4, %v364_v3  ;;  %v3546_v3 = vld [vmem:[#allocation23_spill] sm:$0xff]  ;;  %v3549_v27 = vld [vmem:[#allocation28_spill] sm:$0xff]  ;;  %v3556_v4 = vld [vmem:[#allocation30_spill] sm:$0xff] }
 0x19e   : > { %v412_v58 = vsel %vm355_vm5, %v409_v29, %v3540_v41  ;;  %v1418_v48 = vmul.f32 %v2842_v60, %v3541_v16  ;;  %v464_v52 = vadd.f32 %v3543_v7, %v389_v55  ;;  %v1535_v11 = vrot.slane %v1529_v35, 4  ;;  %v3550_v5 = vld [vmem:[#allocation32_spill] sm:$0xff]  ;;  %v3553_v41 = vld [vmem:[#allocation31_spill] sm:$0xff] }
 0x19f   : > { %v574_v45 = vpop.permute.xlu1 %573  ;;  %v607_v25 = vpop.permute.xlu0 %606  ;;  %v1530_v51 = vadd.f32 %v1527_v24, %v1523_v56  ;;  %v410_v36 = vsel %vm355_vm5, %v408_v0, %v409_v29  ;;  %v417_v53 = vadd.f32 %v412_v58, %v318_v44  ;;  %v3544_v17 = vmov %v3539_v10  ;;  %v3547_v29 = vld [vmem:[#allocation25_spill] sm:$0xff]  ;;  %v3551_v35 = vld [vmem:[#allocation24_spill] sm:$0xff]  ;;  %v3555_v0 = vld [vmem:[#allocation34_spill] sm:$0xff] }
 0x1a0   : > { %v1421_v57 = vmul.f32 %v2857_v1, %v3544_v17  ;;  %v551_v22 = vadd.f32 %v547_v6, %v438_v63  ;;  %v582_v50 = vadd.f32 %v574_v45, %v464_v52  ;;  %v636_v60 = vadd.f32 %v3545_v14, %v550_v9  ;;  %v3548_v6 = vld [vmem:[#allocation27_spill] sm:$0xff]  ;;  %v3554_v9 = vld [vmem:[#allocation33_spill] sm:$0xff]  ;;  %v3557_v7 = vld [vmem:[#allocation36_spill] sm:$0xff] }
 0x1a1   : > { %1605 = vrot.lane.b32.xlu1 %v1599_v46, %s2101_s6  ;;  %1426 = vrot.lane.b32.xlu0 %v1422_v31, %s2101_s6  ;;  %v1534_v20 = vrot.slane %v1528_v61, 4  ;;  %v465_v28 = vadd.f32 %v3546_v3, %v390_v40  ;;  %v317_v55 = vadd.f32 %v314_v47, %v310_v30  ;;  %v493_v49 = vadd.f32 %v3547_v29, %v417_v53  ;;  %v3559_v29 = vld [vmem:[#allocation43_spill] sm:$0xff] }
 0x1a2   : > { %v1423_v62 = vadd.f32 %v1421_v57, %v1418_v48  ;;  %v1537_v23 = vrot.slane %v1530_v51, 4  ;;  %v637_v54 = vadd.f32 %v3548_v6, %v551_v22  ;;  %v663_v39 = vadd.f32 %v3549_v27, %v582_v50 }
 0x1a3   : > { %v609_v26 = vpop.permute.xlu1 %608  ;;  %v744_v18 = vpop.permute.xlu0 %743  ;;  %v1536_v46 = vsel %vm355_vm5, %v1534_v20, %v1535_v11  ;;  %v416_v33 = vadd.f32 %v410_v36, %v317_v55  ;;  %v583_v38 = vadd.f32 %v576_v12, %v465_v28  ;;  %v3552_v12 = vld [vmem:[#allocation29_spill] sm:$0xff] }
 0x1a4   : > { %v749_v59 = vadd.f32 %v744_v18, %v636_v60  ;;  %v616_v1 = vadd.f32 %v609_v26, %v493_v49  ;;  %v1538_v47 = vsel %vm355_vm5, %v1535_v11, %v1537_v23  ;;  %v3558_v18 = vld [vmem:[#allocation42_spill] sm:$0xff] }
 0x1a5   : > { %1428 = vrot.lane.b32.xlu1 %v1423_v62, %s2101_s6  ;;  %1539 = vrot.lane.b32.xlu0 %v1536_v46, %s2101_s6  ;;  %v492_v56 = vadd.f32 %v3551_v35, %v416_v33  ;;  %v664_v43 = vadd.f32 %v3552_v12, %v583_v38 }
 0x1a6   : > { %v835_v10 = vadd.f32 %v3550_v5, %v749_v59  ;;  %v692_v58 = vadd.f32 %v3553_v41, %v616_v1 }
 0x1a7   : > { %v746_v2 = vpop.permute.xlu1 %745  ;;  %v773_v15 = vpop.permute.xlu0 %772  ;;  %v615_v40 = vadd.f32 %v607_v25, %v492_v56 }
 0x1a8   : > { %v750_v24 = vadd.f32 %v746_v2, %v637_v54  ;;  %v781_v30 = vadd.f32 %v773_v15, %v663_v39  ;;  %v3561_v15 = vld [vmem:[#allocation40_spill] sm:$0xff] }
 0x1a9   : > { %1541 = vrot.lane.b32.xlu1 %v1538_v47, %s2101_s6  ;;  %v691_v63 = vadd.f32 %v3556_v4, %v615_v40 }
 0x1aa   : > { %v836_v61 = vadd.f32 %v3554_v9, %v750_v24  ;;  %v862_v44 = vadd.f32 %v3555_v0, %v781_v30  ;;  %v3562_v30 = vld [vmem:[#allocation41_spill] sm:$0xff] }
 0x1ab   : > { %v775_v45 = vpop.permute.xlu1 %774  ;;  %v808_v31 = vpop.permute.xlu0 %807 }
 0x1ac   : > { %v782_v16 = vadd.f32 %v775_v45, %v664_v43  ;;  %v815_v48 = vadd.f32 %v808_v31, %v692_v58 }
 0x1ae   : > { %v863_v52 = vadd.f32 %v3557_v7, %v782_v16  ;;  %v891_v11 = vadd.f32 %v3038_v13, %v815_v48 }
 0x1af   : > { %v806_v51 = vpop.permute.xlu1 %805  ;;  %v945_v36 = vpop.permute.xlu0 %944 }
 0x1b0   : > { %v814_v53 = vadd.f32 %v806_v51, %v691_v63  ;;  %v949_v25 = vadd.f32 %v945_v36, %v836_v61 }
 0x1b2   : > { %v890_v17 = vadd.f32 %v3036_v8, %v814_v53  ;;  %v3378_v57 = vadd.f32 %v3120_v42, %v949_v25 }
 0x1b3   : > { %v943_v22 = vpop.permute.xlu1 %942  ;;  %v974_v50 = vpop.permute.xlu0 %973 }
 0x1b4   : > { %v948_v14 = vadd.f32 %v943_v22, %v835_v10  ;;  %v981_v60 = vadd.f32 %v974_v50, %v863_v52  ;;  %v3560_v10 = vld [vmem:[#allocation39_spill] sm:$0xff] }
 0x1b6   : > { %v1062_v20 = vadd.f32 %v3153_v21, %v981_v60  ;;  %v3382_v3 = vadd.f32 %v3118_v19, %v948_v14 }
 0x1b7   : > { %v972_v28 = vpop.permute.xlu1 %971  ;;  %v1005_v13 = vpop.permute.xlu0 %1004 }
 0x1b8   : > { %v980_v55 = vadd.f32 %v972_v28, %v862_v44  ;;  %v1013_v26 = vadd.f32 %v1005_v13, %v890_v17 }
 0x1ba   : > { %v1061_v62 = vadd.f32 %v3558_v18, %v980_v55  ;;  %v1089_v8 = vadd.f32 %v3559_v29, %v1013_v26 }
 0x1bb   : > { %v1007_v49 = vpop.permute.xlu1 %1006  ;;  %v1173_v42 = vpop.permute.xlu0 %1172 }
 0x1bc   : > { %v1014_v59 = vadd.f32 %v1007_v49, %v891_v11  ;;  %v1180_v46 = vadd.f32 %v1173_v42, %v1062_v20 }
 0x1be   : > { %v1090_v23 = vadd.f32 %v3220_v32, %v1014_v59 }
 0x1bf   : > { %v1171_v33 = vpop.permute.xlu1 %1170  ;;  %v1204_v38 = vpop.permute.xlu0 %1203 }
 0x1c0   : > { %v1179_v21 = vadd.f32 %v1171_v33, %v1061_v62  ;;  %v1212_v1 = vadd.f32 %v1204_v38, %v1089_v8 }
 0x1c3   : > { %v1206_v19 = vpop.permute.xlu1 %1205  ;;  %v1208_v6 = vpop.permute.xlu0 %1207 }
 0x1c4   : > { %v1213_v54 = vadd.f32 %v1206_v19, %v1090_v23  ;;  %v3388_v27 = vadd.f32 %v1208_v6, %v3304_v37 }
 0x1c7   : > { %v1109_v39 = vpop.permute.xlu1 %1108  ;;  %v1111_v5 = vpop.permute.xlu0 %1110 }
 0x1c8   : > { %v1117_v2 = vadd.f32 %v1109_v39, %v3560_v10  ;;  %v1118_v35 = vadd.f32 %v1111_v5, %v3561_v15 }
 0x1cb   : > { %v1113_v56 = vpop.permute.xlu1 %1112  ;;  %v1252_v24 = vpop.permute.xlu0 %1251 }
 0x1cc   : > { %v1119_v32 = vadd.f32 %v1113_v56, %v3562_v30  ;;  %v1260_v47 = vadd.f32 %v1252_v24, %v1179_v21 }
 0x1cf   : > { %v1254_v12 = vpop.permute.xlu1 %1253  ;;  %v1256_v43 = vpop.permute.xlu0 %1255 }
 0x1d0   : > { %v1262_v40 = vadd.f32 %v1256_v43, %v3308_v34  ;;  %v1261_v59 = vadd.f32 %v1254_v12, %v1180_v46 }
 0x1d3   : > { %v1280_v41 = vpop.permute.xlu1 %1279  ;;  %v1282_v58 = vpop.permute.xlu0 %1281 }
 0x1d4   : > { %v1288_v39 = vadd.f32 %v1280_v41, %v1212_v1  ;;  %v1289_v5 = vadd.f32 %v1282_v58, %v1213_v54 }
 0x1d7   : > { %v1284_v9 = vpop.permute.xlu1 %1283  ;;  %v1142_v37 = vpop.permute.xlu0 %1141 }
 0x1db   : > { %v3394_v61 = vpop.permute.xlu1 %1143  ;;  %v1308_v0 = vpop.permute.xlu0 %1307 }
 0x1dc   : > { %v1316_v51 = vadd.f32 %v1308_v0, %v1117_v2  ;;  %v1290_v0 = vadd.f32 %v1284_v9, %v3388_v27  ;;  %v1148_v9 = vadd.f32 %v3394_v61, %v3378_v57 }
 0x1df   : > { %v1310_v44 = vpop.permute.xlu1 %1309  ;;  %v1312_v45 = vpop.permute.xlu0 %1311 }
 0x1e0   : > { %v1317_v34 = vadd.f32 %v1310_v44, %v1118_v35  ;;  %v1318_v22 = vadd.f32 %v1312_v45, %v1119_v32 }
 0x1e3   : > { %v1370_v31 = vpop.permute.xlu1 %1369  ;;  %v1372_v16 = vpop.permute.xlu0 %1371 }
 0x1e4   : > { %v1378_v23 = vadd.f32 %v1370_v31, %v1260_v47  ;;  %v1379_v21 = vadd.f32 %v1372_v16, %v1261_v59 }
 0x1e7   : > { %v1374_v48 = vpop.permute.xlu1 %1373  ;;  %v1403_v4 = vpop.permute.xlu0 %1402 }
 0x1e8   : > { %v1380_v19 = vadd.f32 %v1374_v48, %v1262_v40  ;;  %v1411_v35 = vadd.f32 %v1403_v4, %v1288_v39  ;;  %v1147_v40 = vadd.f32 %v1142_v37, %v3382_v3 }
 0x1eb   : > { %v1405_v63 = vpop.permute.xlu1 %1404  ;;  %v1407_v7 = vpop.permute.xlu0 %1406 }
 0x1ec   : > { %v1412_v30 = vadd.f32 %v1405_v63, %v1289_v5  ;;  %v1413_v1 = vadd.f32 %v1407_v7, %v1290_v0 }
 0x1ef   : > { %v1228_v52 = vpop.permute.xlu1 %1227  ;;  %v3396_v11 = vpop.permute.xlu0 %1229 }
 0x1f0   : > { %v1233_v4 = vadd.f32 %v1228_v52, %v1147_v40 }
 0x1f3   : > { %v1507_v36 = vpop.permute.xlu1 %1506  ;;  %v1509_v53 = vpop.permute.xlu0 %1508 }
 0x1f4   : > { %v1515_v25 = vadd.f32 %v1507_v36, %v1316_v51  ;;  %v1516_v17 = vadd.f32 %v1509_v53, %v1317_v34 }
 0x1f6   : > { %v1629_v50 = vrot.slane %v1515_v25, 1  ;;  %v1630_v14 = vrot.slane %v1516_v17, 1  ;;  %v1234_v25 = vadd.f32 %v3396_v11, %v1148_v9 }
 0x1f7   : > { %v1511_v60 = vpop.permute.xlu1 %1510  ;;  %v1451_v20 = vpop.permute.xlu0 %1450 }
 0x1f8   : > { %v1517_v28 = vadd.f32 %v1511_v60, %v1318_v22  ;;  %v1631_v13 = vsel %vm1616_vm6, %v1629_v50, %v1630_v14  ;;  %v1459_v6 = vadd.f32 %v1451_v20, %v1378_v23 }
 0x1fa   : > { %v1632_v55 = vrot.slane %v1517_v28, 1 }
 0x1fb   : > { %v1453_v26 = vpop.permute.xlu1 %1452  ;;  %v1455_v18 = vpop.permute.xlu0 %1454 }
 0x1fc   : > { %v1633_v62 = vsel %vm1616_vm6, %v1630_v14, %v1632_v55  ;;  %v1460_v10 = vadd.f32 %v1453_v26, %v1379_v21  ;;  %v1461_v2 = vadd.f32 %v1455_v18, %v1380_v19 }
 0x1ff   : > { %v1479_v29 = vpop.permute.xlu1 %1478  ;;  %v1481_v8 = vpop.permute.xlu0 %1480 }
 0x200   : > { %v1487_v46 = vadd.f32 %v1479_v29, %v1411_v35  ;;  %v1488_v47 = vadd.f32 %v1481_v8, %v1412_v30 }
 0x203   : > { %v1483_v49 = vpop.permute.xlu1 %1482  ;;  %v1341_v42 = vpop.permute.xlu0 %1340 }
 0x204   : > { %v1489_v63 = vadd.f32 %v1483_v49, %v1413_v1  ;;  %v1346_v3 = vadd.f32 %v1341_v42, %v1233_v4 }
 0x207   : > { %v1343_v33 = vpop.permute.xlu1 %1342  ;;  %v1569_v38 = vpop.permute.xlu0 %1568 }
 0x208   : > { %v1577_v15 = vadd.f32 %v1569_v38, %v1459_v6  ;;  %v1347_v60 = vadd.f32 %v1343_v33, %v1234_v25 }
 0x20a   : > { %v1617_v12 = vrot.slane %v1577_v15, 1 }
 0x20b   : > { %v1571_v56 = vpop.permute.xlu1 %1570  ;;  %v1573_v24 = vpop.permute.xlu0 %1572 }
 0x20c   : > { %v1578_v32 = vadd.f32 %v1571_v56, %v1460_v10  ;;  %v1579_v43 = vadd.f32 %v1573_v24, %v1461_v2 }
 0x20e   : > { %v1618_v44 = vrot.slane %v1578_v32, 1  ;;  %v1620_v45 = vrot.slane %v1579_v43, 1 }
 0x20f   : > { %v1602_v54 = vpop.permute.xlu1 %1601  ;;  %v1604_v41 = vpop.permute.xlu0 %1603 }
 0x210   : > { %v1610_v58 = vadd.f32 %v1602_v54, %v1487_v46  ;;  %v1611_v31 = vadd.f32 %v1604_v41, %v1488_v47  ;;  %v1619_v16 = vsel %vm1616_vm6, %v1617_v12, %v1618_v44  ;;  %v1621_v48 = vsel %vm1616_vm6, %v1618_v44, %v1620_v45 }
 0x212   : > { %v1637_v51 = vadd.f32 %v1631_v13, %v1610_v58  ;;  %v1638_v27 = vadd.f32 %v1633_v62, %v1611_v31 }
 0x213   : > { %v1606_v34 = vpop.permute.xlu1 %1605  ;;  %v1427_v36 = vpop.permute.xlu0 %1426 }
 0x214   : > { %v1644_v37 = vrot.slane %v1637_v51, 2  ;;  %v1645_v7 = vrot.slane %v1638_v27, 2  ;;  %v1612_v53 = vadd.f32 %v1606_v34, %v1489_v63  ;;  %v1432_v22 = vadd.f32 %v1427_v36, %v1346_v3 }
 0x216   : > { %v1639_v17 = vadd.f32 %v1632_v55, %v1612_v53  ;;  %v1646_v50 = vsel %vm1643_vm7, %v1644_v37, %v1645_v7 }
 0x217   : > { %v1429_v52 = vpop.permute.xlu1 %1428  ;;  %v1540_v14 = vpop.permute.xlu0 %1539 }
 0x218   : > { %v1647_v20 = vrot.slane %v1639_v17, 2  ;;  %v1545_v28 = vadd.f32 %v1540_v14, %v1432_v22  ;;  %v1433_v13 = vadd.f32 %v1429_v52, %v1347_v60 }
 0x21a   : > { %v1624_v57 = vadd.f32 %v1619_v16, %v1545_v28  ;;  %v1648_v61 = vsel %vm1643_vm7, %v1645_v7, %v1647_v20 }
 0x21b   : > { %v1542_v26 = vpop.permute.xlu1 %1541 }
 0x21c   : > { %v1651_v18 = vadd.f32 %v1646_v50, %v1624_v57  ;;  %v1546_v62 = vadd.f32 %v1542_v26, %v1433_v13 }
 0x21e   : > { %v1872_v29 = vmul.f32 -1.442695, %v1651_v18  ;;  %v1625_v11 = vadd.f32 %v1621_v48, %v1546_v62 }
 0x220   : > { %1956 = vpow2.f32 %v1872_v29  ;;  %v1652_v55 = vadd.f32 %v1648_v61, %v1625_v11 }
 0x222   : > { %v1873_v8 = vmul.f32 -1.442695, %v1652_v55 }
 0x224   : > { %1958 = vpow2.f32 %v1873_v8 }
 0x22d   : > { %v1957_v49 = vpop.eup %1956 }
 0x22e   : > { %v1659_v42 = vadd.f32 1.0, %v1957_v49 }
 0x230   : > { %1960 = vrcp.f32 %v1659_v42 }
 0x231   : > { %v1959_v59 = vpop.eup %1958 }
 0x232   : > { %v1660_v23 = vadd.f32 1.0, %v1959_v59 }
 0x234   : > { %1962 = vrcp.f32 %v1660_v23 }
 0x23d   : > { %v1961_v33 = vpop.eup %1960 }
 0x23e   : > { %1665 = vst.msk [vmem:[%s156_s25] sm:$0xff] %vm167_vm3, %v1961_v33 }
 0x241   : > { %v1963_v38 = vpop.eup %1962 }
 0x242   : > { %1666 = vst.msk [vmem:[%s156_s25 + $0x8] sm:$0xff] %vm167_vm3, %v1963_v38 }
 0x243   : > { %2019 = shalt.err (!%p2016_p6)
}
 0x244   : > { %s2020_s27 = scalar_lea.hbm %s3415_s1, 256  ;;  %s2024_s28 = scalar_lea.hbm %s3468_s2, 512 }
 0x245   : > { %p2021_p7 = scmp.ne.s32.totalorder %s3415_s1, %s2020_s27  ;;  %p2025_p13 = scmp.lt.s32.totalorder %s3415_s1, %s3468_s2 }
 0x246   : > { %p2026_p2 = scmp.lt.s32.totalorder %s2024_s28, %s2020_s27 }
 0x247   : > { %p2022_p10 = pnand %p2021_p7, %p2174_p9 }
 0x248   : > { %p2027_p8 = por %p2026_p2, %p2025_p13 }
 0x249   : > { %p2023_p4 = pneg %p2022_p10 }
 0x24b   : > { %p2028_p12 = pnand %p2027_p8, %p2023_p4 }
 0x24d   : > { %2031 = shalt.err (!%p2028_p12)
}
 0x24e   : > { %s2103_s10 = smov 128   ;;  %s2104_s29 = smov 8  }
 0x24f   : > { %1883 = dma.vmem_to_hbm [thread:$0]  (%p2174_p9), %s3417_s8, 256, %s3415_s1, %s1668_s9, %s2103_s10, %s2103_s10, %s2104_s29  }
 0x250 PF: > { %s3564_s30 = sld [smem:[#allocation16_spill]]  ;;  %s1696_s3 = sand.u32 1, %s2068_s12  }
 0x251   : > { %s1697_s16 = scalar_lea.sflag [#allocation8], %s1696_s3 }
 0x256   : > { %p3565_p0 = scmp.ge.s32.totalorder %s3564_s30, 2 }
 0x258   : > { %p1890_p1 = pnand %p3565_p0, %p2181_p11 }
 0x25a   : > { %p1891_p3 = pneg %p1890_p1 }
 0x25c   : > { %2063 = dma.done.wait (%p1891_p3), %s1697_s16, 256  }
 0x25d   : > { %2065 = vsyncadd (%p1891_p3), %s1697_s16, 4294967040  ;;  %s22_s17 = sadd.s32 1, %s3564_s30   ;;  %s3566_s12 = sld [smem:[#allocation13_spill]] }
 0x25e   : > { %p19_p5 = scmp.ge.s32.totalorder %s22_s17, 4   ;;  %s3567_s13 = sld [smem:[#allocation14_spill]] }
 0x25f   : > { %s3568_s14 = sld [smem:[#allocation18_spill]] }
 0x260   : > { %s3569_s15 = sld [smem:[#allocation15_spill]]  ;;  %21 = sbr.rel (!%p19_p5) target bundleno = 12 (0xc), region = 81 }
 0x261   : > { %s3570_s16 = sld [smem:[#allocation17_spill]] }
 0x265   :  { %1702 = vsyncpa [#allocation7], 1 }
 0x266   :  { %1704 = vsyncpa [#allocation7 + $0x1], 1 }
 0x267   :  { %1705 = vsyncpa [#allocation8], 1 }
 0x268   :  { %1707 = vsyncpa [#allocation8 + $0x1], 1 }

</bundles_post_ra>
